<compile_context>
chip_gen: v7x
topology: tpu7x:2x2x1
jax: 0.10.0
libtpu: 0.0.40
codegen_flags: <defaults>
</compile_context>

<pallas_src>
import functools

import numpy as np
import jax
import jax.numpy as jnp
from jax.experimental import pallas as pl
from jax.experimental.pallas import tpu as pltpu

_KEPS = 1e-8


def _raster_kernel(ng_ref, tab_ref, gyb_ref, tyb_ref, pix_ref, o_ref,
                   best_z_ref, *, D, stride, tile_r, U, n_groups):
    b = pl.program_id(0)
    ti = pl.program_id(1)

    xf = pix_ref[0]                       # (tile_r, 128) pixel NDC x
    yf = pix_ref[1]                       # (tile_r, 128) pixel NDC y
    tile_ylo = tyb_ref[2 * ti]
    tile_yhi = tyb_ref[2 * ti + 1]

    best_z_ref[...] = jnp.full((tile_r, 128), jnp.inf, jnp.float32)
    o_ref[...] = jnp.zeros((1, D + 1, tile_r, 128), jnp.float32)

    # dynamic bound: number of face groups that contain at least one active
    # (non-culled) face for this batch element (faces are compacted in the
    # wrapper so culled faces sit at the end).
    @pl.loop(0, ng_ref[b])
    def _(g):
        gi = b * n_groups + g
        gylo = gyb_ref[2 * gi]
        gyhi = gyb_ref[2 * gi + 1]

        # scalar group-bbox vs tile gate: skip all vector work when none of
        # the U faces of this group can cover a pixel of the current tile.
        @pl.when(jnp.logical_and(gyhi >= tile_ylo, gylo <= tile_yhi))
        def _():
            bz = best_z_ref[...]
            for u in range(U):                         # unrolled face bodies
                base = (gi * U + u) * stride
                # plane-coefficient edge functions (already divided by area)
                w0 = tab_ref[base + 0] * xf + tab_ref[base + 1] * yf + tab_ref[base + 2]
                w1 = tab_ref[base + 3] * xf + tab_ref[base + 4] * yf + tab_ref[base + 5]
                w2 = tab_ref[base + 6] * xf + tab_ref[base + 7] * yf + tab_ref[base + 8]
                pz = tab_ref[base + 9] * xf + tab_ref[base + 10] * yf + tab_ref[base + 11]
                # pz >= 0 is implied: wrapper culls zmin < kEps and backfaces,
                # so inside pixels of active faces always have pz > 0.
                win = (jnp.minimum(w0, jnp.minimum(w1, w2)) > 0.0) & (pz < bz)
                bz = jnp.where(win, pz, bz)
                # per-channel attribute planes folded in the wrapper
                # (two-pass scheme only needed on v5e for D >~ 8-10).
                for d in range(D):
                    abase = base + 12 + 3 * d
                    val = (tab_ref[abase] * xf + tab_ref[abase + 1] * yf
                           + tab_ref[abase + 2])
                    o_ref[0, d] = jnp.where(win, val, o_ref[0, d])
            best_z_ref[...] = bz

    # visibility mask derived once from the depth buffer
    o_ref[0, D] = (best_z_ref[...] < jnp.inf).astype(jnp.float32)


def rasterizer_forward(vertices, faces, attributes, image_size=64,
                       unroll=4, max_tile_rows=48):
    """Pallas implementation of Pytorch3dRasterizer.forward (square image).

    vertices:   [B, V, 3] float  (x, y, z in normalized image space)
    faces:      [B, F, 3] int
    attributes: [B, F, 3, D] float
    returns:    [B, D+1, H, W] float32 (interpolated attrs + vismask channel)
    """
    B, V, _ = vertices.shape
    F = faces.shape[1]
    D = attributes.shape[-1]
    H = W = image_size
    n_pix = H * W
    # TODO(synk): non-square (h, w) images and H*W not divisible by 128 would
    # need a padded pixel layout; the module's raster_settings fix the square
    # path exercised here.
    assert n_pix % 128 == 0, "H*W must be a multiple of 128"
    R = n_pix // 128

    # lane-dense pixel tiling: tiles of (tile_r, 128) flattened pixels.
    # tile_r capped at ~48 sublanes (vreg pressure is the ceiling, not VMEM)
    # while guaranteeing >= 2 grid steps so both v7x TensorCores stay busy.
    divs = [c for c in range(1, R + 1)
            if R % c == 0 and (c % 8 == 0 or c == R)]
    small = [c for c in divs if c <= max_tile_rows] or divs
    ok_c = [c for c in small if B * (R // c) >= 2] or small
    tile_r = max(ok_c)
    num_tiles = R // tile_r

    # pixel NDC coordinates (pytorch3d convention), flattened lane-dense.
    yi = jnp.arange(H, dtype=jnp.float32)
    xi = jnp.arange(W, dtype=jnp.float32)
    yrow = (2.0 * (H - 1.0 - yi) + 1.0) / H - 1.0
    xcol = (2.0 * (W - 1.0 - xi) + 1.0) / W - 1.0
    yf = jnp.broadcast_to(yrow[:, None], (H, W)).reshape(R, 128)
    xf = jnp.broadcast_to(xcol[None, :], (H, W)).reshape(R, 128)
    pix = jnp.stack([xf, yf], axis=0)                        # [2, R, 128]
    ytile = yf.reshape(num_tiles, tile_r * 128)
    tile_yb = jnp.stack([ytile.min(axis=1), ytile.max(axis=1)],
                        axis=1).reshape(-1)                  # [2 * num_tiles]

    # glue: negate x,y (fixed_vertices) and gather per-face vertex coords.
    fixed = vertices.astype(jnp.float32) * jnp.array([-1.0, -1.0, 1.0],
                                                     jnp.float32)
    fv = jax.vmap(lambda v, f: v[f])(fixed, faces)           # [B, F, 3, 3]
    v0, v1, v2 = fv[:, :, 0], fv[:, :, 1], fv[:, :, 2]

    # wrapper-side face culling: backface / zero-area (cull_backfaces=True),
    # any vertex behind camera (z < kEps), fully off-screen bbox.
    area = ((v2[..., 0] - v0[..., 0]) * (v1[..., 1] - v0[..., 1])
            - (v2[..., 1] - v0[..., 1]) * (v1[..., 0] - v0[..., 0]))
    zmin = jnp.min(fv[..., 2], axis=-1)
    xs, ys = fv[..., 0], fv[..., 1]
    off = ((xs.max(-1) < 1.0 / W - 1.0) | (xs.min(-1) > 1.0 - 1.0 / W) |
           (ys.max(-1) < 1.0 / H - 1.0) | (ys.min(-1) > 1.0 - 1.0 / H))
    face_ok = (area > _KEPS) & (zmin >= _KEPS) & (~off)      # [B, F]
    n_active = jnp.sum(face_ok, axis=-1).astype(jnp.int32)   # [B]

    # stable partition: active faces first, original relative order preserved
    # so nearest-face tie-breaking (first index wins) matches the reference.
    key = jnp.where(face_ok, 0, 1) * F + jnp.arange(F, dtype=jnp.int32)[None, :]
    perm = jnp.argsort(key, axis=-1)                         # [B, F]
    fv_s = jax.vmap(lambda a, p: a[p])(fv, perm)             # [B, F, 3, 3]
    at_s = jax.vmap(lambda a, p: a[p])(attributes.astype(jnp.float32), perm)
    ok_s = jax.vmap(lambda a, p: a[p])(face_ok, perm)        # [B, F]

    # per-face plane coefficients (already divided by the face area):
    #   w_i(x, y)  = A_i*x + B_i*y + C_i
    #   pz(x, y)   = Az*x + Bz*y + Cz
    #   val_d(x,y) = Px_d*x + Py_d*y + P0_d
    v0x, v0y, v0z = fv_s[:, :, 0, 0], fv_s[:, :, 0, 1], fv_s[:, :, 0, 2]
    v1x, v1y, v1z = fv_s[:, :, 1, 0], fv_s[:, :, 1, 1], fv_s[:, :, 1, 2]
    v2x, v2y, v2z = fv_s[:, :, 2, 0], fv_s[:, :, 2, 1], fv_s[:, :, 2, 2]
    area_s = (v2x - v0x) * (v1y - v0y) - (v2y - v0y) * (v1x - v0x)
    inv = 1.0 / (area_s + _KEPS)
    A0 = (v2y - v1y) * inv; B0 = (v1x - v2x) * inv; C0 = (v1y * v2x - v1x * v2y) * inv
    A1 = (v0y - v2y) * inv; B1 = (v2x - v0x) * inv; C1 = (v2y * v0x - v2x * v0y) * inv
    A2 = (v1y - v0y) * inv; B2 = (v0x - v1x) * inv; C2 = (v0y * v1x - v0x * v1y) * inv
    Az = A0 * v0z + A1 * v1z + A2 * v2z
    Bz = B0 * v0z + B1 * v1z + B2 * v2z
    Cz = C0 * v0z + C1 * v1z + C2 * v2z
    a0, a1, a2 = at_s[:, :, 0], at_s[:, :, 1], at_s[:, :, 2]   # [B, F, D]
    Px = A0[..., None] * a0 + A1[..., None] * a1 + A2[..., None] * a2
    Py = B0[..., None] * a0 + B1[..., None] * a1 + B2[..., None] * a2
    P0 = C0[..., None] * a0 + C1[..., None] * a1 + C2[..., None] * a2

    # zero out culled faces (min(w)=0 fails the coverage test) and give them
    # an empty y-bbox so they neither pollute group bboxes nor ever win.
    coeff = jnp.stack([A0, B0, C0, A1, B1, C1, A2, B2, C2, Az, Bz, Cz], axis=-1)
    coeff = jnp.where(ok_s[..., None], coeff, 0.0)           # [B, F, 12]
    aplanes = jnp.stack([Px, Py, P0], axis=-1)               # [B, F, D, 3]
    aplanes = jnp.where(ok_s[..., None, None], aplanes, 0.0).reshape(B, F, 3 * D)
    ylo = jnp.where(ok_s, fv_s[..., 1].min(axis=-1), 2.0)    # [B, F]
    yhi = jnp.where(ok_s, fv_s[..., 1].max(axis=-1), -2.0)

    stride = 12 + 3 * D
    tab_rows = jnp.concatenate([coeff, aplanes], axis=-1)    # [B, F, stride]

    # pad the face axis to a multiple of the unroll factor with harmless
    # all-zero faces (empty bbox, zero coefficients).
    U = max(1, int(unroll))
    F_pad = ((F + U - 1) // U) * U
    pad = F_pad - F
    if pad:
        tab_rows = jnp.pad(tab_rows, ((0, 0), (0, pad), (0, 0)))
        ylo = jnp.pad(ylo, ((0, 0), (0, pad)), constant_values=2.0)
        yhi = jnp.pad(yhi, ((0, 0), (0, pad)), constant_values=-2.0)
    n_groups = F_pad // U
    gylo = ylo.reshape(B, n_groups, U).min(axis=-1)
    gyhi = yhi.reshape(B, n_groups, U).max(axis=-1)
    gyb = jnp.stack([gylo, gyhi], axis=-1).reshape(-1)       # [B*n_groups*2]
    ng = ((n_active + U - 1) // U).astype(jnp.int32)         # [B] active groups
    tab = tab_rows.reshape(-1)                               # [B*F_pad*stride]
    # TODO(synk): for very large F the flat SMEM face table should be chunked
    # (extra "arbitrary" face-chunk grid axis or manual DMA) instead of being
    # fully resident; fine at the mesh sizes exercised here.

    kernel = functools.partial(_raster_kernel, D=D, stride=stride,
                               tile_r=tile_r, U=U, n_groups=n_groups)
    out = pl.pallas_call(
        kernel,
        out_shape=jax.ShapeDtypeStruct((B, D + 1, R, 128), jnp.float32),
        grid=(B, num_tiles),
        in_specs=[
            pl.BlockSpec(memory_space=pltpu.MemorySpace.SMEM),   # ng [B]
            pl.BlockSpec(memory_space=pltpu.MemorySpace.SMEM),   # face table 1D
            pl.BlockSpec(memory_space=pltpu.MemorySpace.SMEM),   # group y-bboxes
            pl.BlockSpec(memory_space=pltpu.MemorySpace.SMEM),   # tile y-bounds
            pl.BlockSpec((2, tile_r, 128), lambda b, t: (0, t, 0)),  # pixel NDC
        ],
        out_specs=pl.BlockSpec((1, D + 1, tile_r, 128),
                               lambda b, t: (b, 0, t, 0)),
        scratch_shapes=[pltpu.VMEM((tile_r, 128), jnp.float32)],  # depth buffer
        compiler_params=pltpu.CompilerParams(
            dimension_semantics=("parallel", "parallel")),
    )(ng, tab, gyb, tile_yb, pix)
    return out.reshape(B, D + 1, H, W)


def reference_forward(vertices, faces, attributes, image_size=64):
    """Pure-JAX reference with pytorch3d-style formulation (for validation)."""
    B, V, _ = vertices.shape
    F = faces.shape[1]
    D = attributes.shape[-1]
    H = W = image_size

    fixed = vertices.astype(jnp.float32) * jnp.array([-1.0, -1.0, 1.0], jnp.float32)
    fv = jax.vmap(lambda v, f: v[f])(fixed, faces)            # [B, F, 3, 3]
    v0, v1, v2 = fv[:, :, 0], fv[:, :, 1], fv[:, :, 2]

    yi = jnp.arange(H)
    xi = jnp.arange(W)
    yf = (2.0 * (H - 1 - yi) + 1.0) / H - 1.0
    xf = (2.0 * (W - 1 - xi) + 1.0) / W - 1.0
    PY = jnp.broadcast_to(yf[:, None], (H, W))[None, None]
    PX = jnp.broadcast_to(xf[None, :], (H, W))[None, None]

    def ef(px, py, ax, ay, bx, by):
        return (px - ax) * (by - ay) - (py - ay) * (bx - ax)

    def e(a):  # [B,F] -> [B,F,1,1]
        return a[:, :, None, None]

    area = ef(v2[..., 0], v2[..., 1], v0[..., 0], v0[..., 1], v1[..., 0], v1[..., 1])
    zmin = jnp.min(fv[..., 2], axis=-1)
    face_ok = (area > _KEPS) & (zmin >= _KEPS)
    inv = 1.0 / (area + _KEPS)

    w0 = ef(PX, PY, e(v1[..., 0]), e(v1[..., 1]), e(v2[..., 0]), e(v2[..., 1])) * e(inv)
    w1 = ef(PX, PY, e(v2[..., 0]), e(v2[..., 1]), e(v0[..., 0]), e(v0[..., 1])) * e(inv)
    w2 = ef(PX, PY, e(v0[..., 0]), e(v0[..., 1]), e(v1[..., 0]), e(v1[..., 1])) * e(inv)
    pz = w0 * e(v0[..., 2]) + w1 * e(v1[..., 2]) + w2 * e(v2[..., 2])

    inside = (w0 > 0.0) & (w1 > 0.0) & (w2 > 0.0)
    qual = inside & (pz >= 0.0) & e(face_ok)                  # [B,F,H,W]
    zq = jnp.where(qual, pz, jnp.inf)
    best = jnp.argmin(zq, axis=1)                             # [B,H,W]
    vis = jnp.any(qual, axis=1).astype(jnp.float32)           # [B,H,W]

    bary = jnp.stack([w0, w1, w2], axis=-1)                   # [B,F,H,W,3]
    idx = jnp.broadcast_to(best[:, None, :, :, None], (B, 1, H, W, 3))
    bary_best = jnp.take_along_axis(bary, idx, axis=1)[:, 0]  # [B,H,W,3]
    attr_best = jax.vmap(lambda a, i: a[i])(
        attributes.astype(jnp.float32), best.reshape(B, -1)
    ).reshape(B, H, W, 3, D)
    vals = (bary_best[..., None] * attr_best).sum(axis=-2)    # [B,H,W,D]
    vals = jnp.where(vis[..., None] > 0, vals, 0.0)
    return jnp.concatenate(
        [jnp.transpose(vals, (0, 3, 1, 2)), vis[:, None]], axis=1)


if __name__ == "__main__":
    key = jax.random.PRNGKey(0)
    B, V, F, D, image_size = 2, 64, 16, 4, 64
    k1, k2, k3, k4 = jax.random.split(key, 4)

    xy = jax.random.uniform(k1, (B, V, 2), minval=-0.9, maxval=0.9)
    z = jax.random.uniform(k2, (B, V, 1), minval=0.2, maxval=1.0)
    vertices = jnp.concatenate([xy, z], axis=-1)              # [B, V, 3]
    faces = jax.random.randint(k3, (B, F, 3), 0, V)           # [B, F, 3]
    attributes = jax.random.uniform(k4, (B, F, 3, D))         # [B, F, 3, D]

    out = rasterizer_forward(vertices, faces, attributes, image_size=image_size)
    out = jax.block_until_ready(out)
    assert out.shape == (B, D + 1, image_size, image_size)

    ref = reference_forward(vertices, faces, attributes, image_size=image_size)
    ref = jax.block_until_ready(ref)

    # Coverage-tolerant comparison (per review): the precomputed plane
    # coefficients round differently from the reference's (p-v)*(v-v) edge
    # functions, so a pixel lying essentially on an edge may flip coverage.
    # Require that at most a tiny number of pixels differ and that all other
    # pixels agree tightly.
    out_np = np.asarray(out)
    ref_np = np.asarray(ref)
    per_pix = np.abs(out_np - ref_np).max(axis=1)             # [B, H, W]
    bad = per_pix > 1e-3
    n_bad = int(bad.sum())
    assert n_bad <= max(8, int(0.002 * bad.size)), (
        f"too many mismatched pixels: {n_bad} / {bad.size}")
    np.testing.assert_allclose(
        np.where(bad[:, None, :, :], ref_np, out_np), ref_np,
        rtol=1e-4, atol=1e-4)

    # TODO(synk): faces_per_pixel>1, bin_size>0 (binned rasterization),
    # blur_radius>0 and the non-square (h, w) branch are not implemented;
    # raster_settings fix the square / K=1 / naive path used here.  For very
    # high per-tile face counts the edge/z planes could be evaluated on the
    # MXU ([x y 1] @ E for 128-face groups) — measure before committing.
    print("KERNEL_OK")
</pallas_src>

<mosaic_0001>
module attributes {stable_mosaic.version = 11 : i64} {
  func.func @_raster_kernel(%arg0: i32, %arg1: i32, %arg2: memref<2xi32, #tpu.memory_space<smem>>, %arg3: memref<768xf32, #tpu.memory_space<smem>>, %arg4: memref<16xf32, #tpu.memory_space<smem>>, %arg5: memref<2xf32, #tpu.memory_space<smem>>, %arg6: memref<2x32x128xf32, #tpu.memory_space<vmem>>, %arg7: memref<1x5x32x128xf32, #tpu.memory_space<vmem>>, %arg8: memref<32x128xf32, #tpu.memory_space<vmem>>) attributes {dimension_semantics = [#tpu.dimension_semantics<parallel>, #tpu.dimension_semantics<parallel>], iteration_bounds = array<i64: 2, 1>, scalar_prefetch = 0 : i64, scratch_operands = 1 : i64, tpu.core_type = #tpu.core_type<tc>, window_params = [{transform_indices = @transform_0, window_bounds = array<i64: 2>}, {transform_indices = @transform_1, window_bounds = array<i64: 768>}, {transform_indices = @transform_2, window_bounds = array<i64: 16>}, {transform_indices = @transform_3, window_bounds = array<i64: 2>}, {transform_indices = @transform_4, window_bounds = array<i64: 2, 32, 128>}, {transform_indices = @transform_5, window_bounds = array<i64: 1, 5, 32, 128>}]} {
    %c0 = arith.constant 0 : index
    %c0_0 = arith.constant 0 : index
    %c0_1 = arith.constant 0 : index
    %0 = vector.load %arg6[%c0, %c0_0, %c0_1] : memref<2x32x128xf32, #tpu.memory_space<vmem>>, vector<1x32x128xf32>
    %1 = vector.shape_cast %0 : vector<1x32x128xf32> to vector<32x128xf32>
    %c1 = arith.constant 1 : index
    %c0_2 = arith.constant 0 : index
    %c0_3 = arith.constant 0 : index
    %2 = vector.load %arg6[%c1, %c0_2, %c0_3] : memref<2x32x128xf32, #tpu.memory_space<vmem>>, vector<1x32x128xf32>
    %3 = vector.shape_cast %2 : vector<1x32x128xf32> to vector<32x128xf32>
    %c2_i32 = arith.constant 2 : i32
    %4 = arith.muli %c2_i32, %arg1 : i32
    %5 = arith.index_cast %4 : i32 to index
    %6 = memref.load %arg5[%5] : memref<2xf32, #tpu.memory_space<smem>>
    %c2_i32_4 = arith.constant 2 : i32
    %7 = arith.muli %c2_i32_4, %arg1 : i32
    %c1_i32 = arith.constant 1 : i32
    %8 = arith.addi %7, %c1_i32 : i32
    %9 = arith.index_cast %8 : i32 to index
    %10 = memref.load %arg5[%9] : memref<2xf32, #tpu.memory_space<smem>>
    %cst = arith.constant 0x7F800000 : f32
    %11 = vector.broadcast %cst : f32 to vector<32x128xf32>
    %c0_5 = arith.constant 0 : index
    %c0_6 = arith.constant 0 : index
    %12 = vector.load %arg8[%c0_5, %c0_6] : memref<32x128xf32, #tpu.memory_space<vmem>>, vector<32x128xf32>
    tpu.vector_store %arg8[%c0_5, %c0_6], %11 {strides = array<i32>} : memref<32x128xf32, #tpu.memory_space<vmem>>, vector<32x128xf32>,
    %cst_7 = arith.constant 0.000000e+00 : f32
    %13 = vector.broadcast %cst_7 : f32 to vector<1x5x32x128xf32>
    %c0_8 = arith.constant 0 : index
    %c0_9 = arith.constant 0 : index
    %c0_10 = arith.constant 0 : index
    %c0_11 = arith.constant 0 : index
    %14 = vector.load %arg7[%c0_8, %c0_9, %c0_10, %c0_11] : memref<1x5x32x128xf32, #tpu.memory_space<vmem>>, vector<1x5x32x128xf32>
    tpu.vector_store %arg7[%c0_8, %c0_9, %c0_10, %c0_11], %13 {strides = array<i32>} : memref<1x5x32x128xf32, #tpu.memory_space<vmem>>, vector<1x5x32x128xf32>,
    %15 = arith.index_cast %arg0 : i32 to index
    %16 = memref.load %arg2[%15] : memref<2xi32, #tpu.memory_space<smem>>
    %c0_i32 = arith.constant 0 : i32
    %17 = arith.subi %16, %c0_i32 : i32
    %c1_i32_12 = arith.constant 1 : i32
    %c1_i32_13 = arith.constant 1 : i32
    %18 = arith.subi %c1_i32_12, %c1_i32_13 : i32
    %19 = arith.addi %17, %18 : i32
    %c1_i32_14 = arith.constant 1 : i32
    %20 = arith.divsi %19, %c1_i32_14 : i32
    %c1_i32_15 = arith.constant 1 : i32
    %c0_i32_16 = arith.constant 0 : i32
    %c0_i32_17 = arith.constant 0 : i32
    %21 = arith.subi %20, %c0_i32_17 : i32
    %22 = arith.addi %c0_i32_17, %21 : i32
    %c1_i32_18 = arith.constant 1 : i32
    scf.for %arg9 = %c0_i32_17 to %22 step %c1_i32_18  : i32 {
      %31 = arith.muli %arg9, %c1_i32_15 : i32
      %32 = arith.addi %c0_i32_16, %31 : i32
      %c4_i32 = arith.constant 4 : i32
      %33 = arith.muli %arg0, %c4_i32 : i32
      %34 = arith.addi %33, %32 : i32
      %c2_i32_25 = arith.constant 2 : i32
      %35 = arith.muli %c2_i32_25, %34 : i32
      %36 = arith.index_cast %35 : i32 to index
      %37 = memref.load %arg4[%36] : memref<16xf32, #tpu.memory_space<smem>>
      %c2_i32_26 = arith.constant 2 : i32
      %38 = arith.muli %c2_i32_26, %34 : i32
      %c1_i32_27 = arith.constant 1 : i32
      %39 = arith.addi %38, %c1_i32_27 : i32
      %40 = arith.index_cast %39 : i32 to index
      %41 = memref.load %arg4[%40] : memref<16xf32, #tpu.memory_space<smem>>
      %42 = arith.cmpf oge, %41, %6 : f32
      %43 = arith.cmpf ole, %37, %10 : f32
      %44 = arith.andi %42, %43 : i1
      %45 = arith.extui %44 : i1 to i32
      %c0_i32_28 = arith.constant 0 : i32
      %46 = arith.cmpi ne, %45, %c0_i32_28 : i32
      scf.if %46 {
        %c0_29 = arith.constant 0 : index
        %c0_30 = arith.constant 0 : index
        %47 = vector.load %arg8[%c0_29, %c0_30] : memref<32x128xf32, #tpu.memory_space<vmem>>, vector<32x128xf32>
        %c4_i32_31 = arith.constant 4 : i32
        %48 = arith.muli %34, %c4_i32_31 : i32
        %c0_i32_32 = arith.constant 0 : i32
        %49 = arith.addi %48, %c0_i32_32 : i32
        %c24_i32 = arith.constant 24 : i32
        %50 = arith.muli %49, %c24_i32 : i32
        %c0_i32_33 = arith.constant 0 : i32
        %51 = arith.addi %50, %c0_i32_33 : i32
        %52 = arith.index_cast %51 : i32 to index
        %53 = memref.load %arg3[%52] : memref<768xf32, #tpu.memory_space<smem>>
        %54 = vector.broadcast %53 : f32 to vector<32x128xf32>
        %55 = arith.mulf %54, %1 : vector<32x128xf32>
        %c1_i32_34 = arith.constant 1 : i32
        %56 = arith.addi %50, %c1_i32_34 : i32
        %57 = arith.index_cast %56 : i32 to index
        %58 = memref.load %arg3[%57] : memref<768xf32, #tpu.memory_space<smem>>
        %59 = vector.broadcast %58 : f32 to vector<32x128xf32>
        %60 = arith.mulf %59, %3 : vector<32x128xf32>
        %61 = arith.addf %55, %60 : vector<32x128xf32>
        %c2_i32_35 = arith.constant 2 : i32
        %62 = arith.addi %50, %c2_i32_35 : i32
        %63 = arith.index_cast %62 : i32 to index
        %64 = memref.load %arg3[%63] : memref<768xf32, #tpu.memory_space<smem>>
        %65 = vector.broadcast %64 : f32 to vector<32x128xf32>
        %66 = arith.addf %61, %65 : vector<32x128xf32>
        %c3_i32 = arith.constant 3 : i32
        %67 = arith.addi %50, %c3_i32 : i32
        %68 = arith.index_cast %67 : i32 to index
        %69 = memref.load %arg3[%68] : memref<768xf32, #tpu.memory_space<smem>>
        %70 = vector.broadcast %69 : f32 to vector<32x128xf32>
        %71 = arith.mulf %70, %1 : vector<32x128xf32>
        %c4_i32_36 = arith.constant 4 : i32
        %72 = arith.addi %50, %c4_i32_36 : i32
        %73 = arith.index_cast %72 : i32 to index
        %74 = memref.load %arg3[%73] : memref<768xf32, #tpu.memory_space<smem>>
        %75 = vector.broadcast %74 : f32 to vector<32x128xf32>
        %76 = arith.mulf %75, %3 : vector<32x128xf32>
        %77 = arith.addf %71, %76 : vector<32x128xf32>
        %c5_i32 = arith.constant 5 : i32
        %78 = arith.addi %50, %c5_i32 : i32
        %79 = arith.index_cast %78 : i32 to index
        %80 = memref.load %arg3[%79] : memref<768xf32, #tpu.memory_space<smem>>
        %81 = vector.broadcast %80 : f32 to vector<32x128xf32>
        %82 = arith.addf %77, %81 : vector<32x128xf32>
        %c6_i32 = arith.constant 6 : i32
        %83 = arith.addi %50, %c6_i32 : i32
        %84 = arith.index_cast %83 : i32 to index
        %85 = memref.load %arg3[%84] : memref<768xf32, #tpu.memory_space<smem>>
        %86 = vector.broadcast %85 : f32 to vector<32x128xf32>
        %87 = arith.mulf %86, %1 : vector<32x128xf32>
        %c7_i32 = arith.constant 7 : i32
        %88 = arith.addi %50, %c7_i32 : i32
        %89 = arith.index_cast %88 : i32 to index
        %90 = memref.load %arg3[%89] : memref<768xf32, #tpu.memory_space<smem>>
        %91 = vector.broadcast %90 : f32 to vector<32x128xf32>
        %92 = arith.mulf %91, %3 : vector<32x128xf32>
        %93 = arith.addf %87, %92 : vector<32x128xf32>
        %c8_i32 = arith.constant 8 : i32
        %94 = arith.addi %50, %c8_i32 : i32
        %95 = arith.index_cast %94 : i32 to index
        %96 = memref.load %arg3[%95] : memref<768xf32, #tpu.memory_space<smem>>
        %97 = vector.broadcast %96 : f32 to vector<32x128xf32>
        %98 = arith.addf %93, %97 : vector<32x128xf32>
        %c9_i32 = arith.constant 9 : i32
        %99 = arith.addi %50, %c9_i32 : i32
        %100 = arith.index_cast %99 : i32 to index
        %101 = memref.load %arg3[%100] : memref<768xf32, #tpu.memory_space<smem>>
        %102 = vector.broadcast %101 : f32 to vector<32x128xf32>
        %103 = arith.mulf %102, %1 : vector<32x128xf32>
        %c10_i32 = arith.constant 10 : i32
        %104 = arith.addi %50, %c10_i32 : i32
        %105 = arith.index_cast %104 : i32 to index
        %106 = memref.load %arg3[%105] : memref<768xf32, #tpu.memory_space<smem>>
        %107 = vector.broadcast %106 : f32 to vector<32x128xf32>
        %108 = arith.mulf %107, %3 : vector<32x128xf32>
        %109 = arith.addf %103, %108 : vector<32x128xf32>
        %c11_i32 = arith.constant 11 : i32
        %110 = arith.addi %50, %c11_i32 : i32
        %111 = arith.index_cast %110 : i32 to index
        %112 = memref.load %arg3[%111] : memref<768xf32, #tpu.memory_space<smem>>
        %113 = vector.broadcast %112 : f32 to vector<32x128xf32>
        %114 = arith.addf %109, %113 : vector<32x128xf32>
        %115 = arith.minimumf %82, %98 : vector<32x128xf32>
        %116 = arith.minimumf %66, %115 : vector<32x128xf32>
        %cst_37 = arith.constant 0.000000e+00 : f32
        %117 = vector.broadcast %cst_37 : f32 to vector<32x128xf32>
        %118 = arith.cmpf ogt, %116, %117 : vector<32x128xf32>
        %119 = arith.cmpf olt, %114, %47 : vector<32x128xf32>
        %120 = arith.andi %118, %119 : vector<32x128xi1>
        %121 = arith.select %120, %114, %47 : vector<32x128xi1>, vector<32x128xf32>
        %c12_i32 = arith.constant 12 : i32
        %122 = arith.addi %50, %c12_i32 : i32
        %c0_i32_38 = arith.constant 0 : i32
        %123 = arith.addi %122, %c0_i32_38 : i32
        %124 = arith.index_cast %123 : i32 to index
        %125 = memref.load %arg3[%124] : memref<768xf32, #tpu.memory_space<smem>>
        %126 = vector.broadcast %125 : f32 to vector<32x128xf32>
        %127 = arith.mulf %126, %1 : vector<32x128xf32>
        %c1_i32_39 = arith.constant 1 : i32
        %128 = arith.addi %123, %c1_i32_39 : i32
        %129 = arith.index_cast %128 : i32 to index
        %130 = memref.load %arg3[%129] : memref<768xf32, #tpu.memory_space<smem>>
        %131 = vector.broadcast %130 : f32 to vector<32x128xf32>
        %132 = arith.mulf %131, %3 : vector<32x128xf32>
        %133 = arith.addf %127, %132 : vector<32x128xf32>
        %c2_i32_40 = arith.constant 2 : i32
        %134 = arith.addi %123, %c2_i32_40 : i32
        %135 = arith.index_cast %134 : i32 to index
        %136 = memref.load %arg3[%135] : memref<768xf32, #tpu.memory_space<smem>>
        %137 = vector.broadcast %136 : f32 to vector<32x128xf32>
        %138 = arith.addf %133, %137 : vector<32x128xf32>
        %c0_41 = arith.constant 0 : index
        %c0_42 = arith.constant 0 : index
        %c0_43 = arith.constant 0 : index
        %c0_44 = arith.constant 0 : index
        %139 = vector.load %arg7[%c0_41, %c0_42, %c0_43, %c0_44] : memref<1x5x32x128xf32, #tpu.memory_space<vmem>>, vector<1x1x32x128xf32>
        %140 = vector.shape_cast %139 : vector<1x1x32x128xf32> to vector<32x128xf32>
        %141 = arith.select %120, %138, %140 : vector<32x128xi1>, vector<32x128xf32>
        %c0_45 = arith.constant 0 : index
        %c0_46 = arith.constant 0 : index
        %c0_47 = arith.constant 0 : index
        %c0_48 = arith.constant 0 : index
        %142 = vector.load %arg7[%c0_45, %c0_46, %c0_47, %c0_48] : memref<1x5x32x128xf32, #tpu.memory_space<vmem>>, vector<1x1x32x128xf32>
        %143 = vector.shape_cast %142 : vector<1x1x32x128xf32> to vector<32x128xf32>
        %144 = vector.shape_cast %141 : vector<32x128xf32> to vector<1x1x32x128xf32>
        tpu.vector_store %arg7[%c0_45, %c0_46, %c0_47, %c0_48], %144 {strides = array<i32>} : memref<1x5x32x128xf32, #tpu.memory_space<vmem>>, vector<1x1x32x128xf32>,
        %c12_i32_49 = arith.constant 12 : i32
        %145 = arith.addi %50, %c12_i32_49 : i32
        %c3_i32_50 = arith.constant 3 : i32
        %146 = arith.addi %145, %c3_i32_50 : i32
        %147 = arith.index_cast %146 : i32 to index
        %148 = memref.load %arg3[%147] : memref<768xf32, #tpu.memory_space<smem>>
        %149 = vector.broadcast %148 : f32 to vector<32x128xf32>
        %150 = arith.mulf %149, %1 : vector<32x128xf32>
        %c1_i32_51 = arith.constant 1 : i32
        %151 = arith.addi %146, %c1_i32_51 : i32
        %152 = arith.index_cast %151 : i32 to index
        %153 = memref.load %arg3[%152] : memref<768xf32, #tpu.memory_space<smem>>
        %154 = vector.broadcast %153 : f32 to vector<32x128xf32>
        %155 = arith.mulf %154, %3 : vector<32x128xf32>
        %156 = arith.addf %150, %155 : vector<32x128xf32>
        %c2_i32_52 = arith.constant 2 : i32
        %157 = arith.addi %146, %c2_i32_52 : i32
        %158 = arith.index_cast %157 : i32 to index
        %159 = memref.load %arg3[%158] : memref<768xf32, #tpu.memory_space<smem>>
        %160 = vector.broadcast %159 : f32 to vector<32x128xf32>
        %161 = arith.addf %156, %160 : vector<32x128xf32>
        %c0_53 = arith.constant 0 : index
        %c1_54 = arith.constant 1 : index
        %c0_55 = arith.constant 0 : index
        %c0_56 = arith.constant 0 : index
        %162 = vector.load %arg7[%c0_53, %c1_54, %c0_55, %c0_56] : memref<1x5x32x128xf32, #tpu.memory_space<vmem>>, vector<1x1x32x128xf32>
        %163 = vector.shape_cast %162 : vector<1x1x32x128xf32> to vector<32x128xf32>
        %164 = arith.select %120, %161, %163 : vector<32x128xi1>, vector<32x128xf32>
        %c0_57 = arith.constant 0 : index
        %c1_58 = arith.constant 1 : index
        %c0_59 = arith.constant 0 : index
        %c0_60 = arith.constant 0 : index
        %165 = vector.load %arg7[%c0_57, %c1_58, %c0_59, %c0_60] : memref<1x5x32x128xf32, #tpu.memory_space<vmem>>, vector<1x1x32x128xf32>
        %166 = vector.shape_cast %165 : vector<1x1x32x128xf32> to vector<32x128xf32>
        %167 = vector.shape_cast %164 : vector<32x128xf32> to vector<1x1x32x128xf32>
        tpu.vector_store %arg7[%c0_57, %c1_58, %c0_59, %c0_60], %167 {strides = array<i32>} : memref<1x5x32x128xf32, #tpu.memory_space<vmem>>, vector<1x1x32x128xf32>,
        %c12_i32_61 = arith.constant 12 : i32
        %168 = arith.addi %50, %c12_i32_61 : i32
        %c6_i32_62 = arith.constant 6 : i32
        %169 = arith.addi %168, %c6_i32_62 : i32
        %170 = arith.index_cast %169 : i32 to index
        %171 = memref.load %arg3[%170] : memref<768xf32, #tpu.memory_space<smem>>
        %172 = vector.broadcast %171 : f32 to vector<32x128xf32>
        %173 = arith.mulf %172, %1 : vector<32x128xf32>
        %c1_i32_63 = arith.constant 1 : i32
        %174 = arith.addi %169, %c1_i32_63 : i32
        %175 = arith.index_cast %174 : i32 to index
        %176 = memref.load %arg3[%175] : memref<768xf32, #tpu.memory_space<smem>>
        %177 = vector.broadcast %176 : f32 to vector<32x128xf32>
        %178 = arith.mulf %177, %3 : vector<32x128xf32>
        %179 = arith.addf %173, %178 : vector<32x128xf32>
        %c2_i32_64 = arith.constant 2 : i32
        %180 = arith.addi %169, %c2_i32_64 : i32
        %181 = arith.index_cast %180 : i32 to index
        %182 = memref.load %arg3[%181] : memref<768xf32, #tpu.memory_space<smem>>
        %183 = vector.broadcast %182 : f32 to vector<32x128xf32>
        %184 = arith.addf %179, %183 : vector<32x128xf32>
        %c0_65 = arith.constant 0 : index
        %c2 = arith.constant 2 : index
        %c0_66 = arith.constant 0 : index
        %c0_67 = arith.constant 0 : index
        %185 = vector.load %arg7[%c0_65, %c2, %c0_66, %c0_67] : memref<1x5x32x128xf32, #tpu.memory_space<vmem>>, vector<1x1x32x128xf32>
        %186 = vector.shape_cast %185 : vector<1x1x32x128xf32> to vector<32x128xf32>
        %187 = arith.select %120, %184, %186 : vector<32x128xi1>, vector<32x128xf32>
        %c0_68 = arith.constant 0 : index
        %c2_69 = arith.constant 2 : index
        %c0_70 = arith.constant 0 : index
        %c0_71 = arith.constant 0 : index
        %188 = vector.load %arg7[%c0_68, %c2_69, %c0_70, %c0_71] : memref<1x5x32x128xf32, #tpu.memory_space<vmem>>, vector<1x1x32x128xf32>
        %189 = vector.shape_cast %188 : vector<1x1x32x128xf32> to vector<32x128xf32>
        %190 = vector.shape_cast %187 : vector<32x128xf32> to vector<1x1x32x128xf32>
        tpu.vector_store %arg7[%c0_68, %c2_69, %c0_70, %c0_71], %190 {strides = array<i32>} : memref<1x5x32x128xf32, #tpu.memory_space<vmem>>, vector<1x1x32x128xf32>,
        %c12_i32_72 = arith.constant 12 : i32
        %191 = arith.addi %50, %c12_i32_72 : i32
        %c9_i32_73 = arith.constant 9 : i32
        %192 = arith.addi %191, %c9_i32_73 : i32
        %193 = arith.index_cast %192 : i32 to index
        %194 = memref.load %arg3[%193] : memref<768xf32, #tpu.memory_space<smem>>
        %195 = vector.broadcast %194 : f32 to vector<32x128xf32>
        %196 = arith.mulf %195, %1 : vector<32x128xf32>
        %c1_i32_74 = arith.constant 1 : i32
        %197 = arith.addi %192, %c1_i32_74 : i32
        %198 = arith.index_cast %197 : i32 to index
        %199 = memref.load %arg3[%198] : memref<768xf32, #tpu.memory_space<smem>>
        %200 = vector.broadcast %199 : f32 to vector<32x128xf32>
        %201 = arith.mulf %200, %3 : vector<32x128xf32>
        %202 = arith.addf %196, %201 : vector<32x128xf32>
        %c2_i32_75 = arith.constant 2 : i32
        %203 = arith.addi %192, %c2_i32_75 : i32
        %204 = arith.index_cast %203 : i32 to index
        %205 = memref.load %arg3[%204] : memref<768xf32, #tpu.memory_space<smem>>
        %206 = vector.broadcast %205 : f32 to vector<32x128xf32>
        %207 = arith.addf %202, %206 : vector<32x128xf32>
        %c0_76 = arith.constant 0 : index
        %c3 = arith.constant 3 : index
        %c0_77 = arith.constant 0 : index
        %c0_78 = arith.constant 0 : index
        %208 = vector.load %arg7[%c0_76, %c3, %c0_77, %c0_78] : memref<1x5x32x128xf32, #tpu.memory_space<vmem>>, vector<1x1x32x128xf32>
        %209 = vector.shape_cast %208 : vector<1x1x32x128xf32> to vector<32x128xf32>
        %210 = arith.select %120, %207, %209 : vector<32x128xi1>, vector<32x128xf32>
        %c0_79 = arith.constant 0 : index
        %c3_80 = arith.constant 3 : index
        %c0_81 = arith.constant 0 : index
        %c0_82 = arith.constant 0 : index
        %211 = vector.load %arg7[%c0_79, %c3_80, %c0_81, %c0_82] : memref<1x5x32x128xf32, #tpu.memory_space<vmem>>, vector<1x1x32x128xf32>
        %212 = vector.shape_cast %211 : vector<1x1x32x128xf32> to vector<32x128xf32>
        %213 = vector.shape_cast %210 : vector<32x128xf32> to vector<1x1x32x128xf32>
        tpu.vector_store %arg7[%c0_79, %c3_80, %c0_81, %c0_82], %213 {strides = array<i32>} : memref<1x5x32x128xf32, #tpu.memory_space<vmem>>, vector<1x1x32x128xf32>,
        %c4_i32_83 = arith.constant 4 : i32
        %214 = arith.muli %34, %c4_i32_83 : i32
        %c1_i32_84 = arith.constant 1 : i32
        %215 = arith.addi %214, %c1_i32_84 : i32
        %c24_i32_85 = arith.constant 24 : i32
        %216 = arith.muli %215, %c24_i32_85 : i32
        %c0_i32_86 = arith.constant 0 : i32
        %217 = arith.addi %216, %c0_i32_86 : i32
        %218 = arith.index_cast %217 : i32 to index
        %219 = memref.load %arg3[%218] : memref<768xf32, #tpu.memory_space<smem>>
        %220 = vector.broadcast %219 : f32 to vector<32x128xf32>
        %221 = arith.mulf %220, %1 : vector<32x128xf32>
        %c1_i32_87 = arith.constant 1 : i32
        %222 = arith.addi %216, %c1_i32_87 : i32
        %223 = arith.index_cast %222 : i32 to index
        %224 = memref.load %arg3[%223] : memref<768xf32, #tpu.memory_space<smem>>
        %225 = vector.broadcast %224 : f32 to vector<32x128xf32>
        %226 = arith.mulf %225, %3 : vector<32x128xf32>
        %227 = arith.addf %221, %226 : vector<32x128xf32>
        %c2_i32_88 = arith.constant 2 : i32
        %228 = arith.addi %216, %c2_i32_88 : i32
        %229 = arith.index_cast %228 : i32 to index
        %230 = memref.load %arg3[%229] : memref<768xf32, #tpu.memory_space<smem>>
        %231 = vector.broadcast %230 : f32 to vector<32x128xf32>
        %232 = arith.addf %227, %231 : vector<32x128xf32>
        %c3_i32_89 = arith.constant 3 : i32
        %233 = arith.addi %216, %c3_i32_89 : i32
        %234 = arith.index_cast %233 : i32 to index
        %235 = memref.load %arg3[%234] : memref<768xf32, #tpu.memory_space<smem>>
        %236 = vector.broadcast %235 : f32 to vector<32x128xf32>
        %237 = arith.mulf %236, %1 : vector<32x128xf32>
        %c4_i32_90 = arith.constant 4 : i32
        %238 = arith.addi %216, %c4_i32_90 : i32
        %239 = arith.index_cast %238 : i32 to index
        %240 = memref.load %arg3[%239] : memref<768xf32, #tpu.memory_space<smem>>
        %241 = vector.broadcast %240 : f32 to vector<32x128xf32>
        %242 = arith.mulf %241, %3 : vector<32x128xf32>
        %243 = arith.addf %237, %242 : vector<32x128xf32>
        %c5_i32_91 = arith.constant 5 : i32
        %244 = arith.addi %216, %c5_i32_91 : i32
        %245 = arith.index_cast %244 : i32 to index
        %246 = memref.load %arg3[%245] : memref<768xf32, #tpu.memory_space<smem>>
        %247 = vector.broadcast %246 : f32 to vector<32x128xf32>
        %248 = arith.addf %243, %247 : vector<32x128xf32>
        %c6_i32_92 = arith.constant 6 : i32
        %249 = arith.addi %216, %c6_i32_92 : i32
        %250 = arith.index_cast %249 : i32 to index
        %251 = memref.load %arg3[%250] : memref<768xf32, #tpu.memory_space<smem>>
        %252 = vector.broadcast %251 : f32 to vector<32x128xf32>
        %253 = arith.mulf %252, %1 : vector<32x128xf32>
        %c7_i32_93 = arith.constant 7 : i32
        %254 = arith.addi %216, %c7_i32_93 : i32
        %255 = arith.index_cast %254 : i32 to index
        %256 = memref.load %arg3[%255] : memref<768xf32, #tpu.memory_space<smem>>
        %257 = vector.broadcast %256 : f32 to vector<32x128xf32>
        %258 = arith.mulf %257, %3 : vector<32x128xf32>
        %259 = arith.addf %253, %258 : vector<32x128xf32>
        %c8_i32_94 = arith.constant 8 : i32
        %260 = arith.addi %216, %c8_i32_94 : i32
        %261 = arith.index_cast %260 : i32 to index
        %262 = memref.load %arg3[%261] : memref<768xf32, #tpu.memory_space<smem>>
        %263 = vector.broadcast %262 : f32 to vector<32x128xf32>
        %264 = arith.addf %259, %263 : vector<32x128xf32>
        %c9_i32_95 = arith.constant 9 : i32
        %265 = arith.addi %216, %c9_i32_95 : i32
        %266 = arith.index_cast %265 : i32 to index
        %267 = memref.load %arg3[%266] : memref<768xf32, #tpu.memory_space<smem>>
        %268 = vector.broadcast %267 : f32 to vector<32x128xf32>
        %269 = arith.mulf %268, %1 : vector<32x128xf32>
        %c10_i32_96 = arith.constant 10 : i32
        %270 = arith.addi %216, %c10_i32_96 : i32
        %271 = arith.index_cast %270 : i32 to index
        %272 = memref.load %arg3[%271] : memref<768xf32, #tpu.memory_space<smem>>
        %273 = vector.broadcast %272 : f32 to vector<32x128xf32>
        %274 = arith.mulf %273, %3 : vector<32x128xf32>
        %275 = arith.addf %269, %274 : vector<32x128xf32>
        %c11_i32_97 = arith.constant 11 : i32
        %276 = arith.addi %216, %c11_i32_97 : i32
        %277 = arith.index_cast %276 : i32 to index
        %278 = memref.load %arg3[%277] : memref<768xf32, #tpu.memory_space<smem>>
        %279 = vector.broadcast %278 : f32 to vector<32x128xf32>
        %280 = arith.addf %275, %279 : vector<32x128xf32>
        %281 = arith.minimumf %248, %264 : vector<32x128xf32>
        %282 = arith.minimumf %232, %281 : vector<32x128xf32>
        %cst_98 = arith.constant 0.000000e+00 : f32
        %283 = vector.broadcast %cst_98 : f32 to vector<32x128xf32>
        %284 = arith.cmpf ogt, %282, %283 : vector<32x128xf32>
        %285 = arith.cmpf olt, %280, %121 : vector<32x128xf32>
        %286 = arith.andi %284, %285 : vector<32x128xi1>
        %287 = arith.select %286, %280, %121 : vector<32x128xi1>, vector<32x128xf32>
        %c12_i32_99 = arith.constant 12 : i32
        %288 = arith.addi %216, %c12_i32_99 : i32
        %c0_i32_100 = arith.constant 0 : i32
        %289 = arith.addi %288, %c0_i32_100 : i32
        %290 = arith.index_cast %289 : i32 to index
        %291 = memref.load %arg3[%290] : memref<768xf32, #tpu.memory_space<smem>>
        %292 = vector.broadcast %291 : f32 to vector<32x128xf32>
        %293 = arith.mulf %292, %1 : vector<32x128xf32>
        %c1_i32_101 = arith.constant 1 : i32
        %294 = arith.addi %289, %c1_i32_101 : i32
        %295 = arith.index_cast %294 : i32 to index
        %296 = memref.load %arg3[%295] : memref<768xf32, #tpu.memory_space<smem>>
        %297 = vector.broadcast %296 : f32 to vector<32x128xf32>
        %298 = arith.mulf %297, %3 : vector<32x128xf32>
        %299 = arith.addf %293, %298 : vector<32x128xf32>
        %c2_i32_102 = arith.constant 2 : i32
        %300 = arith.addi %289, %c2_i32_102 : i32
        %301 = arith.index_cast %300 : i32 to index
        %302 = memref.load %arg3[%301] : memref<768xf32, #tpu.memory_space<smem>>
        %303 = vector.broadcast %302 : f32 to vector<32x128xf32>
        %304 = arith.addf %299, %303 : vector<32x128xf32>
        %c0_103 = arith.constant 0 : index
        %c0_104 = arith.constant 0 : index
        %c0_105 = arith.constant 0 : index
        %c0_106 = arith.constant 0 : index
        %305 = vector.load %arg7[%c0_103, %c0_104, %c0_105, %c0_106] : memref<1x5x32x128xf32, #tpu.memory_space<vmem>>, vector<1x1x32x128xf32>
        %306 = vector.shape_cast %305 : vector<1x1x32x128xf32> to vector<32x128xf32>
        %307 = arith.select %286, %304, %306 : vector<32x128xi1>, vector<32x128xf32>
        %c0_107 = arith.constant 0 : index
        %c0_108 = arith.constant 0 : index
        %c0_109 = arith.constant 0 : index
        %c0_110 = arith.constant 0 : index
        %308 = vector.load %arg7[%c0_107, %c0_108, %c0_109, %c0_110] : memref<1x5x32x128xf32, #tpu.memory_space<vmem>>, vector<1x1x32x128xf32>
        %309 = vector.shape_cast %308 : vector<1x1x32x128xf32> to vector<32x128xf32>
        %310 = vector.shape_cast %307 : vector<32x128xf32> to vector<1x1x32x128xf32>
        tpu.vector_store %arg7[%c0_107, %c0_108, %c0_109, %c0_110], %310 {strides = array<i32>} : memref<1x5x32x128xf32, #tpu.memory_space<vmem>>, vector<1x1x32x128xf32>,
        %c12_i32_111 = arith.constant 12 : i32
        %311 = arith.addi %216, %c12_i32_111 : i32
        %c3_i32_112 = arith.constant 3 : i32
        %312 = arith.addi %311, %c3_i32_112 : i32
        %313 = arith.index_cast %312 : i32 to index
        %314 = memref.load %arg3[%313] : memref<768xf32, #tpu.memory_space<smem>>
        %315 = vector.broadcast %314 : f32 to vector<32x128xf32>
        %316 = arith.mulf %315, %1 : vector<32x128xf32>
        %c1_i32_113 = arith.constant 1 : i32
        %317 = arith.addi %312, %c1_i32_113 : i32
        %318 = arith.index_cast %317 : i32 to index
        %319 = memref.load %arg3[%318] : memref<768xf32, #tpu.memory_space<smem>>
        %320 = vector.broadcast %319 : f32 to vector<32x128xf32>
        %321 = arith.mulf %320, %3 : vector<32x128xf32>
        %322 = arith.addf %316, %321 : vector<32x128xf32>
        %c2_i32_114 = arith.constant 2 : i32
        %323 = arith.addi %312, %c2_i32_114 : i32
        %324 = arith.index_cast %323 : i32 to index
        %325 = memref.load %arg3[%324] : memref<768xf32, #tpu.memory_space<smem>>
        %326 = vector.broadcast %325 : f32 to vector<32x128xf32>
        %327 = arith.addf %322, %326 : vector<32x128xf32>
        %c0_115 = arith.constant 0 : index
        %c1_116 = arith.constant 1 : index
        %c0_117 = arith.constant 0 : index
        %c0_118 = arith.constant 0 : index
        %328 = vector.load %arg7[%c0_115, %c1_116, %c0_117, %c0_118] : memref<1x5x32x128xf32, #tpu.memory_space<vmem>>, vector<1x1x32x128xf32>
        %329 = vector.shape_cast %328 : vector<1x1x32x128xf32> to vector<32x128xf32>
        %330 = arith.select %286, %327, %329 : vector<32x128xi1>, vector<32x128xf32>
        %c0_119 = arith.constant 0 : index
        %c1_120 = arith.constant 1 : index
        %c0_121 = arith.constant 0 : index
        %c0_122 = arith.constant 0 : index
        %331 = vector.load %arg7[%c0_119, %c1_120, %c0_121, %c0_122] : memref<1x5x32x128xf32, #tpu.memory_space<vmem>>, vector<1x1x32x128xf32>
        %332 = vector.shape_cast %331 : vector<1x1x32x128xf32> to vector<32x128xf32>
        %333 = vector.shape_cast %330 : vector<32x128xf32> to vector<1x1x32x128xf32>
        tpu.vector_store %arg7[%c0_119, %c1_120, %c0_121, %c0_122], %333 {strides = array<i32>} : memref<1x5x32x128xf32, #tpu.memory_space<vmem>>, vector<1x1x32x128xf32>,
        %c12_i32_123 = arith.constant 12 : i32
        %334 = arith.addi %216, %c12_i32_123 : i32
        %c6_i32_124 = arith.constant 6 : i32
        %335 = arith.addi %334, %c6_i32_124 : i32
        %336 = arith.index_cast %335 : i32 to index
        %337 = memref.load %arg3[%336] : memref<768xf32, #tpu.memory_space<smem>>
        %338 = vector.broadcast %337 : f32 to vector<32x128xf32>
        %339 = arith.mulf %338, %1 : vector<32x128xf32>
        %c1_i32_125 = arith.constant 1 : i32
        %340 = arith.addi %335, %c1_i32_125 : i32
        %341 = arith.index_cast %340 : i32 to index
        %342 = memref.load %arg3[%341] : memref<768xf32, #tpu.memory_space<smem>>
        %343 = vector.broadcast %342 : f32 to vector<32x128xf32>
        %344 = arith.mulf %343, %3 : vector<32x128xf32>
        %345 = arith.addf %339, %344 : vector<32x128xf32>
        %c2_i32_126 = arith.constant 2 : i32
        %346 = arith.addi %335, %c2_i32_126 : i32
        %347 = arith.index_cast %346 : i32 to index
        %348 = memref.load %arg3[%347] : memref<768xf32, #tpu.memory_space<smem>>
        %349 = vector.broadcast %348 : f32 to vector<32x128xf32>
        %350 = arith.addf %345, %349 : vector<32x128xf32>
        %c0_127 = arith.constant 0 : index
        %c2_128 = arith.constant 2 : index
        %c0_129 = arith.constant 0 : index
        %c0_130 = arith.constant 0 : index
        %351 = vector.load %arg7[%c0_127, %c2_128, %c0_129, %c0_130] : memref<1x5x32x128xf32, #tpu.memory_space<vmem>>, vector<1x1x32x128xf32>
        %352 = vector.shape_cast %351 : vector<1x1x32x128xf32> to vector<32x128xf32>
        %353 = arith.select %286, %350, %352 : vector<32x128xi1>, vector<32x128xf32>
        %c0_131 = arith.constant 0 : index
        %c2_132 = arith.constant 2 : index
        %c0_133 = arith.constant 0 : index
        %c0_134 = arith.constant 0 : index
        %354 = vector.load %arg7[%c0_131, %c2_132, %c0_133, %c0_134] : memref<1x5x32x128xf32, #tpu.memory_space<vmem>>, vector<1x1x32x128xf32>
        %355 = vector.shape_cast %354 : vector<1x1x32x128xf32> to vector<32x128xf32>
        %356 = vector.shape_cast %353 : vector<32x128xf32> to vector<1x1x32x128xf32>
        tpu.vector_store %arg7[%c0_131, %c2_132, %c0_133, %c0_134], %356 {strides = array<i32>} : memref<1x5x32x128xf32, #tpu.memory_space<vmem>>, vector<1x1x32x128xf32>,
        %c12_i32_135 = arith.constant 12 : i32
        %357 = arith.addi %216, %c12_i32_135 : i32
        %c9_i32_136 = arith.constant 9 : i32
        %358 = arith.addi %357, %c9_i32_136 : i32
        %359 = arith.index_cast %358 : i32 to index
        %360 = memref.load %arg3[%359] : memref<768xf32, #tpu.memory_space<smem>>
        %361 = vector.broadcast %360 : f32 to vector<32x128xf32>
        %362 = arith.mulf %361, %1 : vector<32x128xf32>
        %c1_i32_137 = arith.constant 1 : i32
        %363 = arith.addi %358, %c1_i32_137 : i32
        %364 = arith.index_cast %363 : i32 to index
        %365 = memref.load %arg3[%364] : memref<768xf32, #tpu.memory_space<smem>>
        %366 = vector.broadcast %365 : f32 to vector<32x128xf32>
        %367 = arith.mulf %366, %3 : vector<32x128xf32>
        %368 = arith.addf %362, %367 : vector<32x128xf32>
        %c2_i32_138 = arith.constant 2 : i32
        %369 = arith.addi %358, %c2_i32_138 : i32
        %370 = arith.index_cast %369 : i32 to index
        %371 = memref.load %arg3[%370] : memref<768xf32, #tpu.memory_space<smem>>
        %372 = vector.broadcast %371 : f32 to vector<32x128xf32>
        %373 = arith.addf %368, %372 : vector<32x128xf32>
        %c0_139 = arith.constant 0 : index
        %c3_140 = arith.constant 3 : index
        %c0_141 = arith.constant 0 : index
        %c0_142 = arith.constant 0 : index
        %374 = vector.load %arg7[%c0_139, %c3_140, %c0_141, %c0_142] : memref<1x5x32x128xf32, #tpu.memory_space<vmem>>, vector<1x1x32x128xf32>
        %375 = vector.shape_cast %374 : vector<1x1x32x128xf32> to vector<32x128xf32>
        %376 = arith.select %286, %373, %375 : vector<32x128xi1>, vector<32x128xf32>
        %c0_143 = arith.constant 0 : index
        %c3_144 = arith.constant 3 : index
        %c0_145 = arith.constant 0 : index
        %c0_146 = arith.constant 0 : index
        %377 = vector.load %arg7[%c0_143, %c3_144, %c0_145, %c0_146] : memref<1x5x32x128xf32, #tpu.memory_space<vmem>>, vector<1x1x32x128xf32>
        %378 = vector.shape_cast %377 : vector<1x1x32x128xf32> to vector<32x128xf32>
        %379 = vector.shape_cast %376 : vector<32x128xf32> to vector<1x1x32x128xf32>
        tpu.vector_store %arg7[%c0_143, %c3_144, %c0_145, %c0_146], %379 {strides = array<i32>} : memref<1x5x32x128xf32, #tpu.memory_space<vmem>>, vector<1x1x32x128xf32>,
        %c4_i32_147 = arith.constant 4 : i32
        %380 = arith.muli %34, %c4_i32_147 : i32
        %c2_i32_148 = arith.constant 2 : i32
        %381 = arith.addi %380, %c2_i32_148 : i32
        %c24_i32_149 = arith.constant 24 : i32
        %382 = arith.muli %381, %c24_i32_149 : i32
        %c0_i32_150 = arith.constant 0 : i32
        %383 = arith.addi %382, %c0_i32_150 : i32
        %384 = arith.index_cast %383 : i32 to index
        %385 = memref.load %arg3[%384] : memref<768xf32, #tpu.memory_space<smem>>
        %386 = vector.broadcast %385 : f32 to vector<32x128xf32>
        %387 = arith.mulf %386, %1 : vector<32x128xf32>
        %c1_i32_151 = arith.constant 1 : i32
        %388 = arith.addi %382, %c1_i32_151 : i32
        %389 = arith.index_cast %388 : i32 to index
        %390 = memref.load %arg3[%389] : memref<768xf32, #tpu.memory_space<smem>>
        %391 = vector.broadcast %390 : f32 to vector<32x128xf32>
        %392 = arith.mulf %391, %3 : vector<32x128xf32>
        %393 = arith.addf %387, %392 : vector<32x128xf32>
        %c2_i32_152 = arith.constant 2 : i32
        %394 = arith.addi %382, %c2_i32_152 : i32
        %395 = arith.index_cast %394 : i32 to index
        %396 = memref.load %arg3[%395] : memref<768xf32, #tpu.memory_space<smem>>
        %397 = vector.broadcast %396 : f32 to vector<32x128xf32>
        %398 = arith.addf %393, %397 : vector<32x128xf32>
        %c3_i32_153 = arith.constant 3 : i32
        %399 = arith.addi %382, %c3_i32_153 : i32
        %400 = arith.index_cast %399 : i32 to index
        %401 = memref.load %arg3[%400] : memref<768xf32, #tpu.memory_space<smem>>
        %402 = vector.broadcast %401 : f32 to vector<32x128xf32>
        %403 = arith.mulf %402, %1 : vector<32x128xf32>
        %c4_i32_154 = arith.constant 4 : i32
        %404 = arith.addi %382, %c4_i32_154 : i32
        %405 = arith.index_cast %404 : i32 to index
        %406 = memref.load %arg3[%405] : memref<768xf32, #tpu.memory_space<smem>>
        %407 = vector.broadcast %406 : f32 to vector<32x128xf32>
        %408 = arith.mulf %407, %3 : vector<32x128xf32>
        %409 = arith.addf %403, %408 : vector<32x128xf32>
        %c5_i32_155 = arith.constant 5 : i32
        %410 = arith.addi %382, %c5_i32_155 : i32
        %411 = arith.index_cast %410 : i32 to index
        %412 = memref.load %arg3[%411] : memref<768xf32, #tpu.memory_space<smem>>
        %413 = vector.broadcast %412 : f32 to vector<32x128xf32>
        %414 = arith.addf %409, %413 : vector<32x128xf32>
        %c6_i32_156 = arith.constant 6 : i32
        %415 = arith.addi %382, %c6_i32_156 : i32
        %416 = arith.index_cast %415 : i32 to index
        %417 = memref.load %arg3[%416] : memref<768xf32, #tpu.memory_space<smem>>
        %418 = vector.broadcast %417 : f32 to vector<32x128xf32>
        %419 = arith.mulf %418, %1 : vector<32x128xf32>
        %c7_i32_157 = arith.constant 7 : i32
        %420 = arith.addi %382, %c7_i32_157 : i32
        %421 = arith.index_cast %420 : i32 to index
        %422 = memref.load %arg3[%421] : memref<768xf32, #tpu.memory_space<smem>>
        %423 = vector.broadcast %422 : f32 to vector<32x128xf32>
        %424 = arith.mulf %423, %3 : vector<32x128xf32>
        %425 = arith.addf %419, %424 : vector<32x128xf32>
        %c8_i32_158 = arith.constant 8 : i32
        %426 = arith.addi %382, %c8_i32_158 : i32
        %427 = arith.index_cast %426 : i32 to index
        %428 = memref.load %arg3[%427] : memref<768xf32, #tpu.memory_space<smem>>
        %429 = vector.broadcast %428 : f32 to vector<32x128xf32>
        %430 = arith.addf %425, %429 : vector<32x128xf32>
        %c9_i32_159 = arith.constant 9 : i32
        %431 = arith.addi %382, %c9_i32_159 : i32
        %432 = arith.index_cast %431 : i32 to index
        %433 = memref.load %arg3[%432] : memref<768xf32, #tpu.memory_space<smem>>
        %434 = vector.broadcast %433 : f32 to vector<32x128xf32>
        %435 = arith.mulf %434, %1 : vector<32x128xf32>
        %c10_i32_160 = arith.constant 10 : i32
        %436 = arith.addi %382, %c10_i32_160 : i32
        %437 = arith.index_cast %436 : i32 to index
        %438 = memref.load %arg3[%437] : memref<768xf32, #tpu.memory_space<smem>>
        %439 = vector.broadcast %438 : f32 to vector<32x128xf32>
        %440 = arith.mulf %439, %3 : vector<32x128xf32>
        %441 = arith.addf %435, %440 : vector<32x128xf32>
        %c11_i32_161 = arith.constant 11 : i32
        %442 = arith.addi %382, %c11_i32_161 : i32
        %443 = arith.index_cast %442 : i32 to index
        %444 = memref.load %arg3[%443] : memref<768xf32, #tpu.memory_space<smem>>
        %445 = vector.broadcast %444 : f32 to vector<32x128xf32>
        %446 = arith.addf %441, %445 : vector<32x128xf32>
        %447 = arith.minimumf %414, %430 : vector<32x128xf32>
        %448 = arith.minimumf %398, %447 : vector<32x128xf32>
        %cst_162 = arith.constant 0.000000e+00 : f32
        %449 = vector.broadcast %cst_162 : f32 to vector<32x128xf32>
        %450 = arith.cmpf ogt, %448, %449 : vector<32x128xf32>
        %451 = arith.cmpf olt, %446, %287 : vector<32x128xf32>
        %452 = arith.andi %450, %451 : vector<32x128xi1>
        %453 = arith.select %452, %446, %287 : vector<32x128xi1>, vector<32x128xf32>
        %c12_i32_163 = arith.constant 12 : i32
        %454 = arith.addi %382, %c12_i32_163 : i32
        %c0_i32_164 = arith.constant 0 : i32
        %455 = arith.addi %454, %c0_i32_164 : i32
        %456 = arith.index_cast %455 : i32 to index
        %457 = memref.load %arg3[%456] : memref<768xf32, #tpu.memory_space<smem>>
        %458 = vector.broadcast %457 : f32 to vector<32x128xf32>
        %459 = arith.mulf %458, %1 : vector<32x128xf32>
        %c1_i32_165 = arith.constant 1 : i32
        %460 = arith.addi %455, %c1_i32_165 : i32
        %461 = arith.index_cast %460 : i32 to index
        %462 = memref.load %arg3[%461] : memref<768xf32, #tpu.memory_space<smem>>
        %463 = vector.broadcast %462 : f32 to vector<32x128xf32>
        %464 = arith.mulf %463, %3 : vector<32x128xf32>
        %465 = arith.addf %459, %464 : vector<32x128xf32>
        %c2_i32_166 = arith.constant 2 : i32
        %466 = arith.addi %455, %c2_i32_166 : i32
        %467 = arith.index_cast %466 : i32 to index
        %468 = memref.load %arg3[%467] : memref<768xf32, #tpu.memory_space<smem>>
        %469 = vector.broadcast %468 : f32 to vector<32x128xf32>
        %470 = arith.addf %465, %469 : vector<32x128xf32>
        %c0_167 = arith.constant 0 : index
        %c0_168 = arith.constant 0 : index
        %c0_169 = arith.constant 0 : index
        %c0_170 = arith.constant 0 : index
        %471 = vector.load %arg7[%c0_167, %c0_168, %c0_169, %c0_170] : memref<1x5x32x128xf32, #tpu.memory_space<vmem>>, vector<1x1x32x128xf32>
        %472 = vector.shape_cast %471 : vector<1x1x32x128xf32> to vector<32x128xf32>
        %473 = arith.select %452, %470, %472 : vector<32x128xi1>, vector<32x128xf32>
        %c0_171 = arith.constant 0 : index
        %c0_172 = arith.constant 0 : index
        %c0_173 = arith.constant 0 : index
        %c0_174 = arith.constant 0 : index
        %474 = vector.load %arg7[%c0_171, %c0_172, %c0_173, %c0_174] : memref<1x5x32x128xf32, #tpu.memory_space<vmem>>, vector<1x1x32x128xf32>
        %475 = vector.shape_cast %474 : vector<1x1x32x128xf32> to vector<32x128xf32>
        %476 = vector.shape_cast %473 : vector<32x128xf32> to vector<1x1x32x128xf32>
        tpu.vector_store %arg7[%c0_171, %c0_172, %c0_173, %c0_174], %476 {strides = array<i32>} : memref<1x5x32x128xf32, #tpu.memory_space<vmem>>, vector<1x1x32x128xf32>,
        %c12_i32_175 = arith.constant 12 : i32
        %477 = arith.addi %382, %c12_i32_175 : i32
        %c3_i32_176 = arith.constant 3 : i32
        %478 = arith.addi %477, %c3_i32_176 : i32
        %479 = arith.index_cast %478 : i32 to index
        %480 = memref.load %arg3[%479] : memref<768xf32, #tpu.memory_space<smem>>
        %481 = vector.broadcast %480 : f32 to vector<32x128xf32>
        %482 = arith.mulf %481, %1 : vector<32x128xf32>
        %c1_i32_177 = arith.constant 1 : i32
        %483 = arith.addi %478, %c1_i32_177 : i32
        %484 = arith.index_cast %483 : i32 to index
        %485 = memref.load %arg3[%484] : memref<768xf32, #tpu.memory_space<smem>>
        %486 = vector.broadcast %485 : f32 to vector<32x128xf32>
        %487 = arith.mulf %486, %3 : vector<32x128xf32>
        %488 = arith.addf %482, %487 : vector<32x128xf32>
        %c2_i32_178 = arith.constant 2 : i32
        %489 = arith.addi %478, %c2_i32_178 : i32
        %490 = arith.index_cast %489 : i32 to index
        %491 = memref.load %arg3[%490] : memref<768xf32, #tpu.memory_space<smem>>
        %492 = vector.broadcast %491 : f32 to vector<32x128xf32>
        %493 = arith.addf %488, %492 : vector<32x128xf32>
        %c0_179 = arith.constant 0 : index
        %c1_180 = arith.constant 1 : index
        %c0_181 = arith.constant 0 : index
        %c0_182 = arith.constant 0 : index
        %494 = vector.load %arg7[%c0_179, %c1_180, %c0_181, %c0_182] : memref<1x5x32x128xf32, #tpu.memory_space<vmem>>, vector<1x1x32x128xf32>
        %495 = vector.shape_cast %494 : vector<1x1x32x128xf32> to vector<32x128xf32>
        %496 = arith.select %452, %493, %495 : vector<32x128xi1>, vector<32x128xf32>
        %c0_183 = arith.constant 0 : index
        %c1_184 = arith.constant 1 : index
        %c0_185 = arith.constant 0 : index
        %c0_186 = arith.constant 0 : index
        %497 = vector.load %arg7[%c0_183, %c1_184, %c0_185, %c0_186] : memref<1x5x32x128xf32, #tpu.memory_space<vmem>>, vector<1x1x32x128xf32>
        %498 = vector.shape_cast %497 : vector<1x1x32x128xf32> to vector<32x128xf32>
        %499 = vector.shape_cast %496 : vector<32x128xf32> to vector<1x1x32x128xf32>
        tpu.vector_store %arg7[%c0_183, %c1_184, %c0_185, %c0_186], %499 {strides = array<i32>} : memref<1x5x32x128xf32, #tpu.memory_space<vmem>>, vector<1x1x32x128xf32>,
        %c12_i32_187 = arith.constant 12 : i32
        %500 = arith.addi %382, %c12_i32_187 : i32
        %c6_i32_188 = arith.constant 6 : i32
        %501 = arith.addi %500, %c6_i32_188 : i32
        %502 = arith.index_cast %501 : i32 to index
        %503 = memref.load %arg3[%502] : memref<768xf32, #tpu.memory_space<smem>>
        %504 = vector.broadcast %503 : f32 to vector<32x128xf32>
        %505 = arith.mulf %504, %1 : vector<32x128xf32>
        %c1_i32_189 = arith.constant 1 : i32
        %506 = arith.addi %501, %c1_i32_189 : i32
        %507 = arith.index_cast %506 : i32 to index
        %508 = memref.load %arg3[%507] : memref<768xf32, #tpu.memory_space<smem>>
        %509 = vector.broadcast %508 : f32 to vector<32x128xf32>
        %510 = arith.mulf %509, %3 : vector<32x128xf32>
        %511 = arith.addf %505, %510 : vector<32x128xf32>
        %c2_i32_190 = arith.constant 2 : i32
        %512 = arith.addi %501, %c2_i32_190 : i32
        %513 = arith.index_cast %512 : i32 to index
        %514 = memref.load %arg3[%513] : memref<768xf32, #tpu.memory_space<smem>>
        %515 = vector.broadcast %514 : f32 to vector<32x128xf32>
        %516 = arith.addf %511, %515 : vector<32x128xf32>
        %c0_191 = arith.constant 0 : index
        %c2_192 = arith.constant 2 : index
        %c0_193 = arith.constant 0 : index
        %c0_194 = arith.constant 0 : index
        %517 = vector.load %arg7[%c0_191, %c2_192, %c0_193, %c0_194] : memref<1x5x32x128xf32, #tpu.memory_space<vmem>>, vector<1x1x32x128xf32>
        %518 = vector.shape_cast %517 : vector<1x1x32x128xf32> to vector<32x128xf32>
        %519 = arith.select %452, %516, %518 : vector<32x128xi1>, vector<32x128xf32>
        %c0_195 = arith.constant 0 : index
        %c2_196 = arith.constant 2 : index
        %c0_197 = arith.constant 0 : index
        %c0_198 = arith.constant 0 : index
        %520 = vector.load %arg7[%c0_195, %c2_196, %c0_197, %c0_198] : memref<1x5x32x128xf32, #tpu.memory_space<vmem>>, vector<1x1x32x128xf32>
        %521 = vector.shape_cast %520 : vector<1x1x32x128xf32> to vector<32x128xf32>
        %522 = vector.shape_cast %519 : vector<32x128xf32> to vector<1x1x32x128xf32>
        tpu.vector_store %arg7[%c0_195, %c2_196, %c0_197, %c0_198], %522 {strides = array<i32>} : memref<1x5x32x128xf32, #tpu.memory_space<vmem>>, vector<1x1x32x128xf32>,
        %c12_i32_199 = arith.constant 12 : i32
        %523 = arith.addi %382, %c12_i32_199 : i32
        %c9_i32_200 = arith.constant 9 : i32
        %524 = arith.addi %523, %c9_i32_200 : i32
        %525 = arith.index_cast %524 : i32 to index
        %526 = memref.load %arg3[%525] : memref<768xf32, #tpu.memory_space<smem>>
        %527 = vector.broadcast %526 : f32 to vector<32x128xf32>
        %528 = arith.mulf %527, %1 : vector<32x128xf32>
        %c1_i32_201 = arith.constant 1 : i32
        %529 = arith.addi %524, %c1_i32_201 : i32
        %530 = arith.index_cast %529 : i32 to index
        %531 = memref.load %arg3[%530] : memref<768xf32, #tpu.memory_space<smem>>
        %532 = vector.broadcast %531 : f32 to vector<32x128xf32>
        %533 = arith.mulf %532, %3 : vector<32x128xf32>
        %534 = arith.addf %528, %533 : vector<32x128xf32>
        %c2_i32_202 = arith.constant 2 : i32
        %535 = arith.addi %524, %c2_i32_202 : i32
        %536 = arith.index_cast %535 : i32 to index
        %537 = memref.load %arg3[%536] : memref<768xf32, #tpu.memory_space<smem>>
        %538 = vector.broadcast %537 : f32 to vector<32x128xf32>
        %539 = arith.addf %534, %538 : vector<32x128xf32>
        %c0_203 = arith.constant 0 : index
        %c3_204 = arith.constant 3 : index
        %c0_205 = arith.constant 0 : index
        %c0_206 = arith.constant 0 : index
        %540 = vector.load %arg7[%c0_203, %c3_204, %c0_205, %c0_206] : memref<1x5x32x128xf32, #tpu.memory_space<vmem>>, vector<1x1x32x128xf32>
        %541 = vector.shape_cast %540 : vector<1x1x32x128xf32> to vector<32x128xf32>
        %542 = arith.select %452, %539, %541 : vector<32x128xi1>, vector<32x128xf32>
        %c0_207 = arith.constant 0 : index
        %c3_208 = arith.constant 3 : index
        %c0_209 = arith.constant 0 : index
        %c0_210 = arith.constant 0 : index
        %543 = vector.load %arg7[%c0_207, %c3_208, %c0_209, %c0_210] : memref<1x5x32x128xf32, #tpu.memory_space<vmem>>, vector<1x1x32x128xf32>
        %544 = vector.shape_cast %543 : vector<1x1x32x128xf32> to vector<32x128xf32>
        %545 = vector.shape_cast %542 : vector<32x128xf32> to vector<1x1x32x128xf32>
        tpu.vector_store %arg7[%c0_207, %c3_208, %c0_209, %c0_210], %545 {strides = array<i32>} : memref<1x5x32x128xf32, #tpu.memory_space<vmem>>, vector<1x1x32x128xf32>,
        %c4_i32_211 = arith.constant 4 : i32
        %546 = arith.muli %34, %c4_i32_211 : i32
        %c3_i32_212 = arith.constant 3 : i32
        %547 = arith.addi %546, %c3_i32_212 : i32
        %c24_i32_213 = arith.constant 24 : i32
        %548 = arith.muli %547, %c24_i32_213 : i32
        %c0_i32_214 = arith.constant 0 : i32
        %549 = arith.addi %548, %c0_i32_214 : i32
        %550 = arith.index_cast %549 : i32 to index
        %551 = memref.load %arg3[%550] : memref<768xf32, #tpu.memory_space<smem>>
        %552 = vector.broadcast %551 : f32 to vector<32x128xf32>
        %553 = arith.mulf %552, %1 : vector<32x128xf32>
        %c1_i32_215 = arith.constant 1 : i32
        %554 = arith.addi %548, %c1_i32_215 : i32
        %555 = arith.index_cast %554 : i32 to index
        %556 = memref.load %arg3[%555] : memref<768xf32, #tpu.memory_space<smem>>
        %557 = vector.broadcast %556 : f32 to vector<32x128xf32>
        %558 = arith.mulf %557, %3 : vector<32x128xf32>
        %559 = arith.addf %553, %558 : vector<32x128xf32>
        %c2_i32_216 = arith.constant 2 : i32
        %560 = arith.addi %548, %c2_i32_216 : i32
        %561 = arith.index_cast %560 : i32 to index
        %562 = memref.load %arg3[%561] : memref<768xf32, #tpu.memory_space<smem>>
        %563 = vector.broadcast %562 : f32 to vector<32x128xf32>
        %564 = arith.addf %559, %563 : vector<32x128xf32>
        %c3_i32_217 = arith.constant 3 : i32
        %565 = arith.addi %548, %c3_i32_217 : i32
        %566 = arith.index_cast %565 : i32 to index
        %567 = memref.load %arg3[%566] : memref<768xf32, #tpu.memory_space<smem>>
        %568 = vector.broadcast %567 : f32 to vector<32x128xf32>
        %569 = arith.mulf %568, %1 : vector<32x128xf32>
        %c4_i32_218 = arith.constant 4 : i32
        %570 = arith.addi %548, %c4_i32_218 : i32
        %571 = arith.index_cast %570 : i32 to index
        %572 = memref.load %arg3[%571] : memref<768xf32, #tpu.memory_space<smem>>
        %573 = vector.broadcast %572 : f32 to vector<32x128xf32>
        %574 = arith.mulf %573, %3 : vector<32x128xf32>
        %575 = arith.addf %569, %574 : vector<32x128xf32>
        %c5_i32_219 = arith.constant 5 : i32
        %576 = arith.addi %548, %c5_i32_219 : i32
        %577 = arith.index_cast %576 : i32 to index
        %578 = memref.load %arg3[%577] : memref<768xf32, #tpu.memory_space<smem>>
        %579 = vector.broadcast %578 : f32 to vector<32x128xf32>
        %580 = arith.addf %575, %579 : vector<32x128xf32>
        %c6_i32_220 = arith.constant 6 : i32
        %581 = arith.addi %548, %c6_i32_220 : i32
        %582 = arith.index_cast %581 : i32 to index
        %583 = memref.load %arg3[%582] : memref<768xf32, #tpu.memory_space<smem>>
        %584 = vector.broadcast %583 : f32 to vector<32x128xf32>
        %585 = arith.mulf %584, %1 : vector<32x128xf32>
        %c7_i32_221 = arith.constant 7 : i32
        %586 = arith.addi %548, %c7_i32_221 : i32
        %587 = arith.index_cast %586 : i32 to index
        %588 = memref.load %arg3[%587] : memref<768xf32, #tpu.memory_space<smem>>
        %589 = vector.broadcast %588 : f32 to vector<32x128xf32>
        %590 = arith.mulf %589, %3 : vector<32x128xf32>
        %591 = arith.addf %585, %590 : vector<32x128xf32>
        %c8_i32_222 = arith.constant 8 : i32
        %592 = arith.addi %548, %c8_i32_222 : i32
        %593 = arith.index_cast %592 : i32 to index
        %594 = memref.load %arg3[%593] : memref<768xf32, #tpu.memory_space<smem>>
        %595 = vector.broadcast %594 : f32 to vector<32x128xf32>
        %596 = arith.addf %591, %595 : vector<32x128xf32>
        %c9_i32_223 = arith.constant 9 : i32
        %597 = arith.addi %548, %c9_i32_223 : i32
        %598 = arith.index_cast %597 : i32 to index
        %599 = memref.load %arg3[%598] : memref<768xf32, #tpu.memory_space<smem>>
        %600 = vector.broadcast %599 : f32 to vector<32x128xf32>
        %601 = arith.mulf %600, %1 : vector<32x128xf32>
        %c10_i32_224 = arith.constant 10 : i32
        %602 = arith.addi %548, %c10_i32_224 : i32
        %603 = arith.index_cast %602 : i32 to index
        %604 = memref.load %arg3[%603] : memref<768xf32, #tpu.memory_space<smem>>
        %605 = vector.broadcast %604 : f32 to vector<32x128xf32>
        %606 = arith.mulf %605, %3 : vector<32x128xf32>
        %607 = arith.addf %601, %606 : vector<32x128xf32>
        %c11_i32_225 = arith.constant 11 : i32
        %608 = arith.addi %548, %c11_i32_225 : i32
        %609 = arith.index_cast %608 : i32 to index
        %610 = memref.load %arg3[%609] : memref<768xf32, #tpu.memory_space<smem>>
        %611 = vector.broadcast %610 : f32 to vector<32x128xf32>
        %612 = arith.addf %607, %611 : vector<32x128xf32>
        %613 = arith.minimumf %580, %596 : vector<32x128xf32>
        %614 = arith.minimumf %564, %613 : vector<32x128xf32>
        %cst_226 = arith.constant 0.000000e+00 : f32
        %615 = vector.broadcast %cst_226 : f32 to vector<32x128xf32>
        %616 = arith.cmpf ogt, %614, %615 : vector<32x128xf32>
        %617 = arith.cmpf olt, %612, %453 : vector<32x128xf32>
        %618 = arith.andi %616, %617 : vector<32x128xi1>
        %619 = arith.select %618, %612, %453 : vector<32x128xi1>, vector<32x128xf32>
        %c12_i32_227 = arith.constant 12 : i32
        %620 = arith.addi %548, %c12_i32_227 : i32
        %c0_i32_228 = arith.constant 0 : i32
        %621 = arith.addi %620, %c0_i32_228 : i32
        %622 = arith.index_cast %621 : i32 to index
        %623 = memref.load %arg3[%622] : memref<768xf32, #tpu.memory_space<smem>>
        %624 = vector.broadcast %623 : f32 to vector<32x128xf32>
        %625 = arith.mulf %624, %1 : vector<32x128xf32>
        %c1_i32_229 = arith.constant 1 : i32
        %626 = arith.addi %621, %c1_i32_229 : i32
        %627 = arith.index_cast %626 : i32 to index
        %628 = memref.load %arg3[%627] : memref<768xf32, #tpu.memory_space<smem>>
        %629 = vector.broadcast %628 : f32 to vector<32x128xf32>
        %630 = arith.mulf %629, %3 : vector<32x128xf32>
        %631 = arith.addf %625, %630 : vector<32x128xf32>
        %c2_i32_230 = arith.constant 2 : i32
        %632 = arith.addi %621, %c2_i32_230 : i32
        %633 = arith.index_cast %632 : i32 to index
        %634 = memref.load %arg3[%633] : memref<768xf32, #tpu.memory_space<smem>>
        %635 = vector.broadcast %634 : f32 to vector<32x128xf32>
        %636 = arith.addf %631, %635 : vector<32x128xf32>
        %c0_231 = arith.constant 0 : index
        %c0_232 = arith.constant 0 : index
        %c0_233 = arith.constant 0 : index
        %c0_234 = arith.constant 0 : index
        %637 = vector.load %arg7[%c0_231, %c0_232, %c0_233, %c0_234] : memref<1x5x32x128xf32, #tpu.memory_space<vmem>>, vector<1x1x32x128xf32>
        %638 = vector.shape_cast %637 : vector<1x1x32x128xf32> to vector<32x128xf32>
        %639 = arith.select %618, %636, %638 : vector<32x128xi1>, vector<32x128xf32>
        %c0_235 = arith.constant 0 : index
        %c0_236 = arith.constant 0 : index
        %c0_237 = arith.constant 0 : index
        %c0_238 = arith.constant 0 : index
        %640 = vector.load %arg7[%c0_235, %c0_236, %c0_237, %c0_238] : memref<1x5x32x128xf32, #tpu.memory_space<vmem>>, vector<1x1x32x128xf32>
        %641 = vector.shape_cast %640 : vector<1x1x32x128xf32> to vector<32x128xf32>
        %642 = vector.shape_cast %639 : vector<32x128xf32> to vector<1x1x32x128xf32>
        tpu.vector_store %arg7[%c0_235, %c0_236, %c0_237, %c0_238], %642 {strides = array<i32>} : memref<1x5x32x128xf32, #tpu.memory_space<vmem>>, vector<1x1x32x128xf32>,
        %c12_i32_239 = arith.constant 12 : i32
        %643 = arith.addi %548, %c12_i32_239 : i32
        %c3_i32_240 = arith.constant 3 : i32
        %644 = arith.addi %643, %c3_i32_240 : i32
        %645 = arith.index_cast %644 : i32 to index
        %646 = memref.load %arg3[%645] : memref<768xf32, #tpu.memory_space<smem>>
        %647 = vector.broadcast %646 : f32 to vector<32x128xf32>
        %648 = arith.mulf %647, %1 : vector<32x128xf32>
        %c1_i32_241 = arith.constant 1 : i32
        %649 = arith.addi %644, %c1_i32_241 : i32
        %650 = arith.index_cast %649 : i32 to index
        %651 = memref.load %arg3[%650] : memref<768xf32, #tpu.memory_space<smem>>
        %652 = vector.broadcast %651 : f32 to vector<32x128xf32>
        %653 = arith.mulf %652, %3 : vector<32x128xf32>
        %654 = arith.addf %648, %653 : vector<32x128xf32>
        %c2_i32_242 = arith.constant 2 : i32
        %655 = arith.addi %644, %c2_i32_242 : i32
        %656 = arith.index_cast %655 : i32 to index
        %657 = memref.load %arg3[%656] : memref<768xf32, #tpu.memory_space<smem>>
        %658 = vector.broadcast %657 : f32 to vector<32x128xf32>
        %659 = arith.addf %654, %658 : vector<32x128xf32>
        %c0_243 = arith.constant 0 : index
        %c1_244 = arith.constant 1 : index
        %c0_245 = arith.constant 0 : index
        %c0_246 = arith.constant 0 : index
        %660 = vector.load %arg7[%c0_243, %c1_244, %c0_245, %c0_246] : memref<1x5x32x128xf32, #tpu.memory_space<vmem>>, vector<1x1x32x128xf32>
        %661 = vector.shape_cast %660 : vector<1x1x32x128xf32> to vector<32x128xf32>
        %662 = arith.select %618, %659, %661 : vector<32x128xi1>, vector<32x128xf32>
        %c0_247 = arith.constant 0 : index
        %c1_248 = arith.constant 1 : index
        %c0_249 = arith.constant 0 : index
        %c0_250 = arith.constant 0 : index
        %663 = vector.load %arg7[%c0_247, %c1_248, %c0_249, %c0_250] : memref<1x5x32x128xf32, #tpu.memory_space<vmem>>, vector<1x1x32x128xf32>
        %664 = vector.shape_cast %663 : vector<1x1x32x128xf32> to vector<32x128xf32>
        %665 = vector.shape_cast %662 : vector<32x128xf32> to vector<1x1x32x128xf32>
        tpu.vector_store %arg7[%c0_247, %c1_248, %c0_249, %c0_250], %665 {strides = array<i32>} : memref<1x5x32x128xf32, #tpu.memory_space<vmem>>, vector<1x1x32x128xf32>,
        %c12_i32_251 = arith.constant 12 : i32
        %666 = arith.addi %548, %c12_i32_251 : i32
        %c6_i32_252 = arith.constant 6 : i32
        %667 = arith.addi %666, %c6_i32_252 : i32
        %668 = arith.index_cast %667 : i32 to index
        %669 = memref.load %arg3[%668] : memref<768xf32, #tpu.memory_space<smem>>
        %670 = vector.broadcast %669 : f32 to vector<32x128xf32>
        %671 = arith.mulf %670, %1 : vector<32x128xf32>
        %c1_i32_253 = arith.constant 1 : i32
        %672 = arith.addi %667, %c1_i32_253 : i32
        %673 = arith.index_cast %672 : i32 to index
        %674 = memref.load %arg3[%673] : memref<768xf32, #tpu.memory_space<smem>>
        %675 = vector.broadcast %674 : f32 to vector<32x128xf32>
        %676 = arith.mulf %675, %3 : vector<32x128xf32>
        %677 = arith.addf %671, %676 : vector<32x128xf32>
        %c2_i32_254 = arith.constant 2 : i32
        %678 = arith.addi %667, %c2_i32_254 : i32
        %679 = arith.index_cast %678 : i32 to index
        %680 = memref.load %arg3[%679] : memref<768xf32, #tpu.memory_space<smem>>
        %681 = vector.broadcast %680 : f32 to vector<32x128xf32>
        %682 = arith.addf %677, %681 : vector<32x128xf32>
        %c0_255 = arith.constant 0 : index
        %c2_256 = arith.constant 2 : index
        %c0_257 = arith.constant 0 : index
        %c0_258 = arith.constant 0 : index
        %683 = vector.load %arg7[%c0_255, %c2_256, %c0_257, %c0_258] : memref<1x5x32x128xf32, #tpu.memory_space<vmem>>, vector<1x1x32x128xf32>
        %684 = vector.shape_cast %683 : vector<1x1x32x128xf32> to vector<32x128xf32>
        %685 = arith.select %618, %682, %684 : vector<32x128xi1>, vector<32x128xf32>
        %c0_259 = arith.constant 0 : index
        %c2_260 = arith.constant 2 : index
        %c0_261 = arith.constant 0 : index
        %c0_262 = arith.constant 0 : index
        %686 = vector.load %arg7[%c0_259, %c2_260, %c0_261, %c0_262] : memref<1x5x32x128xf32, #tpu.memory_space<vmem>>, vector<1x1x32x128xf32>
        %687 = vector.shape_cast %686 : vector<1x1x32x128xf32> to vector<32x128xf32>
        %688 = vector.shape_cast %685 : vector<32x128xf32> to vector<1x1x32x128xf32>
        tpu.vector_store %arg7[%c0_259, %c2_260, %c0_261, %c0_262], %688 {strides = array<i32>} : memref<1x5x32x128xf32, #tpu.memory_space<vmem>>, vector<1x1x32x128xf32>,
        %c12_i32_263 = arith.constant 12 : i32
        %689 = arith.addi %548, %c12_i32_263 : i32
        %c9_i32_264 = arith.constant 9 : i32
        %690 = arith.addi %689, %c9_i32_264 : i32
        %691 = arith.index_cast %690 : i32 to index
        %692 = memref.load %arg3[%691] : memref<768xf32, #tpu.memory_space<smem>>
        %693 = vector.broadcast %692 : f32 to vector<32x128xf32>
        %694 = arith.mulf %693, %1 : vector<32x128xf32>
        %c1_i32_265 = arith.constant 1 : i32
        %695 = arith.addi %690, %c1_i32_265 : i32
        %696 = arith.index_cast %695 : i32 to index
        %697 = memref.load %arg3[%696] : memref<768xf32, #tpu.memory_space<smem>>
        %698 = vector.broadcast %697 : f32 to vector<32x128xf32>
        %699 = arith.mulf %698, %3 : vector<32x128xf32>
        %700 = arith.addf %694, %699 : vector<32x128xf32>
        %c2_i32_266 = arith.constant 2 : i32
        %701 = arith.addi %690, %c2_i32_266 : i32
        %702 = arith.index_cast %701 : i32 to index
        %703 = memref.load %arg3[%702] : memref<768xf32, #tpu.memory_space<smem>>
        %704 = vector.broadcast %703 : f32 to vector<32x128xf32>
        %705 = arith.addf %700, %704 : vector<32x128xf32>
        %c0_267 = arith.constant 0 : index
        %c3_268 = arith.constant 3 : index
        %c0_269 = arith.constant 0 : index
        %c0_270 = arith.constant 0 : index
        %706 = vector.load %arg7[%c0_267, %c3_268, %c0_269, %c0_270] : memref<1x5x32x128xf32, #tpu.memory_space<vmem>>, vector<1x1x32x128xf32>
        %707 = vector.shape_cast %706 : vector<1x1x32x128xf32> to vector<32x128xf32>
        %708 = arith.select %618, %705, %707 : vector<32x128xi1>, vector<32x128xf32>
        %c0_271 = arith.constant 0 : index
        %c3_272 = arith.constant 3 : index
        %c0_273 = arith.constant 0 : index
        %c0_274 = arith.constant 0 : index
        %709 = vector.load %arg7[%c0_271, %c3_272, %c0_273, %c0_274] : memref<1x5x32x128xf32, #tpu.memory_space<vmem>>, vector<1x1x32x128xf32>
        %710 = vector.shape_cast %709 : vector<1x1x32x128xf32> to vector<32x128xf32>
        %711 = vector.shape_cast %708 : vector<32x128xf32> to vector<1x1x32x128xf32>
        tpu.vector_store %arg7[%c0_271, %c3_272, %c0_273, %c0_274], %711 {strides = array<i32>} : memref<1x5x32x128xf32, #tpu.memory_space<vmem>>, vector<1x1x32x128xf32>,
        %c0_275 = arith.constant 0 : index
        %c0_276 = arith.constant 0 : index
        %712 = vector.load %arg8[%c0_275, %c0_276] : memref<32x128xf32, #tpu.memory_space<vmem>>, vector<32x128xf32>
        tpu.vector_store %arg8[%c0_275, %c0_276], %619 {strides = array<i32>} : memref<32x128xf32, #tpu.memory_space<vmem>>, vector<32x128xf32>,
      } else {
      }
    }
    %c0_19 = arith.constant 0 : index
    %c0_20 = arith.constant 0 : index
    %23 = vector.load %arg8[%c0_19, %c0_20] : memref<32x128xf32, #tpu.memory_space<vmem>>, vector<32x128xf32>
    %cst_21 = arith.constant 0x7F800000 : f32
    %24 = vector.broadcast %cst_21 : f32 to vector<32x128xf32>
    %25 = arith.cmpf olt, %23, %24 : vector<32x128xf32>
    %26 = arith.extui %25 : vector<32x128xi1> to vector<32x128xi32>
    %27 = arith.sitofp %26 : vector<32x128xi32> to vector<32x128xf32>
    %c0_22 = arith.constant 0 : index
    %c4 = arith.constant 4 : index
    %c0_23 = arith.constant 0 : index
    %c0_24 = arith.constant 0 : index
    %28 = vector.load %arg7[%c0_22, %c4, %c0_23, %c0_24] : memref<1x5x32x128xf32, #tpu.memory_space<vmem>>, vector<1x1x32x128xf32>
    %29 = vector.shape_cast %28 : vector<1x1x32x128xf32> to vector<32x128xf32>
    %30 = vector.shape_cast %27 : vector<32x128xf32> to vector<1x1x32x128xf32>
    tpu.vector_store %arg7[%c0_22, %c4, %c0_23, %c0_24], %30 {strides = array<i32>} : memref<1x5x32x128xf32, #tpu.memory_space<vmem>>, vector<1x1x32x128xf32>,
    return
  }
  func.func @transform_0(%arg0: i32, %arg1: i32) -> i32 {
    %c0_i32 = arith.constant 0 : i32
    %c0_i32_0 = arith.constant 0 : i32
    return %c0_i32 : i32
  }
  func.func @transform_1(%arg0: i32, %arg1: i32) -> i32 {
    %c0_i32 = arith.constant 0 : i32
    %c0_i32_0 = arith.constant 0 : i32
    return %c0_i32 : i32
  }
  func.func @transform_2(%arg0: i32, %arg1: i32) -> i32 {
    %c0_i32 = arith.constant 0 : i32
    %c0_i32_0 = arith.constant 0 : i32
    return %c0_i32 : i32
  }
  func.func @transform_3(%arg0: i32, %arg1: i32) -> i32 {
    %c0_i32 = arith.constant 0 : i32
    %c0_i32_0 = arith.constant 0 : i32
    return %c0_i32 : i32
  }
  func.func @transform_4(%arg0: i32, %arg1: i32) -> (i32, i32, i32) {
    %c0_i32 = arith.constant 0 : i32
    %c0_i32_0 = arith.constant 0 : i32
    %c0_i32_1 = arith.constant 0 : i32
    return %c0_i32, %arg1, %c0_i32_0 : i32, i32, i32
  }
  func.func @transform_5(%arg0: i32, %arg1: i32) -> (i32, i32, i32, i32) {
    %c0_i32 = arith.constant 0 : i32
    %c0_i32_0 = arith.constant 0 : i32
    %c0_i32_1 = arith.constant 0 : i32
    return %arg0, %c0_i32, %arg1, %c0_i32_0 : i32, i32, i32, i32
  }
}

</mosaic_0001>

<bundles_post_ra>
// kernel: tpu_custom_call.1
= control target key start
LH: loop header
LB: loop body
LE: loop exit
PB: predicated region body
PF: predicated region fallthrough
CT: control target
= control target key end

     0   :  { %s4175_s0 = inlined_call_operand.hbm [shape: s32[2], index: 0, kind: input, shape index: {}]   ;;  %s4176_s1 = inlined_call_operand.hbm [shape: f32[768], index: 1, kind: input, shape index: {}]   ;;  %s4177_s2 = inlined_call_operand.vmem [shape: f32[16], index: 2, kind: input, shape index: {}]   ;;  %s4178_s3 = inlined_call_operand.vmem [shape: f32[2], index: 3, kind: input, shape index: {}]   ;;  %s4179_s4 = inlined_call_operand.hbm [shape: f32[2,32,128], index: 4, kind: input, shape index: {}]   ;;  %s4180_s5 = inlined_call_operand.hbm [shape: f32[2,5,32,128], index: 5, kind: output, shape index: {}]  }
   0x1   :  { %4235 = sst [smem:[#allocation50_spill]] %s4175_s0 }
   0x2   :  { %4236 = sst [smem:[#allocation51_spill]] %s4176_s1 }
   0x3   :  { %4237 = sst [smem:[#allocation52_spill]] %s4177_s2 }
   0x4   :  { %4238 = sst [smem:[#allocation53_spill]] %s4178_s3 }
   0x5   :  { %4239 = sst [smem:[#allocation54_spill]] %s4179_s4 }
   0x6   :  { %10 = vsyncpa [#allocation6], 0 }
   0x7   :  { %11 = vsyncpa [#allocation9], 0 }
   0x8   :  { %12 = vsyncpa [#allocation7], 0 }
   0x9   :  { %13 = vsyncpa [#allocation12], 0 }
   0xa   :  { %14 = vsyncpa [#allocation4], 0 }
   0xb   :  { %15 = vsyncpa [#allocation5], 0 }
   0xc   :  { %17 = vsyncpa [#allocation5 + $0x1], 0  ;;  %s2093_s18 = smov 0   ;;  %s2095_s19 = smov 0  }
   0xd   :  { %s2097_s20 = smov 0   ;;  %s2099_s21 = smov 0  }
   0xe   :  { %s2101_s22 = smov 0   ;;  %s2103_s23 = smov 0  }
   0xf LB: > { %4240 = sst [smem:[#allocation21_spill]] %s2041_s22  ;;  %s1611_s24 = sadd.s32 4294967295, %s2045_s23   ;;  %s2045_s23 = sphi %s2103_s23, %s23_s23   ;;  %s2041_s22 = sphi %s2101_s22, %s4429_s22   ;;  %s2037_s21 = sphi %s2099_s21, %s4428_s21   ;;  %s2033_s20 = sphi %s2097_s20, %s4432_s20   ;;  %s2029_s19 = sphi %s2095_s19, %s4431_s19   ;;  %s2025_s18 = sphi %s2093_s18, %s4430_s18  }
  0x10   : > { %s1612_s25 = sadd.s32 4294967294, %s2045_s23   ;;  %s35_s26 = sadd.s32 1, %s2041_s22 }
  0x11   : > { %s154_s27 = sadd.s32 1, %s2033_s20  ;;  %p37_p0 = scmp.ge.s32.totalorder %s35_s26, 2 }
  0x12   : > { %p164_p1 = scmp.ne.s32.totalorder %s2033_s20, %s2029_s19  ;;  %p165_p2 = scmp.eq.s32.totalorder %s1611_s24, 1 }
  0x13   : > { %p170_p3 = scmp.ne.s32.totalorder %s2029_s19, %s2025_s18  ;;  %s4434_s26 = smov (%p37_p0, %s35_s26), 0 }
  0x14   : > { %4241 = sst [smem:[#allocation22_spill]] %s4434_s26  ;;  %p2133_p4 = por %p165_p2, %p164_p1 }
  0x15   : > { %p171_p5 = scmp.eq.s32.totalorder %s1612_s25, 1  ;;  %s149_s29 = ssub.s32 %s2041_s22, %s4434_s26 }
  0x16   : > { %s4242_s28 = scalar_select %p2133_p4, 1, 0 }
  0x17   : > { %p1613_p6 = scmp.ge.s32.totalorder %s2045_s23, 1  ;;  %p152_p7 = scmp.eq.s32.totalorder %s149_s29, 0 }
  0x18   : > { %p2140_p8 = por %p171_p5, %p170_p3  ;;  %p178_p9 = scmp.lt.s32.totalorder %s2045_s23, 3 }
  0x19   : > { %s2146_s6 = scalar_select %p152_p7, %s2033_s20, %s154_s27  }
  0x1a   : > { %s4243_s30 = scalar_select %p2140_p8, 1, 0 }
  0x1b   : > { %4244 = sst [smem:[#allocation23_spill]] %s2146_s6  ;;  %p2148_p10 = pnand %p1613_p6, %p178_p9 }
  0x1c   : > { %p2152_p11 = scmp.eq.s32.totalorder %s1611_s24, 0  ;;  %s4247_s2 = sld [smem:[#allocation52_spill]] }
  0x1d   : > { %s4245_s7 = scalar_select %p2148_p10, 1, 0 }
  0x1e   : > { %s4246_s8 = scalar_select %p2152_p11, 1, 0 }
  0x1f   : > { %p1761_p12 = pneg %p2148_p10  ;;  %s4249_s3 = sld [smem:[#allocation53_spill]] }
  0x20   : > { %s4250_s0 = sld [smem:[#allocation50_spill]] }
  0x21   : > { %p2165_p13 = pnand %p2152_p11, %p1761_p12 }
  0x22   : > { %s209_s11 = sshll.u32 %s4247_s2, 4  ;;  %s2161_s11 = int_to_ptr.vmem [resolvable:$true] %s209_s11 }
  0x23   : > { %p2182_p1 = pneg %p2165_p13 }
  0x25   : > { %s220_s15 = sshll.u32 %s4249_s3, 4  ;;  %s2172_s15 = int_to_ptr.vmem [resolvable:$true] %s220_s15 }
  0x26   : > { %s1859_s24 = scalar_lea.hbm %s4250_s0, 16 }
  0x27   : > { %p1860_p0 = scmp.ne.s32.totalorder %s4250_s0, %s1859_s24  ;;  %p1866_p5 = scmp.lt.u32.totalorder %s1859_s24, %s4250_s0 }
  0x29   : > { %p1862_p2 = pnand %p2182_p1, %p1860_p0 }
  0x2b   : > { %p1863_p3 = pneg %p1862_p2 }
  0x2d   : > { %p1868_p6 = pnand %p1866_p5, %p1863_p3 }
  0x2f   : > { %1871 = shalt.err (!%p1868_p6)
}
  0x30   : > { %s2051_s13 = smov [#allocation3]   ;;  %s4252_s1 = sld [smem:[#allocation51_spill]] }
  0x31   : > { %1764 = dma.hbm_to_smem (!%p2165_p13), %s4250_s0, 16, %s2051_s13, [#allocation6]  }
  0x36   : > { %s1872_s27 = scalar_lea.hbm %s4252_s1, 96  ;;  %s1877_s10 = scalar_lea.hbm %s4252_s1, 128 }
  0x37   : > { %p1873_p7 = scmp.ne.s32.totalorder %s4252_s1, %s1872_s27  ;;  %p1878_p0 = scmp.lt.u32.totalorder %s1877_s10, %s1872_s27 }
  0x38   : > { %p1879_p2 = scmp.lt.u32.totalorder %s1872_s27, %s4252_s1 }
  0x39   : > { %p1875_p9 = pnand %p1873_p7, %p2182_p1 }
  0x3a   : > { %p1880_p3 = por %p1879_p2, %p1878_p0 }
  0x3b   : > { %p1876_p12 = pneg %p1875_p9 }
  0x3d   : > { %p1881_p5 = pnand %p1880_p3, %p1876_p12 }
  0x3f   : > { %1884 = shalt.err (!%p1881_p5)
}
  0x40   : > { %s2052_s13 = smov [#allocation8]   ;;  %s1885_s16 = scalar_lea.vmem %s2161_s11, 16 }
  0x41   : > { %1767 = dma.hbm_to_smem (!%p2165_p13), %s4252_s1, 96, %s2052_s13, [#allocation9]  }
  0x42   : > { %p1886_p6 = scmp.ne.s32.totalorder %s2161_s11, %s1885_s16  ;;  %p1893_p0 = scmp.lt.s32.totalorder %s2161_s11, %s2161_s11 }
  0x43   : > { %p1894_p12 = scmp.lt.s32.totalorder %s1885_s16, %s1885_s16 }
  0x44   : > { %p1888_p7 = pnand %p1886_p6, %p2182_p1 }
  0x45   : > { %p1895_p2 = por %p1894_p12, %p1893_p0 }
  0x46   : > { %p1889_p9 = pneg %p1888_p7 }
  0x48   : > { %p1896_p3 = pnand %p1895_p2, %p1889_p9 }
  0x4a   : > { %1899 = shalt.err (!%p1896_p3)
}
  0x4b   : > { %s2053_s26 = smov [#allocation10]   ;;  %s1900_s17 = scalar_lea.vmem %s2172_s15, 16 }
  0x4c   : > { %1770 = dma.vmem_to_smem (!%p2165_p13), %s2161_s11, 16, %s2053_s26, [#allocation7]  }
  0x4d   : > { %p1901_p5 = scmp.ne.s32.totalorder %s2172_s15, %s1900_s17  ;;  %p1908_p8 = scmp.lt.s32.totalorder %s2172_s15, %s2172_s15 }
  0x4e   : > { %p1909_p4 = scmp.lt.s32.totalorder %s1900_s17, %s1900_s17 }
  0x4f   : > { %p1903_p6 = pnand %p1901_p5, %p2182_p1 }
  0x50   : > { %p1910_p0 = por %p1909_p4, %p1908_p8 }
  0x51   : > { %p1904_p7 = pneg %p1903_p6 }
  0x53   : > { %p1911_p9 = pnand %p1910_p0, %p1904_p7 }
  0x55   : > { %1914 = shalt.err (!%p1911_p9)
}
  0x56   : > { %s2054_s25 = smov [#allocation11]   ;;  %s2055_s27 = smov [#allocation13]  }
  0x57   : > { %1773 = dma.vmem_to_smem (!%p2165_p13), %s2172_s15, 16, %s2054_s25, [#allocation12]  }
  0x58   : > { %s233_s24 = sshll.u32 %s2055_s27, 4  ;;  %s4253_s4 = sld [smem:[#allocation54_spill]]  ;;  %s234_s24 = int_to_ptr.vmem [resolvable:$true] %s233_s24 }
  0x5e   : > { %s1915_s10 = scalar_lea.hbm %s4253_s4, 1024 }
  0x5f   : > { %p1916_p12 = scmp.ne.s32.totalorder %s4253_s4, %s1915_s10  ;;  %p1922_p2 = scmp.lt.u32.totalorder %s1915_s10, %s4253_s4 }
  0x61   : > { %p1918_p4 = pnand %p1916_p12, %p2182_p1 }
  0x63   : > { %p1919_p8 = pneg %p1918_p4 }
  0x65   : > { %p1924_p3 = pnand %p1922_p2, %p1919_p8 }
  0x67   : > { %1927 = shalt.err (!%p1924_p3)
}
  0x68   : > { %s1928_s15 = scalar_lea.vmem %s234_s24, 1024  ;;  %p1936_p0 = scmp.lt.s32.totalorder %s234_s24, %s234_s24 }
  0x69   : > { %p1929_p5 = scmp.ne.s32.totalorder %s234_s24, %s1928_s15  ;;  %p1937_p9 = scmp.lt.s32.totalorder %s1928_s15, %s1928_s15 }
  0x6b   : > { %p1931_p6 = pnand %p1929_p5, %p2182_p1  ;;  %p1938_p11 = por %p1937_p9, %p1936_p0 }
  0x6d   : > { %p1932_p7 = pneg %p1931_p6 }
  0x6f   : > { %p1939_p10 = pnand %p1938_p11, %p1932_p7 }
  0x71   : > { %1942 = shalt.err (!%p1939_p10)
}
  0x72   : > { %s2056_s16 = smov 128   ;;  %s2057_s26 = smov 8  }
  0x73   : > { %1776 = dma.hbm_to_vmem [thread:$0]  (!%p2165_p13), %s4253_s4, 1024, %s234_s24, [#allocation4], %s2056_s16, %s2056_s16, %s2057_s26  }
  0x74   : > { %p4254_p12 = scmp.ne.s32.totalorder %s4245_s7, 0 }
  0x76   : > { %249 = sbr.rel (%p4254_p12) target bundleno = 414 (0x19e), region = 40 }
  0x7d   : > { %p4255_p4 = scmp.ne.s32.totalorder %s4246_s8, 0 }
  0x7f   : > { %2000 = dma.done.wait (%p4255_p4), [#allocation6], 16  }
  0x80   : > { %2002 = vsyncadd (%p4255_p4), [#allocation6], 4294967280 }
  0x81   : > { %2004 = dma.done.wait (%p4255_p4), [#allocation9], 96  }
  0x82   : > { %2006 = vsyncadd (%p4255_p4), [#allocation9], 4294967200 }
  0x83   : > { %2008 = dma.done.wait (%p4255_p4), [#allocation7], 16  }
  0x84   : > { %2010 = vsyncadd (%p4255_p4), [#allocation7], 4294967280 }
  0x85   : > { %2012 = dma.done.wait (%p4255_p4), [#allocation12], 16  }
  0x86   : > { %2014 = vsyncadd (%p4255_p4), [#allocation12], 4294967280 }
  0x87   : > { %2016 = dma.done.wait (%p4255_p4), [#allocation4], 1024  }
  0x88   : > { %2018 = vsyncadd (%p4255_p4), [#allocation4], 4294966272 }
  0x89   : > { %271 = sfence }
  0x8a   : > { %v2273_v0 = vld [vmem:[#allocation13] sm:$0xff]  ;;  %v2275_v1 = vld [vmem:[#allocation13 + $0x8] sm:$0xff]  ;;  %v2277_v2 = vld [vmem:[#allocation13 + $0x10] sm:$0xff]  ;;  %s2279_s7 = sld [smem:[#allocation11]]  ;;  %s2287_s8 = sld [smem:[#allocation11 + $0x1]]  ;;  %v2058_v6 = vmov inf  }
  0x8b   : > { %v2281_v3 = vld [vmem:[#allocation13 + $0x18] sm:$0xff]  ;;  %v2283_v4 = vld [vmem:[#allocation13 + $0x20] sm:$0xff]  ;;  %v2285_v5 = vld [vmem:[#allocation13 + $0x28] sm:$0xff]  ;;  %304 = vst [vmem:[#allocation2] sm:$0xff] %v2058_v6  ;;  %s2290_s12 = sld [smem:[#allocation3 + %s2037_s21]]  ;;  %s4186_s29 = sand.u32 1, %s2029_s19  }
  0x8c   : > { %305 = vst [vmem:[#allocation2 + $0x8] sm:$0xff] %v2058_v6  ;;  %306 = vst [vmem:[#allocation2 + $0x10] sm:$0xff] %v2058_v6  ;;  %v2292_v7 = vld [vmem:[#allocation13 + $0x30] sm:$0xff]  ;;  %v2294_v8 = vld [vmem:[#allocation13 + $0x38] sm:$0xff]  ;;  %s1737_s27 = smul.u32 160, %s4186_s29  ;;  %v4187_v9 = vmov 0.0  }
  0x8d   : > { %307 = vst [vmem:[#allocation2 + $0x18] sm:$0xff] %v2058_v6 }
  0x8e   : > { %s2299_s24 = scalar_lea.vmem [#allocation14], %s1737_s27 }
  0x8f   : > { %308 = vst [vmem:[%s2299_s24] sm:$0xff] %v4187_v9  ;;  %309 = vst [vmem:[%s2299_s24 + $0x8] sm:$0xff] %v4187_v9 }
  0x90   : > { %4256 = sst [smem:[#allocation24_spill]] %s2279_s7  ;;  %310 = vst [vmem:[%s2299_s24 + $0x10] sm:$0xff] %v4187_v9  ;;  %311 = vst [vmem:[%s2299_s24 + $0x18] sm:$0xff] %v4187_v9 }
  0x91   : > { %4257 = sst [smem:[#allocation25_spill]] %s2287_s8  ;;  %312 = vst [vmem:[%s2299_s24 + $0x20] sm:$0xff] %v4187_v9  ;;  %313 = vst [vmem:[%s2299_s24 + $0x28] sm:$0xff] %v4187_v9  ;;  %p1626_p10 = scmp.le.s32.totalorder %s2290_s12, 0 }
  0x92   : > { %314 = vst [vmem:[%s2299_s24 + $0x30] sm:$0xff] %v4187_v9  ;;  %315 = vst [vmem:[%s2299_s24 + $0x38] sm:$0xff] %v4187_v9  ;;  %s2342_s11 = smov (!%p1626_p10), 0  }
  0x93   : > { %316 = vst [vmem:[%s2299_s24 + $0x40] sm:$0xff] %v4187_v9  ;;  %317 = vst [vmem:[%s2299_s24 + $0x48] sm:$0xff] %v4187_v9  ;;  %1540 = sbr.rel (%p1626_p10) target bundleno = 387 (0x183), region = 106 }
  0x94   : > { %318 = vst [vmem:[%s2299_s24 + $0x50] sm:$0xff] %v4187_v9  ;;  %319 = vst [vmem:[%s2299_s24 + $0x58] sm:$0xff] %v4187_v9 }
  0x95   : > { %320 = vst [vmem:[%s2299_s24 + $0x60] sm:$0xff] %v4187_v9  ;;  %321 = vst [vmem:[%s2299_s24 + $0x68] sm:$0xff] %v4187_v9 }
  0x96   : > { %322 = vst [vmem:[%s2299_s24 + $0x70] sm:$0xff] %v4187_v9  ;;  %323 = vst [vmem:[%s2299_s24 + $0x78] sm:$0xff] %v4187_v9 }
  0x97   : > { %324 = vst [vmem:[%s2299_s24 + $0x80] sm:$0xff] %v4187_v9  ;;  %325 = vst [vmem:[%s2299_s24 + $0x88] sm:$0xff] %v4187_v9 }
  0x98   : > { %326 = vst [vmem:[%s2299_s24 + $0x90] sm:$0xff] %v4187_v9  ;;  %327 = vst [vmem:[%s2299_s24 + $0x98] sm:$0xff] %v4187_v9 }
  0x9a LB: >> { %s4258_s8 = sld [smem:[#allocation25_spill]]  ;;  %s4259_s7 = sld [smem:[#allocation24_spill]]  ;;  %s2049_s11 = sphi %s2342_s11, %s332_s11  }
  0x9b   : >> { %s1627_s9 = sshll.u32 %s2037_s21, 2 }
  0x9c   : >> { %s2349_s10 = sadd.s32 %s2049_s11, %s1627_s9 }
  0x9d   : >> { %s1628_s14 = sshll.u32 %s2349_s10, 1 }
  0x9e   : >> { %s338_s13 = sld [smem:[#allocation10 + %s1628_s14]]  ;;  %s339_s2 = sadd.s32 1, %s1628_s14 }
  0x9f   : >> { %s340_s3 = sld [smem:[#allocation10 + %s339_s2]] }
  0xa4   : >> { %p342_p11 = scmp.le.f32.partialorder %s338_s13, %s4258_s8 }
  0xa5   : >> { %p341_p13 = scmp.ge.f32.partialorder %s340_s3, %s4259_s7 }
  0xa7   : >> { %p343_p1 = pnand %p342_p11, %p341_p13 }
  0xa9   : >> { %346 = sbr.rel (%p343_p1) target bundleno = 377 (0x179), region = 71 }
  0xb0   : >> { %s2355_s15 = smul.u32 96, %s2349_s10  ;;  %v2463_v61 = vld [vmem:[#allocation2] sm:$0xff] }
  0xb2   : >> { %s352_s16 = sld [smem:[#allocation8 + %s2355_s15]]  ;;  %s358_s26 = sadd.s32 1, %s2355_s15 }
  0xb3   : >> { %s359_s17 = sld [smem:[#allocation8 + %s358_s26]]  ;;  %s369_s25 = sadd.s32 2, %s2355_s15 }
  0xb4   : >> { %s370_s27 = sld [smem:[#allocation8 + %s369_s25]]  ;;  %s376_s9 = sadd.s32 3, %s2355_s15 }
  0xb5   : >> { %s377_s14 = sld [smem:[#allocation8 + %s376_s9]]  ;;  %s383_s13 = sadd.s32 4, %s2355_s15 }
  0xb6   : >> { %s384_s2 = sld [smem:[#allocation8 + %s383_s13]]  ;;  %s394_s3 = sadd.s32 5, %s2355_s15 }
  0xb7   : >> { %s2363_s29 = sld [smem:[#allocation8 + %s394_s3]]  ;;  %s401_s0 = sadd.s32 6, %s2355_s15 }
  0xb8   : >> { %v353_v10 = vstv %s352_s16  ;;  %s2366_s1 = sld [smem:[#allocation8 + %s401_s0]]  ;;  %s408_s4 = sadd.s32 7, %s2355_s15 }
  0xb9   : >> { %v354_v11 = vmul.f32 %v353_v10, %v2273_v0  ;;  %v360_v12 = vstv %s359_s17  ;;  %s2370_s26 = sld [smem:[#allocation8 + %s408_s4]]  ;;  %s419_s25 = sadd.s32 8, %s2355_s15  ;;  %v355_v13 = vmul.f32 %v353_v10, %v2275_v1  ;;  %v356_v16 = vmul.f32 %v353_v10, %v2277_v2 }
  0xba   : >> { %v361_v14 = vmul.f32 %v360_v12, %v2283_v4  ;;  %s2375_s9 = sld [smem:[#allocation8 + %s419_s25]]  ;;  %s426_s13 = sadd.s32 9, %s2355_s15  ;;  %v362_v15 = vmul.f32 %v360_v12, %v2285_v5  ;;  %v2380_v17 = vstv %s370_s27  ;;  %v363_v19 = vmul.f32 %v360_v12, %v2292_v7 }
  0xbb   : >> { %v2382_v18 = vstv %s377_s14  ;;  %s2384_s0 = sld [smem:[#allocation8 + %s426_s13]]  ;;  %s433_s4 = sadd.s32 10, %s2355_s15  ;;  %v2389_v20 = vmul.f32 %v353_v10, %v2281_v3  ;;  %v2408_v28 = vmul.f32 %v360_v12, %v2294_v8  ;;  %v2469_v10 = vld [vmem:[#allocation2 + $0x8] sm:$0xff] }
  0xbc   : >> { %v365_v21 = vadd.f32 %v361_v14, %v354_v11  ;;  %v379_v22 = vmul.f32 %v2382_v18, %v2273_v0  ;;  %v2393_v23 = vstv %s384_s2  ;;  %s2395_s16 = sld [smem:[#allocation8 + %s433_s4]]  ;;  %s444_s17 = sadd.s32 11, %s2355_s15  ;;  %v366_v24 = vadd.f32 %v362_v15, %v355_v13 }
  0xbd   : >> { %v386_v25 = vmul.f32 %v2393_v23, %v2283_v4  ;;  %s2400_s27 = sld [smem:[#allocation8 + %s444_s17]]  ;;  %s475_s14 = sadd.s32 12, %s2355_s15  ;;  %v380_v26 = vmul.f32 %v2382_v18, %v2275_v1  ;;  %v387_v27 = vmul.f32 %v2393_v23, %v2285_v5  ;;  %v2412_v30 = vstv %s2363_s29 }
  0xbe   : >> { %v372_v29 = vadd.f32 %v2380_v17, %v365_v21  ;;  %v2415_v31 = vstv %s2366_s1  ;;  %s476_s2 = sld [smem:[#allocation8 + %s475_s14]]  ;;  %s482_s3 = sadd.s32 13, %s2355_s15  ;;  %v373_v32 = vadd.f32 %v2380_v17, %v366_v24  ;;  %v367_v40 = vadd.f32 %v363_v19, %v356_v16  ;;  %v2488_v24 = vld [vmem:[%s2299_s24] sm:$0xff] }
  0xbf   : >> { %v390_v33 = vadd.f32 %v386_v25, %v379_v22  ;;  %v404_v34 = vmul.f32 %v2415_v31, %v2273_v0  ;;  %v2422_v35 = vstv %s2370_s26  ;;  %s483_s25 = sld [smem:[#allocation8 + %s482_s3]]  ;;  %s493_s13 = sadd.s32 14, %s2355_s15  ;;  %v391_v36 = vadd.f32 %v387_v27, %v380_v26 }
  0xc0   : >> { %v411_v37 = vmul.f32 %v2422_v35, %v2283_v4  ;;  %s494_s1 = sld [smem:[#allocation8 + %s493_s13]]  ;;  %v405_v38 = vmul.f32 %v2415_v31, %v2275_v1  ;;  %v412_v39 = vmul.f32 %v2422_v35, %v2285_v5  ;;  %v2433_v42 = vstv %s2375_s9  ;;  %s512_s29 = sadd.s32 15, %s2355_s15 }
  0xc1   : >> { %v397_v41 = vadd.f32 %v2412_v30, %v390_v33  ;;  %v2436_v43 = vstv %s2384_s0  ;;  %v398_v44 = vadd.f32 %v2412_v30, %v391_v36  ;;  %v381_v56 = vmul.f32 %v2382_v18, %v2277_v2  ;;  %s519_s26 = sadd.s32 16, %s2355_s15  ;;  %s2497_s9 = sld [smem:[#allocation8 + %s512_s29]] }
  0xc2   : >> { %v415_v45 = vadd.f32 %v411_v37, %v404_v34  ;;  %v429_v46 = vmul.f32 %v2436_v43, %v2273_v0  ;;  %v2442_v47 = vstv %s2395_s16  ;;  %v416_v48 = vadd.f32 %v412_v39, %v405_v38  ;;  %s530_s0 = sadd.s32 17, %s2355_s15  ;;  %s2513_s4 = sld [smem:[#allocation8 + %s519_s26]]  ;;  %v2520_v39 = vld [vmem:[%s2299_s24 + $0x8] sm:$0xff] }
  0xc3   : >> { %v436_v49 = vmul.f32 %v2442_v47, %v2283_v4  ;;  %v2447_v50 = vstv %s2400_s27  ;;  %v430_v51 = vmul.f32 %v2436_v43, %v2275_v1  ;;  %v437_v52 = vmul.f32 %v2442_v47, %v2285_v5  ;;  %s2530_s16 = sld [smem:[#allocation8 + %s530_s0]]  ;;  %s550_s17 = sadd.s32 18, %s2355_s15 }
  0xc4   : >> { %v422_v53 = vadd.f32 %v2433_v42, %v415_v45  ;;  %v2454_v54 = vstv %s476_s2  ;;  %v423_v55 = vadd.f32 %v2433_v42, %v416_v48  ;;  %v388_v22 = vmul.f32 %v2393_v23, %v2292_v7  ;;  %s2548_s27 = sshll.u32 %s2349_s10, 2  ;;  %s557_s14 = sadd.s32 19, %s2355_s15 }
  0xc5   : >> { %v440_v57 = vadd.f32 %v436_v49, %v429_v46  ;;  %v478_v58 = vmul.f32 %v2454_v54, %v2273_v0  ;;  %v2461_v59 = vstv %s483_s25  ;;  %v441_v60 = vadd.f32 %v437_v52, %v430_v51  ;;  %s568_s2 = sadd.s32 20, %s2355_s15  ;;  %s2567_s10 = sld [smem:[#allocation8 + %s550_s17]] }
  0xc6   : >> { %v451_v62 = vmin.f32 %v397_v41, %v422_v53  ;;  %v485_v63 = vmul.f32 %v2461_v59, %v2283_v4  ;;  %v2467_v6 = vstv %s494_s1  ;;  %v452_v11 = vmin.f32 %v398_v44, %v423_v55  ;;  %s627_s3 = sadd.s32 1, %s2548_s27  ;;  %s2581_s25 = sld [smem:[#allocation8 + %s557_s14]] }
  0xc7   : >> { %v2472_v12 = vadd.f32 %v2447_v50, %v440_v57  ;;  %v2475_v13 = vadd.f32 %v2447_v50, %v441_v60  ;;  %v479_v14 = vmul.f32 %v2454_v54, %v2275_v1  ;;  %v486_v15 = vmul.f32 %v2461_v59, %v2285_v5  ;;  %s2583_s13 = sld [smem:[#allocation8 + %s568_s2]]  ;;  %s588_s1 = sadd.s32 21, %s2355_s15 }
  0xc8   : >> { %v455_v16 = vmin.f32 %v372_v29, %v451_v62  ;;  %v489_v19 = vadd.f32 %v485_v63, %v478_v58  ;;  %v456_v21 = vmin.f32 %v373_v32, %v452_v11  ;;  %v406_v26 = vmul.f32 %v2415_v31, %v2277_v2  ;;  %v2569_v62 = vld [vmem:[#allocation2 + $0x10] sm:$0xff]  ;;  %s595_s29 = sadd.s32 22, %s2355_s15  ;;  %s606_s26 = sadd.s32 23, %s2355_s15 }
  0xc9   : >> { %vm463_vm0 = vcmp.lt.f32.partialorder %v2472_v12, %v2463_v61  ;;  %vm464_vm1 = vcmp.lt.f32.partialorder %v2475_v13, %v2469_v10  ;;  %v490_v25 = vadd.f32 %v486_v15, %v479_v14  ;;  %v392_v29 = vadd.f32 %v388_v22, %v381_v56  ;;  %s2607_s0 = sld [smem:[#allocation8 + %s588_s1]] }
  0xca   : >> { %vm459_vm2 = vcmp.gt.f32.partialorder %v455_v16, 0.0  ;;  %v2495_v27 = vadd.f32 %v2467_v6, %v489_v19  ;;  %vm460_vm3 = vcmp.gt.f32.partialorder %v456_v21, 0.0  ;;  %v413_v34 = vmul.f32 %v2422_v35, %v2292_v7  ;;  %v2585_v19 = vld [vmem:[#allocation2 + $0x18] sm:$0xff]  ;;  %s2631_s17 = sld [smem:[#allocation8 + %s606_s26]] }
  0xcb   : >> { %vm2500_vm4 = vmand %vm459_vm2, %vm463_vm0  ;;  %v2505_v33 = vadd.f32 %v2467_v6, %v490_v25  ;;  %v431_v36 = vmul.f32 %v2436_v43, %v2277_v2  ;;  %v438_v37 = vmul.f32 %v2442_v47, %v2292_v7  ;;  %v374_v41 = vadd.f32 %v2380_v17, %v367_v40 }
  0xcc   : >> { %v480_v44 = vmul.f32 %v2454_v54, %v2277_v2  ;;  %v487_v45 = vmul.f32 %v2461_v59, %v2292_v7  ;;  %v399_v46 = vadd.f32 %v2412_v30, %v392_v29  ;;  %v417_v48 = vadd.f32 %v413_v34, %v406_v26  ;;  %vm2537_vm5 = vmand %vm460_vm3, %vm464_vm1 }
  0xcd   : >> { %v442_v49 = vadd.f32 %v438_v37, %v431_v36  ;;  %v368_v51 = vadd.f32 %v2408_v28, %v2389_v20  ;;  %v382_v53 = vmul.f32 %v2382_v18, %v2281_v3  ;;  %v389_v55 = vmul.f32 %v2393_v23, %v2294_v8  ;;  %v2612_v37 = vld [vmem:[%s2299_s24 + $0x10] sm:$0xff] }
  0xce   : >> { %v491_v52 = vadd.f32 %v487_v45, %v480_v44  ;;  %v407_v20 = vmul.f32 %v2415_v31, %v2281_v3  ;;  %v424_v56 = vadd.f32 %v2433_v42, %v417_v48  ;;  %v414_v18 = vmul.f32 %v2422_v35, %v2294_v8  ;;  %v2618_v45 = vld [vmem:[%s2299_s24 + $0x20] sm:$0xff] }
  0xcf   : >> { %v2556_v57 = vadd.f32 %v2447_v50, %v442_v49  ;;  %v375_v23 = vadd.f32 %v2380_v17, %v368_v51  ;;  %v393_v31 = vadd.f32 %v389_v55, %v382_v53  ;;  %v432_v58 = vmul.f32 %v2436_v43, %v2281_v3  ;;  %4264 = vst [vmem:[#allocation26_spill] sm:$0xff] %v2618_v45  ;;  %v2624_v49 = vld [vmem:[%s2299_s24 + $0x18] sm:$0xff] }
  0xd0   : >> { %v439_v60 = vmul.f32 %v2442_v47, %v2294_v8  ;;  %v453_v63 = vmin.f32 %v399_v46, %v424_v56  ;;  %v2572_v35 = vadd.f32 %v2467_v6, %v491_v52  ;;  %v418_v11 = vadd.f32 %v414_v18, %v407_v20 }
  0xd1   : >> { %v481_v17 = vmul.f32 %v2454_v54, %v2281_v3  ;;  %v400_v43 = vadd.f32 %v2412_v30, %v393_v31  ;;  %v488_v47 = vmul.f32 %v2461_v59, %v2294_v8  ;;  %v514_v15 = vstv %s2497_s9  ;;  %s2602_s9 = smul.u32 24, %s627_s3 }
  0xd2   : >> { %v443_v14 = vadd.f32 %v439_v60, %v432_v58  ;;  %v457_v16 = vmin.f32 %v374_v41, %v453_v63  ;;  %v425_v21 = vadd.f32 %v2433_v42, %v418_v11  ;;  %v515_v54 = vmul.f32 %v514_v15, %v2273_v0  ;;  %v2664_v60 = vld [vmem:[%s2299_s24 + $0x28] sm:$0xff] }
  0xd3   : >> { %v521_v22 = vstv %s2513_s4  ;;  %vm465_vm6 = vcmp.lt.f32.partialorder %v2556_v57, %v2569_v62  ;;  %v492_v59 = vadd.f32 %v488_v47, %v481_v17  ;;  %v532_v29 = vstv %s2530_s16  ;;  %s2609_s4 = sld [smem:[#allocation8 + %s595_s29]]  ;;  %s635_s15 = sadd.s32 1, %s2602_s9  ;;  %4271 = vst [vmem:[#allocation29_spill] sm:$0xff] %v2664_v60 }
  0xd4   : >> { %v2595_v30 = vadd.f32 %v2447_v50, %v443_v14  ;;  %v522_v25 = vmul.f32 %v521_v22, %v2283_v4  ;;  %v454_v26 = vmin.f32 %v400_v43, %v425_v21  ;;  %v516_v42 = vmul.f32 %v514_v15, %v2275_v1  ;;  %s646_s16 = sadd.s32 2, %s2602_s9  ;;  %s2645_s14 = sld [smem:[#allocation8 + %s2602_s9]]  ;;  %v2678_v14 = vld [vmem:[%s2299_s24 + $0x30] sm:$0xff] }
  0xd5   : >> { %v523_v34 = vmul.f32 %v521_v22, %v2285_v5  ;;  %vm461_vm7 = vcmp.gt.f32.partialorder %v457_v16, 0.0  ;;  %v517_v36 = vmul.f32 %v514_v15, %v2277_v2  ;;  %v2615_v44 = vadd.f32 %v2467_v6, %v492_v59  ;;  %s653_s2 = sadd.s32 3, %s2602_s9  ;;  %s2669_s3 = sld [smem:[#allocation8 + %s646_s16]]  ;;  %4273 = vst [vmem:[#allocation31_spill] sm:$0xff] %v2678_v14 }
  0xd6   : >> { %vm466_vm8 = vcmp.lt.f32.partialorder %v2595_v30, %v2585_v19  ;;  %v526_v50 = vadd.f32 %v522_v25, %v515_v54  ;;  %v458_v41 = vmin.f32 %v375_v23, %v454_v26  ;;  %v524_v48 = vmul.f32 %v521_v22, %v2292_v7  ;;  %vm2637_vm9 = vmand %vm461_vm7, %vm465_vm6  ;;  %s671_s1 = sadd.s32 5, %s2602_s9  ;;  %s2689_s29 = sld [smem:[#allocation8 + %s653_s2]]  ;;  %v2697_v25 = vld [vmem:[%s2299_s24 + $0x38] sm:$0xff] }
  0xd7   : >> { %v527_v46 = vadd.f32 %v523_v34, %v516_v42  ;;  %v518_v52 = vmul.f32 %v514_v15, %v2281_v3  ;;  %v525_v6 = vmul.f32 %v521_v22, %v2294_v8  ;;  %v552_v53 = vstv %s2567_s10  ;;  %s2667_s10 = sld [smem:[#allocation8 + %s635_s15]]  ;;  %s678_s26 = sadd.s32 6, %s2602_s9  ;;  %4275 = vst [vmem:[#allocation33_spill] sm:$0xff] %v2697_v25 }
  0xd8   : >> { %v2626_v51 = vadd.f32 %v532_v29, %v526_v50  ;;  %vm462_vm10 = vcmp.gt.f32.partialorder %v458_v41, 0.0  ;;  %v528_v56 = vadd.f32 %v524_v48, %v517_v36  ;;  %v553_v18 = vmul.f32 %v552_v53, %v2273_v0  ;;  %s696_s15 = sadd.s32 8, %s2602_s9  ;;  %s2711_s2 = sld [smem:[#allocation8 + %s671_s1]]  ;;  %v2716_v48 = vld [vmem:[%s2299_s24 + $0x40] sm:$0xff] }
  0xd9   : >> { %v2641_v20 = vadd.f32 %v532_v29, %v527_v46  ;;  %vm2655_vm11 = vmand %vm462_vm10, %vm466_vm8  ;;  %v529_v63 = vadd.f32 %v525_v6, %v518_v52  ;;  %v559_v11 = vstv %s2581_s25  ;;  %v570_v15 = vstv %s2583_s13  ;;  %s660_s25 = sadd.s32 4, %s2602_s9  ;;  %s685_s13 = sadd.s32 7, %s2602_s9  ;;  %4277 = vst [vmem:[#allocation35_spill] sm:$0xff] %v2716_v48 }
  0xda   : >> { %4265 = vst [vmem:[#allocation27_spill] sm:$0xff] %v2626_v51  ;;  %v2675_v43 = vadd.f32 %v532_v29, %v528_v56  ;;  %v560_v47 = vmul.f32 %v559_v11, %v2283_v4  ;;  %v554_v21 = vmul.f32 %v552_v53, %v2275_v1  ;;  %v561_v54 = vmul.f32 %v559_v11, %v2285_v5  ;;  %s2709_s16 = sld [smem:[#allocation8 + %s660_s25]]  ;;  %s710_s1 = sadd.s32 10, %s2602_s9 }
  0xdb   : >> { %4268 = vst [vmem:[#allocation28_spill] sm:$0xff] %v2641_v20  ;;  %v2684_v16 = vadd.f32 %v532_v29, %v529_v63  ;;  %v555_v22 = vmul.f32 %v552_v53, %v2277_v2  ;;  %v562_v29 = vmul.f32 %v559_v11, %v2292_v7  ;;  %v556_v42 = vmul.f32 %v552_v53, %v2281_v3  ;;  %s2720_s7 = sld [smem:[#allocation8 + %s678_s26]]  ;;  %v2730_v63 = vld [vmem:[%s2299_s24 + $0x48] sm:$0xff]  ;;  %s752_s26 = sadd.s32 12, %s2602_s9 }
  0xdc   : >> { %4272 = vst [vmem:[#allocation30_spill] sm:$0xff] %v2675_v43  ;;  %v564_v26 = vadd.f32 %v560_v47, %v553_v18  ;;  %v565_v50 = vadd.f32 %v561_v54, %v554_v21  ;;  %v563_v36 = vmul.f32 %v559_v11, %v2294_v8  ;;  %v590_v41 = vstv %s2607_s0  ;;  %s703_s0 = sadd.s32 9, %s2602_s9  ;;  %4279 = vst [vmem:[#allocation37_spill] sm:$0xff] %v2730_v63  ;;  %s2733_s25 = sld [smem:[#allocation8 + %s685_s13]]  ;;  %v2740_v54 = vld [vmem:[%s2299_s24 + $0x50] sm:$0xff] }
  0xdd   : >> { %4274 = vst [vmem:[#allocation32_spill] sm:$0xff] %v2684_v16  ;;  %v566_v52 = vadd.f32 %v562_v29, %v555_v22  ;;  %v591_v6 = vmul.f32 %v590_v41, %v2273_v0  ;;  %v597_v53 = vstv %s2609_s4  ;;  %s2735_s4 = sld [smem:[#allocation8 + %s696_s15]]  ;;  %4281 = vst [vmem:[#allocation39_spill] sm:$0xff] %v2740_v54  ;;  %v2743_v22 = vld [vmem:[%s2299_s24 + $0x58] sm:$0xff]  ;;  %v592_v29 = vmul.f32 %v590_v41, %v2275_v1  ;;  %s759_s15 = sadd.s32 13, %s2602_s9 }
  0xde   : >> { %v2713_v46 = vadd.f32 %v570_v15, %v564_v26  ;;  %v2727_v18 = vadd.f32 %v570_v15, %v565_v50  ;;  %v567_v11 = vadd.f32 %v563_v36, %v556_v42  ;;  %v598_v47 = vmul.f32 %v597_v53, %v2283_v4  ;;  %4282 = vst [vmem:[#allocation40_spill] sm:$0xff] %v2743_v22  ;;  %s2757_s13 = sld [smem:[#allocation8 + %s703_s0]]  ;;  %s770_s8 = sadd.s32 14, %s2602_s9 }
  0xdf   : >> { %v2737_v21 = vadd.f32 %v570_v15, %v566_v52  ;;  %v608_v26 = vstv %s2631_s17  ;;  %v599_v42 = vmul.f32 %v597_v53, %v2285_v5  ;;  %v593_v9 = vmul.f32 %v590_v41, %v2277_v2  ;;  %s721_s17 = sadd.s32 11, %s2602_s9  ;;  %s2782_s0 = sld [smem:[#allocation8 + %s710_s1]] }
  0xe0   : >> { %4276 = vst [vmem:[#allocation34_spill] sm:$0xff] %v2713_v46  ;;  %4278 = vst [vmem:[#allocation36_spill] sm:$0xff] %v2727_v18  ;;  %v2754_v36 = vadd.f32 %v570_v15, %v567_v11  ;;  %v602_v52 = vadd.f32 %v598_v47, %v591_v6  ;;  %v600_v59 = vmul.f32 %v597_v53, %v2292_v7  ;;  %s2784_s22 = sld [smem:[#allocation8 + %s752_s26]]  ;;  %v2789_v56 = vstv %s2645_s14 }
  0xe1   : >> { %4280 = vst [vmem:[#allocation38_spill] sm:$0xff] %v2737_v21  ;;  %v603_v34 = vadd.f32 %v599_v42, %v592_v29  ;;  %v594_v15 = vmul.f32 %v590_v41, %v2281_v3  ;;  %v2779_v29 = vld [vmem:[%s2299_s24 + $0x60] sm:$0xff]  ;;  %v601_v42 = vmul.f32 %v597_v53, %v2294_v8  ;;  %v2792_v50 = vstv %s2667_s10  ;;  %s2794_s6 = sld [smem:[#allocation8 + %s721_s17]]  ;;  %v2800_v53 = vld [vmem:[%s2299_s24 + $0x70] sm:$0xff]  ;;  %s863_s17 = sadd.s32 21, %s2602_s9 }
  0xe2   : >> { %4283 = vst [vmem:[#allocation41_spill] sm:$0xff] %v2754_v36  ;;  %v2776_v47 = vadd.f32 %v608_v26, %v602_v52  ;;  %4285 = vst [vmem:[#allocation43_spill] sm:$0xff] %v2779_v29  ;;  %v604_v6 = vadd.f32 %v600_v59, %v593_v9  ;;  %v2797_v52 = vld [vmem:[%s2299_s24 + $0x68] sm:$0xff]  ;;  %v631_v9 = vmul.f32 %v2789_v56, %v2273_v0  ;;  %s2812_s14 = sld [smem:[#allocation8 + %s759_s15]]  ;;  %v2829_v58 = vstv %s2689_s29  ;;  %s870_s15 = sadd.s32 22, %s2602_s9 }
  0xe3   : >> { %v2786_v41 = vadd.f32 %v608_v26, %v603_v34  ;;  %4287 = vst [vmem:[#allocation45_spill] sm:$0xff] %v2797_v52  ;;  %4288 = vst [vmem:[#allocation46_spill] sm:$0xff] %v2800_v53  ;;  %v605_v11 = vadd.f32 %v601_v42, %v594_v15  ;;  %v2806_v34 = vsel %vm2500_vm4, %v2472_v12, %v2463_v61  ;;  %s2814_s10 = sld [smem:[#allocation8 + %s770_s8]]  ;;  %v2823_v12 = vld [vmem:[%s2299_s24 + $0x78] sm:$0xff]  ;;  %v2826_v42 = vstv %s2669_s3  ;;  %s807_s8 = sadd.s32 17, %s2602_s9 }
  0xe4   : >> { %4284 = vst [vmem:[#allocation42_spill] sm:$0xff] %v2776_v47  ;;  %v638_v59 = vmul.f32 %v2792_v50, %v2283_v4  ;;  %v2820_v61 = vadd.f32 %v608_v26, %v604_v6  ;;  %4290 = vst [vmem:[#allocation48_spill] sm:$0xff] %v2823_v12  ;;  %v656_v28 = vmul.f32 %v2829_v58, %v2273_v0  ;;  %v2836_v38 = vstv %s2709_s16  ;;  %s3000_s29 = sld [smem:[#allocation8 + %s807_s8]]  ;;  %s826_s16 = sadd.s32 18, %s2602_s9 }
  0xe5   : >> { %4286 = vst [vmem:[#allocation44_spill] sm:$0xff] %v2786_v41  ;;  %v2831_v17 = vadd.f32 %v608_v26, %v605_v11  ;;  %v663_v11 = vmul.f32 %v2836_v38, %v2283_v4  ;;  %v2856_v15 = vstv %s2711_s2  ;;  %v2861_v52 = vstv %s2733_s25  ;;  %s833_s2 = sadd.s32 19, %s2602_s9  ;;  %s844_s25 = sadd.s32 20, %s2602_s9 }
  0xe6   : >> { %4289 = vst [vmem:[#allocation47_spill] sm:$0xff] %v2820_v61  ;;  %v642_v23 = vadd.f32 %v638_v59, %v631_v9  ;;  %v2849_v9 = vstv %s2720_s7  ;;  %v688_v61 = vmul.f32 %v2861_v52, %v2283_v4  ;;  %v2867_v41 = vstv %s2757_s13  ;;  %s3042_s1 = sld [smem:[#allocation8 + %s833_s2]]  ;;  %s900_s13 = sadd.s32 2, %s2548_s27 }
  0xe7   : >> { %4291 = vst [vmem:[#allocation49_spill] sm:$0xff] %v2831_v17  ;;  %v681_v6 = vmul.f32 %v2849_v9, %v2273_v0  ;;  %v667_v53 = vadd.f32 %v663_v11, %v656_v28  ;;  %v2870_v29 = vstv %s2735_s4  ;;  %v706_v59 = vmul.f32 %v2867_v41, %v2273_v0  ;;  %s3037_s4 = sld [smem:[#allocation8 + %s826_s16]] }
  0xe8   : >> { %v649_v26 = vadd.f32 %v2826_v42, %v642_v23  ;;  %v2875_v12 = vstv %s2782_s0  ;;  %v2878_v17 = vstv %s2784_s22  ;;  %v2886_v11 = vstv %s2794_s6  ;;  %s789_s22 = sadd.s32 15, %s2602_s9  ;;  %s796_s6 = sadd.s32 16, %s2602_s9 }
  0xe9   : >> { %v674_v47 = vadd.f32 %v2856_v15, %v667_v53  ;;  %v692_v22 = vadd.f32 %v688_v61, %v681_v6  ;;  %v713_v28 = vmul.f32 %v2875_v12, %v2283_v4  ;;  %v755_v23 = vmul.f32 %v2878_v17, %v2273_v0  ;;  %s2977_s7 = sld [smem:[#allocation8 + %s789_s22]]  ;;  %s881_s0 = sadd.s32 23, %s2602_s9 }
  0xea   : >> { %v2889_v36 = vstv %s2812_s14  ;;  %v2892_v54 = vstv %s2814_s10  ;;  %v632_v21 = vmul.f32 %v2789_v56, %v2275_v1  ;;  %v639_v61 = vmul.f32 %v2792_v50, %v2285_v5  ;;  %s2987_s3 = sld [smem:[#allocation8 + %s796_s6]]  ;;  %s3066_s14 = smul.u32 24, %s900_s13 }
  0xeb   : >> { %v699_v63 = vadd.f32 %v2870_v29, %v692_v22  ;;  %v717_v18 = vadd.f32 %v713_v28, %v706_v59  ;;  %v762_v53 = vmul.f32 %v2889_v36, %v2283_v4  ;;  %v657_v6 = vmul.f32 %v2829_v58, %v2275_v1  ;;  %s3050_s26 = sld [smem:[#allocation8 + %s844_s25]] }
  0xec   : >> { %v664_v48 = vmul.f32 %v2836_v38, %v2285_v5  ;;  %v682_v46 = vmul.f32 %v2849_v9, %v2275_v1  ;;  %v689_v25 = vmul.f32 %v2861_v52, %v2285_v5  ;;  %v643_v16 = vadd.f32 %v639_v61, %v632_v21  ;;  %s3072_s10 = sld [smem:[#allocation8 + %s863_s17]]  ;;  %s908_s9 = sadd.s32 1, %s3066_s14 }
  0xed   : >> { %v2910_v22 = vadd.f32 %v2886_v11, %v717_v18  ;;  %v728_v59 = vmin.f32 %v674_v47, %v699_v63  ;;  %v766_v28 = vadd.f32 %v762_v53, %v755_v23  ;;  %v707_v60 = vmul.f32 %v2867_v41, %v2275_v1  ;;  %s3074_s22 = sld [smem:[#allocation8 + %s870_s15]]  ;;  %s919_s6 = sadd.s32 2, %s3066_s14 }
  0xee   : >> { %v668_v14 = vadd.f32 %v664_v48, %v657_v6  ;;  %v693_v43 = vadd.f32 %v689_v25, %v682_v46  ;;  %v714_v20 = vmul.f32 %v2875_v12, %v2285_v5  ;;  %v650_v18 = vadd.f32 %v2826_v42, %v643_v16  ;;  %s3096_s8 = sld [smem:[#allocation8 + %s3066_s14]]  ;;  %s933_s2 = sadd.s32 4, %s3066_s14 }
  0xef   : >> { %v732_v45 = vmin.f32 %v649_v26, %v728_v59  ;;  %vm740_vm12 = vcmp.lt.f32.partialorder %v2910_v22, %v2806_v34  ;;  %v773_v51 = vadd.f32 %v2892_v54, %v766_v28  ;;  %v756_v46 = vmul.f32 %v2878_v17, %v2275_v1  ;;  %s3109_s16 = sld [smem:[#allocation8 + %s919_s6]]  ;;  %s944_s25 = sadd.s32 5, %s3066_s14 }
  0xf0   : >> { %v675_v63 = vadd.f32 %v2856_v15, %v668_v14  ;;  %v700_v48 = vadd.f32 %v2870_v29, %v693_v43  ;;  %v718_v25 = vadd.f32 %v714_v20, %v707_v60  ;;  %v2928_v21 = vsel %vm2537_vm5, %v2475_v13, %v2469_v10  ;;  %s969_s13 = sadd.s32 8, %s3066_s14  ;;  %s3171_s17 = sld [smem:[#allocation8 + %s933_s2]] }
  0xf1   : >> { %vm736_vm13 = vcmp.gt.f32.partialorder %v732_v45, 0.0  ;;  %v763_v47 = vmul.f32 %v2889_v36, %v2285_v5  ;;  %v633_v14 = vmul.f32 %v2789_v56, %v2277_v2  ;;  %v640_v45 = vmul.f32 %v2792_v50, %v2292_v7  ;;  %s3173_s15 = sld [smem:[#allocation8 + %s944_s25]]  ;;  %s983_s6 = sadd.s32 10, %s3066_s14 }
  0xf2   : >> { %v2935_v43 = vadd.f32 %v2886_v11, %v718_v25  ;;  %v729_v20 = vmin.f32 %v675_v63, %v700_v48  ;;  %v658_v60 = vmul.f32 %v2829_v58, %v2277_v2  ;;  %vm2945_vm14 = vmand %vm736_vm13, %vm740_vm12  ;;  %v2953_v16 = vsel %vm2637_vm9, %v2556_v57, %v2569_v62  ;;  %s994_s2 = sadd.s32 11, %s3066_s14  ;;  %s1032_s25 = sadd.s32 13, %s3066_s14 }
  0xf3   : >> { %v767_v13 = vadd.f32 %v763_v47, %v756_v46  ;;  %v665_v26 = vmul.f32 %v2836_v38, %v2292_v7  ;;  %v683_v23 = vmul.f32 %v2849_v9, %v2277_v2  ;;  %v4294_v53 = vsel %vm2500_vm4, %v2495_v27, %v2488_v24 }
  0xf4   : >> { %v2966_v61 = vsel %vm2945_vm14, %v773_v51, %v4294_v53  ;;  %v733_v6 = vmin.f32 %v650_v18, %v729_v20  ;;  %v644_v59 = vadd.f32 %v640_v45, %v633_v14  ;;  %v690_v57 = vmul.f32 %v2861_v52, %v2292_v7 }
  0xf5   : >> { %vm741_vm15 = vcmp.lt.f32.partialorder %v2935_v43, %v2928_v21  ;;  %v669_v62 = vadd.f32 %v665_v26, %v658_v60  ;;  %v708_v28 = vmul.f32 %v2867_v41, %v2277_v2  ;;  %v715_v24 = vmul.f32 %v2875_v12, %v2292_v7 }
  0xf6   : >> { %vm737_vm0 = vcmp.gt.f32.partialorder %v733_v6, 0.0  ;;  %v774_v27 = vadd.f32 %v2892_v54, %v767_v13  ;;  %v694_v51 = vadd.f32 %v690_v57, %v683_v23  ;;  %v757_v18 = vmul.f32 %v2878_v17, %v2277_v2 }
  0xf7   : >> { %v651_v63 = vadd.f32 %v2826_v42, %v644_v59  ;;  %v676_v48 = vadd.f32 %v2856_v15, %v669_v62  ;;  %v719_v25 = vadd.f32 %v715_v24, %v708_v28  ;;  %v764_v46 = vmul.f32 %v2889_v36, %v2292_v7  ;;  %vm3015_vm1 = vmand %vm737_vm0, %vm741_vm15 }
  0xf8   : >> { %v701_v47 = vadd.f32 %v2870_v29, %v694_v51  ;;  %v2994_v14 = vsel %vm2655_vm11, %v2595_v30, %v2585_v19  ;;  %v634_v20 = vmul.f32 %v2789_v56, %v2281_v3  ;;  %v641_v45 = vmul.f32 %v2792_v50, %v2294_v8 }
  0xf9   : >> { %v3004_v60 = vadd.f32 %v2886_v11, %v719_v25  ;;  %v768_v13 = vadd.f32 %v764_v46, %v757_v18  ;;  %v659_v26 = vmul.f32 %v2829_v58, %v2281_v3  ;;  %v666_v19 = vmul.f32 %v2836_v38, %v2294_v8 }
  0xfa   : >> { %v730_v56 = vmin.f32 %v676_v48, %v701_v47  ;;  %v645_v50 = vadd.f32 %v641_v45, %v634_v20  ;;  %v684_v23 = vmul.f32 %v2849_v9, %v2281_v3  ;;  %v691_v58 = vmul.f32 %v2861_v52, %v2294_v8 }
  0xfb   : >> { %v4297_v38 = vsel %vm2537_vm5, %v2505_v33, %v2520_v39  ;;  %vm742_vm2 = vcmp.lt.f32.partialorder %v3004_v60, %v2953_v16  ;;  %v670_v6 = vadd.f32 %v666_v19, %v659_v26  ;;  %v709_v9 = vmul.f32 %v2867_v41, %v2281_v3 }
  0xfc   : >> { %v3031_v53 = vsel %vm3015_vm1, %v774_v27, %v4297_v38  ;;  %v734_v52 = vmin.f32 %v651_v63, %v730_v56  ;;  %v775_v59 = vadd.f32 %v2892_v54, %v768_v13  ;;  %v695_v33 = vadd.f32 %v691_v58, %v684_v23 }
  0xfd   : >> { %v716_v39 = vmul.f32 %v2875_v12, %v2294_v8  ;;  %v677_v57 = vadd.f32 %v2856_v15, %v670_v6  ;;  %v758_v62 = vmul.f32 %v2878_v17, %v2281_v3  ;;  %v765_v41 = vmul.f32 %v2889_v36, %v2294_v8 }
  0xfe   : >> { %v791_v28 = vstv %s2977_s7  ;;  %v652_v24 = vadd.f32 %v2826_v42, %v645_v50  ;;  %v702_v12 = vadd.f32 %v2870_v29, %v695_v33  ;;  %vm738_vm3 = vcmp.gt.f32.partialorder %v734_v52, 0.0  ;;  %s3083_s7 = sld [smem:[#allocation8 + %s881_s0]] }
  0xff   : >> { %v720_v27 = vadd.f32 %v716_v39, %v709_v9  ;;  %v792_v51 = vmul.f32 %v791_v28, %v2273_v0  ;;  %v769_v17 = vadd.f32 %v765_v41, %v758_v62  ;;  %v798_v15 = vstv %s2987_s3  ;;  %vm3089_vm7 = vmand %vm738_vm3, %vm742_vm2  ;;  %s926_s3 = sadd.s32 3, %s3066_s14 }
 0x100   : >> { %v793_v36 = vmul.f32 %v791_v28, %v2275_v1  ;;  %v731_v63 = vmin.f32 %v677_v57, %v702_v12  ;;  %v799_v48 = vmul.f32 %v798_v15, %v2283_v4  ;;  %v809_v25 = vstv %s3000_s29  ;;  %s3107_s29 = sld [smem:[#allocation8 + %s908_s9]]  ;;  %v4309_v12 = vld [vmem:[#allocation29_spill] sm:$0xff]  ;;  %s976_s9 = sadd.s32 9, %s3066_s14 }
 0x101   : >> { %v3061_v18 = vadd.f32 %v2886_v11, %v720_v27  ;;  %v776_v29 = vadd.f32 %v2892_v54, %v769_v17  ;;  %v800_v42 = vmul.f32 %v798_v15, %v2285_v5  ;;  %v794_v46 = vmul.f32 %v791_v28, %v2277_v2 }
 0x102   : >> { %v801_v47 = vmul.f32 %v798_v15, %v2292_v7  ;;  %v735_v11 = vmin.f32 %v652_v24, %v731_v63  ;;  %v803_v20 = vadd.f32 %v799_v48, %v792_v51  ;;  %v795_v54 = vmul.f32 %v791_v28, %v2281_v3 }
 0x103   : >> { %vm743_vm6 = vcmp.lt.f32.partialorder %v3061_v18, %v2994_v14  ;;  %v804_v45 = vadd.f32 %v800_v42, %v793_v36  ;;  %v802_v26 = vmul.f32 %v798_v15, %v2294_v8  ;;  %v828_v19 = vstv %s3037_s4  ;;  %s3151_s4 = sld [smem:[#allocation8 + %s926_s3]]  ;;  %v4312_v42 = vld [vmem:[#allocation30_spill] sm:$0xff]  ;;  %s1025_s3 = sadd.s32 12, %s3066_s14 }
 0x104   : >> { %v805_v13 = vadd.f32 %v801_v47, %v794_v46  ;;  %vm739_vm8 = vcmp.gt.f32.partialorder %v735_v11, 0.0  ;;  %v810_v50 = vadd.f32 %v809_v25, %v803_v20  ;;  %v829_v23 = vmul.f32 %v828_v19, %v2273_v0 }
 0x105   : >> { %v835_v58 = vstv %s3042_s1  ;;  %vm3102_vm10 = vmand %vm739_vm8, %vm743_vm6  ;;  %v811_v6 = vadd.f32 %v809_v25, %v804_v45  ;;  %v806_v52 = vadd.f32 %v802_v26, %v795_v54  ;;  %v4302_v39 = vsel %vm2637_vm9, %v2572_v35, %v2612_v37  ;;  %v4304_v35 = vld [vmem:[#allocation27_spill] sm:$0xff]  ;;  %v4305_v37 = vld [vmem:[#allocation26_spill] sm:$0xff]  ;;  %s951_s1 = sadd.s32 6, %s3066_s14 }
 0x106   : >> { %v812_v9 = vadd.f32 %v809_v25, %v805_v13  ;;  %v836_v33 = vmul.f32 %v835_v58, %v2283_v4  ;;  %v3118_v57 = vsel %vm3089_vm7, %v775_v59, %v4302_v39  ;;  %v4303_v62 = vsel %vm2655_vm11, %v2615_v44, %v2624_v49  ;;  %v4308_v49 = vld [vmem:[#allocation28_spill] sm:$0xff]  ;;  %s3177_s0 = sld [smem:[#allocation8 + %s951_s1]]  ;;  %s1043_s1 = sadd.s32 14, %s3066_s14 }
 0x107   : >> { %v3127_v41 = vsel %vm3102_vm10, %v776_v29, %v4303_v62  ;;  %v846_v28 = vstv %s3050_s26  ;;  %v830_v24 = vmul.f32 %v828_v19, %v2275_v1  ;;  %v4306_v59 = vsel %vm2500_vm4, %v4304_v35, %v4305_v37  ;;  %s958_s26 = sadd.s32 7, %s3066_s14 }
 0x108   : >> { %v3140_v44 = vsel %vm2945_vm14, %v810_v50, %v4306_v59  ;;  %v4310_v27 = vsel %vm2537_vm5, %v4308_v49, %v4309_v12  ;;  %v813_v17 = vadd.f32 %v809_v25, %v806_v52  ;;  %v840_v15 = vadd.f32 %v836_v33, %v829_v23  ;;  %v4313_v25 = vld [vmem:[#allocation31_spill] sm:$0xff]  ;;  %v4316_v50 = vld [vmem:[#allocation32_spill] sm:$0xff]  ;;  %v4317_v23 = vld [vmem:[#allocation33_spill] sm:$0xff] }
 0x109   : >> { %4307 = vst [vmem:[#allocation27_spill] sm:$0xff] %v3140_v44  ;;  %v3149_v51 = vsel %vm3015_vm1, %v811_v6, %v4310_v27  ;;  %v837_v36 = vmul.f32 %v835_v58, %v2285_v5  ;;  %v831_v63 = vmul.f32 %v828_v19, %v2277_v2  ;;  %v838_v48 = vmul.f32 %v835_v58, %v2292_v7  ;;  %v4320_v27 = vld [vmem:[#allocation34_spill] sm:$0xff] }
 0x10a   : >> { %4311 = vst [vmem:[#allocation26_spill] sm:$0xff] %v3149_v51  ;;  %v832_v29 = vmul.f32 %v828_v19, %v2281_v3  ;;  %v4314_v46 = vsel %vm2637_vm9, %v4312_v42, %v4313_v25  ;;  %v847_v11 = vadd.f32 %v846_v28, %v840_v15  ;;  %v839_v20 = vmul.f32 %v835_v58, %v2294_v8 }
 0x10b   : >> { %v3167_v47 = vsel %vm3089_vm7, %v812_v9, %v4314_v46  ;;  %v865_v54 = vstv %s3072_s10  ;;  %v841_v45 = vadd.f32 %v837_v36, %v830_v24  ;;  %v842_v13 = vadd.f32 %v838_v48, %v831_v63  ;;  %s3191_s10 = sld [smem:[#allocation8 + %s958_s26]]  ;;  %v4325_v63 = vld [vmem:[#allocation37_spill] sm:$0xff]  ;;  %v4328_v46 = vld [vmem:[#allocation38_spill] sm:$0xff] }
 0x10c   : >> { %4315 = vst [vmem:[#allocation28_spill] sm:$0xff] %v3167_v47  ;;  %v866_v26 = vmul.f32 %v865_v54, %v2273_v0  ;;  %v872_v19 = vstv %s3074_s22  ;;  %v4318_v58 = vsel %vm2655_vm11, %v4316_v50, %v4317_v23  ;;  %v843_v9 = vadd.f32 %v839_v20, %v832_v29  ;;  %s3193_s22 = sld [smem:[#allocation8 + %s969_s13]]  ;;  %v4329_v20 = vld [vmem:[#allocation39_spill] sm:$0xff]  ;;  %v4333_v23 = vld [vmem:[#allocation40_spill] sm:$0xff] }
 0x10d   : >> { %v3187_v6 = vsel %vm3102_vm10, %v813_v17, %v4318_v58  ;;  %v873_v52 = vmul.f32 %v872_v19, %v2283_v4  ;;  %v883_v33 = vstv %s3083_s7  ;;  %v848_v39 = vadd.f32 %v846_v28, %v841_v45  ;;  %s3201_s7 = sld [smem:[#allocation8 + %s976_s9]]  ;;  %v4321_v17 = vld [vmem:[#allocation35_spill] sm:$0xff] }
 0x10e   : >> { %4319 = vst [vmem:[#allocation29_spill] sm:$0xff] %v3187_v6  ;;  %v849_v62 = vadd.f32 %v846_v28, %v842_v13  ;;  %v867_v24 = vmul.f32 %v865_v54, %v2275_v1  ;;  %v874_v35 = vmul.f32 %v872_v19, %v2285_v5  ;;  %v850_v37 = vadd.f32 %v846_v28, %v843_v9  ;;  %v4324_v28 = vld [vmem:[#allocation36_spill] sm:$0xff]  ;;  %s3235_s26 = sld [smem:[#allocation8 + %s983_s6]] }
 0x10f   : >> { %v877_v59 = vadd.f32 %v873_v52, %v866_v26  ;;  %v868_v49 = vmul.f32 %v865_v54, %v2277_v2  ;;  %v875_v12 = vmul.f32 %v872_v19, %v2292_v7  ;;  %v4322_v15 = vsel %vm2500_vm4, %v4320_v27, %v4321_v17  ;;  %s3237_s13 = sld [smem:[#allocation8 + %s1025_s3]]  ;;  %s1117_s3 = sadd.s32 20, %s3066_s14 }
 0x110   : >> { %v3211_v36 = vsel %vm2945_vm14, %v847_v11, %v4322_v15  ;;  %v4326_v48 = vsel %vm2537_vm5, %v4324_v28, %v4325_v63  ;;  %v878_v42 = vadd.f32 %v874_v35, %v867_v24  ;;  %v869_v25 = vmul.f32 %v865_v54, %v2281_v3  ;;  %v4332_v54 = vld [vmem:[#allocation41_spill] sm:$0xff]  ;;  %s3254_s9 = sld [smem:[#allocation8 + %s994_s2]] }
 0x111   : >> { %4323 = vst [vmem:[#allocation30_spill] sm:$0xff] %v3211_v36  ;;  %v3220_v29 = vsel %vm3015_vm1, %v848_v39, %v4326_v48  ;;  %v4330_v11 = vsel %vm2637_vm9, %v4328_v46, %v4329_v20  ;;  %v884_v13 = vadd.f32 %v883_v33, %v877_v59  ;;  %v879_v26 = vadd.f32 %v875_v12, %v868_v49  ;;  %s3266_s6 = sld [smem:[#allocation8 + %s1043_s1]]  ;;  %v4336_v59 = vld [vmem:[#allocation42_spill] sm:$0xff]  ;;  %v4337_v49 = vld [vmem:[#allocation43_spill] sm:$0xff]  ;;  %s1173_s1 = sadd.s32 3, %s2548_s27 }
 0x112   : >> { %4327 = vst [vmem:[#allocation31_spill] sm:$0xff] %v3220_v29  ;;  %v3232_v45 = vsel %vm3089_vm7, %v849_v62, %v4330_v11  ;;  %v876_v50 = vmul.f32 %v872_v19, %v2294_v8  ;;  %v4334_v58 = vsel %vm2655_vm11, %v4332_v54, %v4333_v23  ;;  %v885_v52 = vadd.f32 %v883_v33, %v878_v42  ;;  %v4344_v42 = vld [vmem:[#allocation47_spill] sm:$0xff]  ;;  %s1154_s27 = sadd.s32 23, %s3066_s14 }
 0x113   : >> { %4331 = vst [vmem:[#allocation32_spill] sm:$0xff] %v3232_v45  ;;  %v3246_v9 = vsel %vm3102_vm10, %v850_v37, %v4334_v58  ;;  %v3249_v39 = vstv %s3096_s8  ;;  %v3252_v19 = vstv %s3107_s29  ;;  %v886_v62 = vadd.f32 %v883_v33, %v879_v26  ;;  %s3264_s8 = sld [smem:[#allocation8 + %s1032_s25]]  ;;  %v4348_v26 = vld [vmem:[#allocation49_spill] sm:$0xff]  ;;  %s1062_s29 = sadd.s32 15, %s3066_s14 }
 0x114   : >> { %4335 = vst [vmem:[#allocation33_spill] sm:$0xff] %v3246_v9  ;;  %v880_v24 = vadd.f32 %v876_v50, %v869_v25  ;;  %v3260_v35 = vsel %vm2945_vm14, %v2910_v22, %v2806_v34  ;;  %v904_v37 = vmul.f32 %v3249_v39, %v2273_v0  ;;  %v4338_v12 = vsel %vm2500_vm4, %v4336_v59, %v4337_v49  ;;  %v4340_v34 = vld [vmem:[#allocation44_spill] sm:$0xff]  ;;  %v4341_v22 = vld [vmem:[#allocation45_spill] sm:$0xff]  ;;  %v4345_v25 = vld [vmem:[#allocation46_spill] sm:$0xff]  ;;  %s3513_s25 = sld [smem:[#allocation8 + %s1117_s3]] }
 0x115   : >> { %v3275_v27 = vsel %vm2945_vm14, %v884_v13, %v4338_v12  ;;  %v4342_v17 = vsel %vm2537_vm5, %v4340_v34, %v4341_v22  ;;  %v911_v32 = vmul.f32 %v3252_v19, %v2283_v4  ;;  %v3289_v28 = vstv %s3151_s4  ;;  %v4349_v50 = vld [vmem:[#allocation48_spill] sm:$0xff]  ;;  %s3441_s4 = sld [smem:[#allocation8 + %s1062_s29]] }
 0x116   : >> { %4339 = vst [vmem:[#allocation34_spill] sm:$0xff] %v3275_v27  ;;  %v3284_v15 = vsel %vm3015_vm1, %v885_v52, %v4342_v17  ;;  %v887_v10 = vadd.f32 %v883_v33, %v880_v24  ;;  %v3292_v63 = vstv %s3109_s16  ;;  %v929_v40 = vmul.f32 %v3289_v28, %v2273_v0  ;;  %s1069_s16 = sadd.s32 16, %s3066_s14 }
 0x117   : >> { %4343 = vst [vmem:[#allocation35_spill] sm:$0xff] %v3284_v15  ;;  %v3297_v48 = vstv %s3171_s17  ;;  %v4346_v46 = vsel %vm2637_vm9, %v4344_v42, %v4345_v25  ;;  %v915_v11 = vadd.f32 %v911_v32, %v904_v37  ;;  %v3311_v13 = vstv %s3177_s0  ;;  %s1080_s17 = sadd.s32 17, %s3066_s14 }
 0x118   : >> { %v3306_v20 = vsel %vm3089_vm7, %v886_v62, %v4346_v46  ;;  %v936_v33 = vmul.f32 %v3297_v48, %v2283_v4  ;;  %v4350_v54 = vsel %vm2655_vm11, %v4348_v26, %v4349_v50  ;;  %v3323_v23 = vstv %s3173_s15  ;;  %s3453_s15 = sld [smem:[#allocation8 + %s1069_s16]] }
 0x119   : >> { %4347 = vst [vmem:[#allocation36_spill] sm:$0xff] %v3306_v20  ;;  %v3320_v55 = vsel %vm3102_vm10, %v887_v10, %v4350_v54  ;;  %v954_v58 = vmul.f32 %v3311_v13, %v2273_v0  ;;  %v3328_v52 = vstv %s3191_s10  ;;  %v3333_v24 = vstv %s3193_s22  ;;  %s3466_s0 = sld [smem:[#allocation8 + %s1080_s17]]  ;;  %s1099_s10 = sadd.s32 18, %s3066_s14 }
 0x11a   : >> { %4351 = vst [vmem:[#allocation37_spill] sm:$0xff] %v3320_v55  ;;  %v940_v62 = vadd.f32 %v936_v33, %v929_v40  ;;  %v961_v31 = vmul.f32 %v3328_v52, %v2283_v4  ;;  %v3336_v37 = vstv %s3201_s7  ;;  %v922_v59 = vadd.f32 %v3292_v63, %v915_v11  ;;  %s1106_s22 = sadd.s32 19, %s3066_s14  ;;  %s3498_s7 = sld [smem:[#allocation8 + %s1099_s10]] }
 0x11b   : >> { %v979_v49 = vmul.f32 %v3336_v37, %v2273_v0  ;;  %v3342_v12 = vstv %s3235_s26  ;;  %v3345_v34 = vstv %s3237_s13  ;;  %v3353_v40 = vstv %s3254_s9  ;;  %s3505_s2 = sld [smem:[#allocation8 + %s1106_s22]]  ;;  %s1136_s26 = sadd.s32 21, %s3066_s14 }
 0x11c   : >> { %v947_v22 = vadd.f32 %v3323_v23, %v940_v62  ;;  %v965_v17 = vadd.f32 %v961_v31, %v954_v58  ;;  %v986_v32 = vmul.f32 %v3342_v12, %v2283_v4  ;;  %v1028_v10 = vmul.f32 %v3345_v34, %v2273_v0  ;;  %s1143_s13 = sadd.s32 22, %s3066_s14  ;;  %s3529_s9 = smul.u32 24, %s1173_s1 }
 0x11d   : >> { %v3356_v42 = vstv %s3264_s8  ;;  %v3359_v25 = vstv %s3266_s6  ;;  %v905_v46 = vmul.f32 %v3249_v39, %v2275_v1  ;;  %v912_v50 = vmul.f32 %v3252_v19, %v2285_v5  ;;  %s3537_s8 = sld [smem:[#allocation8 + %s1136_s26]] }
 0x11e   : >> { %v972_v11 = vadd.f32 %v3333_v24, %v965_v17  ;;  %v990_v33 = vadd.f32 %v986_v32, %v979_v49  ;;  %v1035_v26 = vmul.f32 %v3356_v42, %v2283_v4  ;;  %v930_v54 = vmul.f32 %v3289_v28, %v2275_v1  ;;  %s3539_s6 = sld [smem:[#allocation8 + %s1143_s13]]  ;;  %s1181_s14 = sadd.s32 1, %s3529_s9 }
 0x11f   : >> { %v937_v58 = vmul.f32 %v3297_v48, %v2285_v5  ;;  %v955_v62 = vmul.f32 %v3311_v13, %v2275_v1  ;;  %v962_v31 = vmul.f32 %v3328_v52, %v2285_v5  ;;  %v916_v55 = vadd.f32 %v912_v50, %v905_v46  ;;  %s1192_s29 = sadd.s32 2, %s3529_s9  ;;  %s3548_s16 = sld [smem:[#allocation8 + %s1154_s27]] }
 0x120   : >> { %v3377_v49 = vadd.f32 %v3353_v40, %v990_v33  ;;  %v1001_v17 = vmin.f32 %v947_v22, %v972_v11  ;;  %v1039_v32 = vadd.f32 %v1035_v26, %v1028_v10  ;;  %v980_v27 = vmul.f32 %v3336_v37, %v2275_v1  ;;  %s1199_s17 = sadd.s32 3, %s3529_s9  ;;  %s3581_s10 = sld [smem:[#allocation8 + %s1192_s29]] }
 0x121   : >> { %v941_v20 = vadd.f32 %v937_v58, %v930_v54  ;;  %v966_v15 = vadd.f32 %v962_v31, %v955_v62  ;;  %v987_v9 = vmul.f32 %v3342_v12, %v2285_v5  ;;  %v923_v22 = vadd.f32 %v3292_v63, %v916_v55  ;;  %s1217_s22 = sadd.s32 5, %s3529_s9  ;;  %s1224_s3 = sadd.s32 6, %s3529_s9 }
 0x122   : >> { %v1005_v45 = vmin.f32 %v922_v59, %v1001_v17  ;;  %vm1013_vm4 = vcmp.lt.f32.partialorder %v3377_v49, %v3260_v35  ;;  %v3386_v29 = vadd.f32 %v3359_v25, %v1039_v32  ;;  %v1029_v33 = vmul.f32 %v3345_v34, %v2275_v1  ;;  %s1242_s1 = sadd.s32 8, %s3529_s9  ;;  %s3623_s26 = sld [smem:[#allocation8 + %s1217_s22]] }
 0x123   : >> { %v948_v10 = vadd.f32 %v3323_v23, %v941_v20  ;;  %v973_v46 = vadd.f32 %v3333_v24, %v966_v15  ;;  %v991_v11 = vadd.f32 %v987_v9, %v980_v27  ;;  %v3397_v59 = vsel %vm3015_vm1, %v2935_v43, %v2928_v21  ;;  %s3625_s13 = sld [smem:[#allocation8 + %s1224_s3]]  ;;  %s1249_s27 = sadd.s32 9, %s3529_s9 }
 0x124   : >> { %vm1009_vm5 = vcmp.gt.f32.partialorder %v1005_v45, 0.0  ;;  %v1036_v26 = vmul.f32 %v3356_v42, %v2285_v5  ;;  %v906_v20 = vmul.f32 %v3249_v39, %v2277_v2  ;;  %v913_v45 = vmul.f32 %v3252_v19, %v2292_v7  ;;  %s3639_s29 = sld [smem:[#allocation8 + %s1242_s1]]  ;;  %s1305_s22 = sadd.s32 13, %s3529_s9 }
 0x125   : >> { %v3404_v15 = vadd.f32 %v3353_v40, %v991_v11  ;;  %v1002_v9 = vmin.f32 %v948_v10, %v973_v46  ;;  %v931_v27 = vmul.f32 %v3289_v28, %v2277_v2  ;;  %vm3414_vm9 = vmand %vm1009_vm5, %vm1013_vm4  ;;  %v3422_v30 = vsel %vm3089_vm7, %v3004_v60, %v2953_v16  ;;  %s1316_s3 = sadd.s32 14, %s3529_s9 }
 0x126   : >> { %v1040_v43 = vadd.f32 %v1036_v26, %v1029_v33  ;;  %v938_v55 = vmul.f32 %v3297_v48, %v2292_v7  ;;  %v956_v50 = vmul.f32 %v3311_v13, %v2277_v2  ;;  %v917_v62 = vadd.f32 %v913_v45, %v906_v20 }
 0x127   : >> { %v1006_v58 = vmin.f32 %v923_v22, %v1002_v9  ;;  %v963_v31 = vmul.f32 %v3328_v52, %v2292_v7  ;;  %vm1014_vm11 = vcmp.lt.f32.partialorder %v3404_v15, %v3397_v59  ;;  %v981_v60 = vmul.f32 %v3336_v37, %v2277_v2 }
 0x128   : >> { %v942_v16 = vadd.f32 %v938_v55, %v931_v27  ;;  %v988_v56 = vmul.f32 %v3342_v12, %v2292_v7  ;;  %v3445_v17 = vadd.f32 %v3359_v25, %v1040_v43  ;;  %v1030_v22 = vmul.f32 %v3345_v34, %v2277_v2 }
 0x129   : >> { %vm1010_vm12 = vcmp.gt.f32.partialorder %v1006_v58, 0.0  ;;  %v967_v32 = vadd.f32 %v963_v31, %v956_v50  ;;  %v924_v10 = vadd.f32 %v3292_v63, %v917_v62  ;;  %v1037_v33 = vmul.f32 %v3356_v42, %v2292_v7 }
 0x12a   : >> { %v949_v46 = vadd.f32 %v3323_v23, %v942_v16  ;;  %v992_v11 = vadd.f32 %v988_v56, %v981_v60  ;;  %v3460_v20 = vsel %vm3102_vm10, %v3061_v18, %v2994_v14  ;;  %v907_v9 = vmul.f32 %v3249_v39, %v2281_v3  ;;  %vm3481_vm13 = vmand %vm1010_vm12, %vm1014_vm11 }
 0x12b   : >> { %v974_v26 = vadd.f32 %v3333_v24, %v967_v32  ;;  %v914_v45 = vmul.f32 %v3252_v19, %v2294_v8  ;;  %v1041_v43 = vadd.f32 %v1037_v33, %v1030_v22  ;;  %v932_v55 = vmul.f32 %v3289_v28, %v2281_v3 }
 0x12c   : >> { %v3470_v27 = vadd.f32 %v3353_v40, %v992_v11  ;;  %v939_v14 = vmul.f32 %v3297_v48, %v2294_v8  ;;  %v957_v19 = vmul.f32 %v3311_v13, %v2281_v3  ;;  %v964_v28 = vmul.f32 %v3328_v52, %v2294_v8 }
 0x12d   : >> { %v1003_v38 = vmin.f32 %v949_v46, %v974_v26  ;;  %v918_v39 = vadd.f32 %v914_v45, %v907_v9  ;;  %v982_v58 = vmul.f32 %v3336_v37, %v2281_v3  ;;  %v3501_v52 = vadd.f32 %v3359_v25, %v1041_v43 }
 0x12e   : >> { %vm1015_vm14 = vcmp.lt.f32.partialorder %v3470_v27, %v3422_v30  ;;  %v943_v50 = vadd.f32 %v939_v14, %v932_v55  ;;  %v968_v62 = vadd.f32 %v964_v28, %v957_v19  ;;  %v989_v31 = vmul.f32 %v3342_v12, %v2294_v8 }
 0x12f   : >> { %v1007_v13 = vmin.f32 %v924_v10, %v1003_v38  ;;  %v1031_v37 = vmul.f32 %v3345_v34, %v2281_v3  ;;  %v1038_v60 = vmul.f32 %v3356_v42, %v2294_v8  ;;  %v1064_v56 = vstv %s3441_s4  ;;  %s3551_s4 = sld [smem:[#allocation8 + %s3529_s9]] }
 0x130   : >> { %v950_v16 = vadd.f32 %v3323_v23, %v943_v50  ;;  %v925_v32 = vadd.f32 %v3292_v63, %v918_v39  ;;  %v975_v12 = vadd.f32 %v3333_v24, %v968_v62  ;;  %v993_v22 = vadd.f32 %v989_v31, %v982_v58 }
 0x131   : >> { %v1065_v10 = vmul.f32 %v1064_v56, %v2273_v0  ;;  %vm1011_vm15 = vcmp.gt.f32.partialorder %v1007_v13, 0.0  ;;  %v1042_v23 = vadd.f32 %v1038_v60, %v1031_v37  ;;  %v1071_v34 = vstv %s3453_s15  ;;  %s1206_s15 = sadd.s32 4, %s3529_s9 }
 0x132   : >> { %v1066_v42 = vmul.f32 %v1064_v56, %v2275_v1  ;;  %v3524_v46 = vadd.f32 %v3353_v40, %v993_v22  ;;  %v1004_v11 = vmin.f32 %v950_v16, %v975_v12  ;;  %v1072_v33 = vmul.f32 %v1071_v34, %v2283_v4  ;;  %vm3557_vm1 = vmand %vm1011_vm15, %vm1015_vm14 }
 0x133   : >> { %v1082_v26 = vstv %s3466_s0  ;;  %v3532_v63 = vadd.f32 %v3359_v25, %v1042_v23  ;;  %v1073_v24 = vmul.f32 %v1071_v34, %v2285_v5  ;;  %v1067_v9 = vmul.f32 %v1064_v56, %v2277_v2  ;;  %s3579_s0 = sld [smem:[#allocation8 + %s1181_s14]]  ;;  %s1256_s14 = sadd.s32 10, %s3529_s9 }
 0x134   : >> { %v1074_v40 = vmul.f32 %v1071_v34, %v2292_v7  ;;  %v1008_v45 = vmin.f32 %v925_v32, %v1004_v11  ;;  %vm1016_vm0 = vcmp.lt.f32.partialorder %v3524_v46, %v3460_v20  ;;  %v1076_v43 = vadd.f32 %v1072_v33, %v1065_v10 }
 0x135   : >> { %v1068_v25 = vmul.f32 %v1064_v56, %v2281_v3  ;;  %v1077_v55 = vadd.f32 %v1073_v24, %v1066_v42  ;;  %v1075_v38 = vmul.f32 %v1071_v34, %v2294_v8  ;;  %v1101_v39 = vstv %s3498_s7  ;;  %s3605_s7 = sld [smem:[#allocation8 + %s1199_s17]]  ;;  %s1298_s17 = sadd.s32 12, %s3529_s9 }
 0x136   : >> { %v1078_v14 = vadd.f32 %v1074_v40, %v1067_v9  ;;  %vm1012_vm2 = vcmp.gt.f32.partialorder %v1008_v45, 0.0  ;;  %v3561_v28 = vadd.f32 %v1082_v26, %v1076_v43  ;;  %v1102_v50 = vmul.f32 %v1101_v39, %v2273_v0  ;;  %s3677_s1 = sld [smem:[#allocation8 + %s1298_s17]] }
 0x137   : >> { %v1108_v58 = vstv %s3505_s2  ;;  %vm3570_vm3 = vmand %vm1012_vm2, %vm1016_vm0  ;;  %v3574_v62 = vadd.f32 %v1082_v26, %v1077_v55  ;;  %v1079_v16 = vadd.f32 %v1075_v38, %v1068_v25  ;;  %v1119_v32 = vstv %s3513_s25  ;;  %s3607_s2 = sld [smem:[#allocation8 + %s1206_s15]]  ;;  %s1231_s25 = sadd.s32 7, %s3529_s9 }
 0x138   : >> { %v3576_v31 = vadd.f32 %v1082_v26, %v1078_v14  ;;  %v1109_v37 = vmul.f32 %v1108_v58, %v2283_v4  ;;  %v1103_v12 = vmul.f32 %v1101_v39, %v2275_v1  ;;  %v1110_v42 = vmul.f32 %v1108_v58, %v2285_v5  ;;  %s3655_s15 = sld [smem:[#allocation8 + %s1256_s14]]  ;;  %s1372_s14 = sadd.s32 18, %s3529_s9 }
 0x139   : >> { %4360 = vst [vmem:[#allocation38_spill] sm:$0xff] %v3574_v62  ;;  %v3603_v23 = vadd.f32 %v1082_v26, %v1079_v16  ;;  %v1104_v11 = vmul.f32 %v1101_v39, %v2277_v2  ;;  %v1111_v33 = vmul.f32 %v1108_v58, %v2292_v7  ;;  %v1105_v24 = vmul.f32 %v1101_v39, %v2281_v3 }
 0x13a   : >> { %4361 = vst [vmem:[#allocation39_spill] sm:$0xff] %v3576_v31  ;;  %v1113_v34 = vadd.f32 %v1109_v37, %v1102_v50  ;;  %v1112_v40 = vmul.f32 %v1108_v58, %v2294_v8  ;;  %v1138_v45 = vstv %s3537_s8  ;;  %v1114_v43 = vadd.f32 %v1110_v42, %v1103_v12  ;;  %s3637_s8 = sld [smem:[#allocation8 + %s1231_s25]] }
 0x13b   : >> { %4362 = vst [vmem:[#allocation41_spill] sm:$0xff] %v3603_v23  ;;  %v1115_v25 = vadd.f32 %v1111_v33, %v1104_v11  ;;  %v1139_v55 = vmul.f32 %v1138_v45, %v2273_v0  ;;  %v1145_v14 = vstv %s3539_s6  ;;  %v1156_v58 = vstv %s3548_s16  ;;  %s1267_s6 = sadd.s32 11, %s3529_s9  ;;  %s3653_s16 = sld [smem:[#allocation8 + %s1249_s27]] }
 0x13c   : >> { %v3619_v9 = vadd.f32 %v1119_v32, %v1113_v34  ;;  %v1116_v39 = vadd.f32 %v1112_v40, %v1105_v24  ;;  %v1146_v50 = vmul.f32 %v1145_v14, %v2283_v4  ;;  %v3641_v16 = vadd.f32 %v1119_v32, %v1114_v43  ;;  %s3675_s25 = sld [smem:[#allocation8 + %s1267_s6]]  ;;  %s1390_s6 = sadd.s32 20, %s3529_s9 }
 0x13d   : >> { %v3643_v37 = vadd.f32 %v1119_v32, %v1115_v25  ;;  %v1140_v12 = vmul.f32 %v1138_v45, %v2275_v1  ;;  %v1147_v34 = vmul.f32 %v1145_v14, %v2285_v5  ;;  %v1141_v33 = vmul.f32 %v1138_v45, %v2277_v2  ;;  %s1306_s27 = sld [smem:[#allocation8 + %s1305_s22]]  ;;  %s1416_s22 = sadd.s32 22, %s3529_s9 }
 0x13e   : >> { %4363 = vst [vmem:[#allocation40_spill] sm:$0xff] %v3619_v9  ;;  %4364 = vst [vmem:[#allocation42_spill] sm:$0xff] %v3641_v16  ;;  %v3649_v42 = vadd.f32 %v1119_v32, %v1116_v39  ;;  %v1150_v11 = vadd.f32 %v1146_v50, %v1139_v55  ;;  %v1148_v24 = vmul.f32 %v1145_v14, %v2292_v7  ;;  %v3686_v50 = vstv %s3551_s4  ;;  %s1317_s4 = sld [smem:[#allocation8 + %s1316_s3]]  ;;  %s1427_s3 = sadd.s32 23, %s3529_s9 }
 0x13f   : >> { %4365 = vst [vmem:[#allocation43_spill] sm:$0xff] %v3643_v37  ;;  %v1151_v25 = vadd.f32 %v1147_v34, %v1140_v12  ;;  %v1142_v55 = vmul.f32 %v1138_v45, %v2281_v3  ;;  %v1149_v40 = vmul.f32 %v1145_v14, %v2294_v8  ;;  %v3719_v22 = vstv %s3581_s10  ;;  %s1342_s10 = sadd.s32 16, %s3529_s9 }
 0x140   : >> { %4366 = vst [vmem:[#allocation44_spill] sm:$0xff] %v3649_v42  ;;  %v3672_v38 = vadd.f32 %v1156_v58, %v1150_v11  ;;  %v1152_v26 = vadd.f32 %v1148_v24, %v1141_v33  ;;  %v3689_v11 = vstv %s3579_s0  ;;  %v3697_v24 = vsel %vm3414_vm9, %v3377_v49, %v3260_v35  ;;  %s1335_s0 = sadd.s32 15, %s3529_s9 }
 0x141   : >> { %v3683_v34 = vadd.f32 %v1156_v58, %v1151_v25  ;;  %v1153_v14 = vadd.f32 %v1149_v40, %v1142_v55  ;;  %v1177_v25 = vmul.f32 %v3686_v50, %v2273_v0  ;;  %v1184_v35 = vmul.f32 %v3689_v11, %v2283_v4 }
 0x142   : >> { %4369 = vst [vmem:[#allocation45_spill] sm:$0xff] %v3672_v38  ;;  %v3691_v33 = vadd.f32 %v1156_v58, %v1152_v26  ;;  %v3712_v49 = vstv %s3605_s7  ;;  %v3724_v56 = vstv %s3607_s2  ;;  %v3731_v54 = vstv %s3625_s13  ;;  %s1353_s7 = sadd.s32 17, %s3529_s9  ;;  %s3851_s2 = sld [smem:[#allocation8 + %s1335_s0]] }
 0x143   : >> { %4371 = vst [vmem:[#allocation47_spill] sm:$0xff] %v3683_v34  ;;  %v1202_v26 = vmul.f32 %v3712_v49, %v2273_v0  ;;  %v3726_v55 = vadd.f32 %v1156_v58, %v1153_v14  ;;  %v1188_v60 = vadd.f32 %v1184_v35, %v1177_v25  ;;  %v1209_v48 = vmul.f32 %v3724_v56, %v2283_v4  ;;  %s3871_s13 = sld [smem:[#allocation8 + %s1353_s7]] }
 0x144   : >> { %4372 = vst [vmem:[#allocation46_spill] sm:$0xff] %v3691_v33  ;;  %v3734_v40 = vstv %s3623_s26  ;;  %v1227_v10 = vmul.f32 %v3731_v54, %v2273_v0  ;;  %v3739_v32 = vstv %s3637_s8  ;;  %v3742_v33 = vstv %s3639_s29  ;;  %s3869_s26 = sld [smem:[#allocation8 + %s1342_s10]]  ;;  %s1379_s8 = sadd.s32 19, %s3529_s9 }
 0x145   : >> { %4376 = vst [vmem:[#allocation49_spill] sm:$0xff] %v3726_v55  ;;  %v1195_v34 = vadd.f32 %v3719_v22, %v1188_v60  ;;  %v1213_v45 = vadd.f32 %v1209_v48, %v1202_v26  ;;  %v1234_v58 = vmul.f32 %v3739_v32, %v2283_v4  ;;  %v3748_v14 = vstv %s3653_s16  ;;  %s3904_s29 = sld [smem:[#allocation8 + %s1372_s14]] }
 0x146   : >> { %v1252_v25 = vmul.f32 %v3748_v14, %v2273_v0  ;;  %v3753_v35 = vstv %s3655_s15  ;;  %v3756_v55 = vstv %s3675_s25  ;;  %v3759_v38 = vstv %s3677_s1  ;;  %s3910_s17 = sld [smem:[#allocation8 + %s1379_s8]]  ;;  %s1409_s15 = sadd.s32 21, %s3529_s9 }
 0x147   : >> { %v1220_v12 = vadd.f32 %v3734_v40, %v1213_v45  ;;  %v1238_v42 = vadd.f32 %v1234_v58, %v1227_v10  ;;  %v1259_v48 = vmul.f32 %v3753_v35, %v2283_v4  ;;  %v1301_v60 = vmul.f32 %v3759_v38, %v2273_v0  ;;  %s3920_s16 = sld [smem:[#allocation8 + %s1390_s6]] }
 0x148   : >> { %v3766_v26 = vstv %s1306_s27  ;;  %v3768_v39 = vstv %s1317_s4  ;;  %v3774_v37 = vsel %vm3481_vm13, %v3404_v15, %v3397_v59  ;;  %v1178_v45 = vmul.f32 %v3686_v50, %v2275_v1  ;;  %s3951_s25 = sld [smem:[#allocation8 + %s1409_s15]] }
 0x149   : >> { %v1245_v10 = vadd.f32 %v3742_v33, %v1238_v42  ;;  %v1263_v58 = vadd.f32 %v1259_v48, %v1252_v25  ;;  %v1308_v43 = vmul.f32 %v3766_v26, %v2283_v4  ;;  %v1185_v16 = vmul.f32 %v3689_v11, %v2285_v5  ;;  %s3956_s9 = sld [smem:[#allocation8 + %s1416_s22]] }
 0x14a   : >> { %v1203_v36 = vmul.f32 %v3712_v49, %v2275_v1  ;;  %v1210_v9 = vmul.f32 %v3724_v56, %v2285_v5  ;;  %v1228_v59 = vmul.f32 %v3731_v54, %v2275_v1  ;;  %v1235_v15 = vmul.f32 %v3739_v32, %v2285_v5  ;;  %s3960_s1 = sld [smem:[#allocation8 + %s1427_s3]] }
 0x14b   : >> { %v3792_v42 = vadd.f32 %v3756_v55, %v1263_v58  ;;  %v1274_v25 = vmin.f32 %v1220_v12, %v1245_v10  ;;  %v1312_v48 = vadd.f32 %v1308_v43, %v1301_v60  ;;  %v1189_v6 = vadd.f32 %v1185_v16, %v1178_v45 }
 0x14c   : >> { %v1214_v23 = vadd.f32 %v1210_v9, %v1203_v36  ;;  %v1239_v47 = vadd.f32 %v1235_v15, %v1228_v59  ;;  %v1253_v31 = vmul.f32 %v3748_v14, %v2275_v1  ;;  %v1260_v51 = vmul.f32 %v3753_v35, %v2285_v5 }
 0x14d   : >> { %v1278_v62 = vmin.f32 %v1195_v34, %v1274_v25  ;;  %vm1286_vm6 = vcmp.lt.f32.partialorder %v3792_v42, %v3697_v24  ;;  %v1319_v44 = vadd.f32 %v3768_v39, %v1312_v48  ;;  %v1196_v58 = vadd.f32 %v3719_v22, %v1189_v6 }
 0x14e   : >> { %v1221_v43 = vadd.f32 %v3734_v40, %v1214_v23  ;;  %v1246_v36 = vadd.f32 %v3742_v33, %v1239_v47  ;;  %v1264_v9 = vadd.f32 %v1260_v51, %v1253_v31  ;;  %v1302_v16 = vmul.f32 %v3759_v38, %v2275_v1  ;;  %v4417_v51 = vld [vmem:[#allocation47_spill] sm:$0xff] }
 0x14f   : >> { %vm1282_vm7 = vcmp.gt.f32.partialorder %v1278_v62, 0.0  ;;  %v1309_v12 = vmul.f32 %v3766_v26, %v2285_v5  ;;  %v3812_v34 = vsel %vm3557_vm1, %v3470_v27, %v3422_v30  ;;  %v1179_v6 = vmul.f32 %v3686_v50, %v2277_v2 }
 0x150   : >> { %vm3816_vm8 = vmand %vm1282_vm7, %vm1286_vm6  ;;  %v3821_v47 = vadd.f32 %v3756_v55, %v1264_v9  ;;  %v1275_v62 = vmin.f32 %v1221_v43, %v1246_v36  ;;  %v1186_v31 = vmul.f32 %v3689_v11, %v2292_v7  ;;  %v1204_v30 = vmul.f32 %v3712_v49, %v2277_v2 }
 0x151   : >> { %v4379_v27 = vsel %vm3414_vm9, %v3386_v29, %v2966_v61  ;;  %v1313_v60 = vadd.f32 %v1309_v12, %v1302_v16  ;;  %v1211_v45 = vmul.f32 %v3724_v56, %v2292_v7  ;;  %v1229_v10 = vmul.f32 %v3731_v54, %v2277_v2 }
 0x152   : >> { %v1327_v23 = vsel %vm3816_vm8, %v1319_v44, %v4379_v27  ;;  %v1279_v59 = vmin.f32 %v1196_v58, %v1275_v62  ;;  %vm1287_vm10 = vcmp.lt.f32.partialorder %v3821_v47, %v3774_v37  ;;  %v1190_v15 = vadd.f32 %v1186_v31, %v1179_v6 }
 0x153   : >> { %1331 = vst [vmem:[%s2299_s24] sm:$0xff] %v1327_v23  ;;  %v1236_v25 = vmul.f32 %v3739_v32, %v2292_v7  ;;  %v1320_v61 = vadd.f32 %v3768_v39, %v1313_v60  ;;  %v1215_v44 = vadd.f32 %v1211_v45, %v1204_v30  ;;  %v1254_v29 = vmul.f32 %v3748_v14, %v2277_v2 }
 0x154   : >> { %v1261_v48 = vmul.f32 %v3753_v35, %v2292_v7  ;;  %vm1283_vm4 = vcmp.gt.f32.partialorder %v1279_v59, 0.0  ;;  %v1197_v58 = vadd.f32 %v3719_v22, %v1190_v15  ;;  %v1303_v36 = vmul.f32 %v3759_v38, %v2277_v2 }
 0x155   : >> { %v1240_v43 = vadd.f32 %v1236_v25, %v1229_v10  ;;  %vm3856_vm5 = vmand %vm1283_vm4, %vm1287_vm10  ;;  %v1222_v16 = vadd.f32 %v3734_v40, %v1215_v44  ;;  %v1310_v6 = vmul.f32 %v3766_v26, %v2292_v7  ;;  %v3867_v62 = vsel %vm3570_vm3, %v3524_v46, %v3460_v20 }
 0x156   : >> { %v1265_v12 = vadd.f32 %v1261_v48, %v1254_v29  ;;  %v4382_v31 = vsel %vm3481_vm13, %v3445_v17, %v3031_v53  ;;  %v1180_v23 = vmul.f32 %v3686_v50, %v2281_v3  ;;  %v1187_v20 = vmul.f32 %v3689_v11, %v2294_v8 }
 0x157   : >> { %v1328_v30 = vsel %vm3856_vm5, %v1320_v61, %v4382_v31  ;;  %v1247_v27 = vadd.f32 %v3742_v33, %v1240_v43  ;;  %v1314_v60 = vadd.f32 %v1310_v6, %v1303_v36  ;;  %v1205_v53 = vmul.f32 %v3712_v49, %v2281_v3 }
 0x158   : >> { %1332 = vst [vmem:[%s2299_s24 + $0x8] sm:$0xff] %v1328_v30  ;;  %v3888_v46 = vadd.f32 %v3756_v55, %v1265_v12  ;;  %v1212_v17 = vmul.f32 %v3724_v56, %v2294_v8  ;;  %v1191_v10 = vadd.f32 %v1187_v20, %v1180_v23  ;;  %v1230_v50 = vmul.f32 %v3731_v54, %v2281_v3 }
 0x159   : >> { %v1276_v45 = vmin.f32 %v1222_v16, %v1247_v27  ;;  %v1237_v11 = vmul.f32 %v3739_v32, %v2294_v8  ;;  %v1321_v59 = vadd.f32 %v3768_v39, %v1314_v60  ;;  %v1255_v49 = vmul.f32 %v3748_v14, %v2281_v3 }
 0x15a   : >> { %vm1288_vm11 = vcmp.lt.f32.partialorder %v3888_v46, %v3812_v34  ;;  %v1216_v15 = vadd.f32 %v1212_v17, %v1205_v53  ;;  %v1198_v54 = vadd.f32 %v3719_v22, %v1191_v10  ;;  %v1262_v32 = vmul.f32 %v3753_v35, %v2294_v8 }
 0x15b   : >> { %v1280_v56 = vmin.f32 %v1197_v58, %v1276_v45  ;;  %v1241_v25 = vadd.f32 %v1237_v11, %v1230_v50  ;;  %v1304_v14 = vmul.f32 %v3759_v38, %v2281_v3  ;;  %v1311_v44 = vmul.f32 %v3766_v26, %v2294_v8 }
 0x15c   : >> { %v1223_v61 = vadd.f32 %v3734_v40, %v1216_v15  ;;  %v1337_v29 = vstv %s3851_s2  ;;  %v1266_v48 = vadd.f32 %v1262_v32, %v1255_v49  ;;  %v1344_v26 = vstv %s3869_s26 }
 0x15d   : >> { %vm1284_vm12 = vcmp.gt.f32.partialorder %v1280_v56, 0.0  ;;  %v1248_v22 = vadd.f32 %v3742_v33, %v1241_v25  ;;  %v1338_v35 = vmul.f32 %v1337_v29, %v2273_v0  ;;  %v1315_v40 = vadd.f32 %v1311_v44, %v1304_v14  ;;  %v4389_v25 = vld [vmem:[#allocation27_spill] sm:$0xff] }
 0x15e   : >> { %vm3926_vm14 = vmand %vm1284_vm12, %vm1288_vm11  ;;  %v1355_v58 = vstv %s3871_s13  ;;  %v1339_v43 = vmul.f32 %v1337_v29, %v2275_v1  ;;  %v4385_v33 = vsel %vm3557_vm1, %v3501_v52, %v3118_v57  ;;  %v3942_v16 = vadd.f32 %v3756_v55, %v1266_v48  ;;  %v4395_v48 = vld [vmem:[#allocation28_spill] sm:$0xff] }
 0x15f   : >> { %v1329_v36 = vsel %vm3926_vm14, %v1321_v59, %v4385_v33  ;;  %v1277_v12 = vmin.f32 %v1223_v61, %v1248_v22  ;;  %v1345_v6 = vmul.f32 %v1344_v26, %v2283_v4  ;;  %v1322_v31 = vadd.f32 %v3768_v39, %v1315_v40 }
 0x160   : >> { %1333 = vst [vmem:[%s2299_s24 + $0x10] sm:$0xff] %v1329_v36  ;;  %v1346_v30 = vmul.f32 %v1344_v26, %v2285_v5  ;;  %v1340_v27 = vmul.f32 %v1337_v29, %v2277_v2  ;;  %v1347_v57 = vmul.f32 %v1344_v26, %v2292_v7  ;;  %vm1289_vm15 = vcmp.lt.f32.partialorder %v3942_v16, %v3867_v62 }
 0x161   : >> { %v1281_v52 = vmin.f32 %v1198_v54, %v1277_v12  ;;  %v1349_v55 = vadd.f32 %v1345_v6, %v1338_v35  ;;  %v1341_v23 = vmul.f32 %v1337_v29, %v2281_v3  ;;  %v1348_v60 = vmul.f32 %v1344_v26, %v2294_v8 }
 0x162   : >> { %v1350_v20 = vadd.f32 %v1346_v30, %v1339_v43  ;;  %v1351_v39 = vadd.f32 %v1347_v57, %v1340_v27  ;;  %v1374_v53 = vstv %s3904_s29  ;;  %v1381_v10 = vstv %s3910_s17  ;;  %v4398_v30 = vld [vmem:[#allocation29_spill] sm:$0xff] }
 0x163   : >> { %vm1285_vm0 = vcmp.gt.f32.partialorder %v1281_v52, 0.0  ;;  %v1356_v17 = vadd.f32 %v1355_v58, %v1349_v55  ;;  %v1375_v45 = vmul.f32 %v1374_v53, %v2273_v0  ;;  %v1352_v15 = vadd.f32 %v1348_v60, %v1341_v23 }
 0x164   : >> { %vm3964_vm2 = vmand %vm1285_vm0, %vm1289_vm15  ;;  %v1357_v11 = vadd.f32 %v1355_v58, %v1350_v20  ;;  %v1358_v59 = vadd.f32 %v1355_v58, %v1351_v39  ;;  %v1382_v49 = vmul.f32 %v1381_v10, %v2283_v4  ;;  %v4388_v56 = vsel %vm3570_vm3, %v3532_v63, %v3127_v41  ;;  %v4391_v41 = vld [vmem:[#allocation38_spill] sm:$0xff] }
 0x165   : >> { %v1330_v54 = vsel %vm3964_vm2, %v1322_v31, %v4388_v56  ;;  %v4390_v32 = vsel %vm3414_vm9, %v3561_v28, %v4389_v25  ;;  %v1392_v14 = vstv %s3920_s16  ;;  %v1376_v44 = vmul.f32 %v1374_v53, %v2275_v1  ;;  %v4392_v63 = vld [vmem:[#allocation26_spill] sm:$0xff]  ;;  %v4394_v28 = vld [vmem:[#allocation39_spill] sm:$0xff]  ;;  %v4397_v31 = vld [vmem:[#allocation41_spill] sm:$0xff] }
 0x166   : >> { %v1364_v61 = vsel %vm3816_vm8, %v1356_v17, %v4390_v32  ;;  %1334 = vst [vmem:[%s2299_s24 + $0x18] sm:$0xff] %v1330_v54  ;;  %v4393_v29 = vsel %vm3481_vm13, %v4391_v41, %v4392_v63  ;;  %v4396_v35 = vsel %vm3557_vm1, %v4394_v28, %v4395_v48  ;;  %v1359_v26 = vadd.f32 %v1355_v58, %v1352_v15  ;;  %v4401_v17 = vld [vmem:[#allocation30_spill] sm:$0xff]  ;;  %v4406_v48 = vld [vmem:[#allocation43_spill] sm:$0xff] }
 0x167   : >> { %1706 = vst [vmem:[%s2299_s24 + $0x20] sm:$0xff] %v1364_v61  ;;  %v1365_v22 = vsel %vm3856_vm5, %v1357_v11, %v4393_v29  ;;  %v1366_v40 = vsel %vm3926_vm14, %v1358_v59, %v4396_v35  ;;  %v1386_v43 = vadd.f32 %v1382_v49, %v1375_v45  ;;  %v1383_v33 = vmul.f32 %v1381_v10, %v2285_v5  ;;  %v4403_v63 = vld [vmem:[#allocation42_spill] sm:$0xff]  ;;  %v4404_v29 = vld [vmem:[#allocation31_spill] sm:$0xff]  ;;  %v4407_v35 = vld [vmem:[#allocation32_spill] sm:$0xff] }
 0x168   : >> { %1707 = vst [vmem:[%s2299_s24 + $0x28] sm:$0xff] %v1365_v22  ;;  %1708 = vst [vmem:[%s2299_s24 + $0x30] sm:$0xff] %v1366_v40  ;;  %v1377_v36 = vmul.f32 %v1374_v53, %v2277_v2  ;;  %v1384_v12 = vmul.f32 %v1381_v10, %v2292_v7  ;;  %v1378_v6 = vmul.f32 %v1374_v53, %v2281_v3  ;;  %v1411_v55 = vstv %s3951_s25  ;;  %v4400_v53 = vld [vmem:[#allocation40_spill] sm:$0xff] }
 0x169   : >> { %v4399_v27 = vsel %vm3570_vm3, %v4397_v31, %v4398_v30  ;;  %v1393_v57 = vadd.f32 %v1392_v14, %v1386_v43  ;;  %v1385_v52 = vmul.f32 %v1381_v10, %v2294_v8  ;;  %v1387_v23 = vadd.f32 %v1383_v33, %v1376_v44  ;;  %v4409_v33 = vld [vmem:[#allocation44_spill] sm:$0xff] }
 0x16a   : >> { %v1367_v58 = vsel %vm3964_vm2, %v1359_v26, %v4399_v27  ;;  %v1388_v20 = vadd.f32 %v1384_v12, %v1377_v36  ;;  %v1412_v39 = vmul.f32 %v1411_v55, %v2273_v0  ;;  %v1418_v60 = vstv %s3956_s9  ;;  %v4410_v36 = vld [vmem:[#allocation33_spill] sm:$0xff] }
 0x16b   : >> { %1709 = vst [vmem:[%s2299_s24 + $0x38] sm:$0xff] %v1367_v58  ;;  %v4402_v45 = vsel %vm3414_vm9, %v4400_v53, %v4401_v17  ;;  %v1389_v59 = vadd.f32 %v1385_v52, %v1378_v6  ;;  %v1419_v15 = vmul.f32 %v1418_v60, %v2283_v4  ;;  %v1429_v10 = vstv %s3960_s1 }
 0x16c   : >> { %v1401_v11 = vsel %vm3816_vm8, %v1393_v57, %v4402_v45  ;;  %v1394_v49 = vadd.f32 %v1392_v14, %v1387_v23  ;;  %v1395_v56 = vadd.f32 %v1392_v14, %v1388_v20  ;;  %v1413_v54 = vmul.f32 %v1411_v55, %v2275_v1  ;;  %v4412_v23 = vld [vmem:[#allocation45_spill] sm:$0xff]  ;;  %v4413_v20 = vld [vmem:[#allocation34_spill] sm:$0xff] }
 0x16d   : >> { %1714 = vst [vmem:[%s2299_s24 + $0x40] sm:$0xff] %v1401_v11  ;;  %v1420_v25 = vmul.f32 %v1418_v60, %v2285_v5  ;;  %v1396_v32 = vadd.f32 %v1392_v14, %v1389_v59  ;;  %v1423_v61 = vadd.f32 %v1419_v15, %v1412_v39  ;;  %v1414_v44 = vmul.f32 %v1411_v55, %v2277_v2  ;;  %v4420_v45 = vld [vmem:[#allocation46_spill] sm:$0xff] }
 0x16e   : >> { %v1421_v41 = vmul.f32 %v1418_v60, %v2292_v7  ;;  %v4405_v22 = vsel %vm3481_vm13, %v4403_v63, %v4404_v29  ;;  %v4408_v40 = vsel %vm3557_vm1, %v4406_v48, %v4407_v35  ;;  %v1415_v43 = vmul.f32 %v1411_v55, %v2281_v3 }
 0x16f   : >> { %v1402_v28 = vsel %vm3856_vm5, %v1394_v49, %v4405_v22  ;;  %v1403_v14 = vsel %vm3926_vm14, %v1395_v56, %v4408_v40  ;;  %v1424_v26 = vadd.f32 %v1420_v25, %v1413_v54  ;;  %v4411_v12 = vsel %vm3570_vm3, %v4409_v33, %v4410_v36 }
 0x170   : >> { %1715 = vst [vmem:[%s2299_s24 + $0x48] sm:$0xff] %v1402_v28  ;;  %1716 = vst [vmem:[%s2299_s24 + $0x50] sm:$0xff] %v1403_v14  ;;  %v1404_v6 = vsel %vm3964_vm2, %v1396_v32, %v4411_v12  ;;  %v1430_v31 = vadd.f32 %v1429_v10, %v1423_v61  ;;  %v1425_v30 = vadd.f32 %v1421_v41, %v1414_v44 }
 0x171   : >> { %v1422_v27 = vmul.f32 %v1418_v60, %v2294_v8  ;;  %1717 = vst [vmem:[%s2299_s24 + $0x58] sm:$0xff] %v1404_v6  ;;  %v1431_v58 = vadd.f32 %v1429_v10, %v1424_v26  ;;  %v1294_v57 = vsel %vm3816_vm8, %v3792_v42, %v3697_v24  ;;  %v1295_v52 = vsel %vm3856_vm5, %v3821_v47, %v3774_v37  ;;  %v4416_v47 = vld [vmem:[#allocation49_spill] sm:$0xff] }
 0x172   : >> { %v1296_v55 = vsel %vm3926_vm14, %v3888_v46, %v3812_v34  ;;  %v4414_v39 = vsel %vm3414_vm9, %v4412_v23, %v4413_v20  ;;  %v1432_v24 = vadd.f32 %v1429_v10, %v1425_v30  ;;  %1446 = vst [vmem:[#allocation2] sm:$0xff] %v1294_v57  ;;  %1447 = vst [vmem:[#allocation2 + $0x8] sm:$0xff] %v1295_v52  ;;  %v4415_v34 = vld [vmem:[#allocation37_spill] sm:$0xff]  ;;  %v4418_v46 = vld [vmem:[#allocation35_spill] sm:$0xff] }
 0x173   : >> { %v1438_v60 = vsel %vm3816_vm8, %v1430_v31, %v4414_v39  ;;  %v1426_v42 = vadd.f32 %v1422_v27, %v1415_v43  ;;  %1448 = vst [vmem:[#allocation2 + $0x10] sm:$0xff] %v1296_v55  ;;  %v1297_v37 = vsel %vm3964_vm2, %v3942_v16, %v3867_v62  ;;  %v1168_v21 = vsel %vm3570_vm3, %v4416_v47, %v4415_v34  ;;  %v4421_v62 = vld [vmem:[#allocation36_spill] sm:$0xff] }
 0x174   : >> { %1722 = vst [vmem:[%s2299_s24 + $0x60] sm:$0xff] %v1438_v60  ;;  %v4419_v53 = vsel %vm3481_vm13, %v4417_v51, %v4418_v46  ;;  %1449 = vst [vmem:[#allocation2 + $0x18] sm:$0xff] %v1297_v37  ;;  %v4422_v16 = vsel %vm3557_vm1, %v4420_v45, %v4421_v62 }
 0x175   : >> { %v1439_v17 = vsel %vm3856_vm5, %v1431_v58, %v4419_v53  ;;  %v1440_v13 = vsel %vm3926_vm14, %v1432_v24, %v4422_v16  ;;  %v1433_v11 = vadd.f32 %v1429_v10, %v1426_v42 }
 0x176   : >> { %1723 = vst [vmem:[%s2299_s24 + $0x68] sm:$0xff] %v1439_v17  ;;  %1724 = vst [vmem:[%s2299_s24 + $0x70] sm:$0xff] %v1440_v13 }
 0x177   : >> { %v1441_v18 = vsel %vm3964_vm2, %v1433_v11, %v1168_v21 }
 0x178   : >> { %1725 = vst [vmem:[%s2299_s24 + $0x78] sm:$0xff] %v1441_v18 }
 0x179 PF: >> { %s332_s11 = sadd.s32 1, %s2049_s11  }
 0x17a   : >> { %p331_p8 = scmp.ge.s32.totalorder %s332_s11, %s2290_s12 }
 0x17c   : > { %334 = sbr.rel (!%p331_p8) target bundleno = 154 (0x9a), region = 112 }
 0x183 PF: > { %v1450_v19 = vld [vmem:[#allocation2] sm:$0xff]  ;;  %v1451_v9 = vld [vmem:[#allocation2 + $0x8] sm:$0xff]  ;;  %v1452_v38 = vld [vmem:[#allocation2 + $0x10] sm:$0xff]  ;;  %s1738_s27 = smul.u32 2560, %s2037_s21  ;;  %s1487_s4 = sshll.u32 %s2299_s24, 4  ;;  %v4423_v59 = vmov 0.0   ;;  %s4120_s4 = int_to_ptr.vmem [resolvable:$true] %s1487_s4 }
 0x184   : > { %vm1454_vm9 = vcmp.lt.f32.partialorder %v1450_v19, inf  ;;  %vm1455_vm13 = vcmp.lt.f32.partialorder %v1451_v9, inf  ;;  %vm1456_vm1 = vcmp.lt.f32.partialorder %v1452_v38, inf  ;;  %v1453_v50 = vld [vmem:[#allocation2 + $0x18] sm:$0xff]  ;;  %s4424_s21 = sand.u32 1, %s2029_s19   ;;  %s1943_s7 = scalar_lea.vmem %s4120_s4, 2560 }
 0x185   : > { %v1726_v15 = vsel %vm1454_vm9, 1.0, %v4423_v59  ;;  %v1727_v0 = vsel %vm1455_vm13, 1.0, %v4423_v59  ;;  %v1728_v1 = vsel %vm1456_vm1, 1.0, %v4423_v59  ;;  %vm1457_vm3 = vcmp.lt.f32.partialorder %v1453_v50, inf  ;;  %s4118_s0 = scalar_lea.hbm %s4180_s5, %s1738_s27  ;;  %s4129_s10 = scalar_lea.sflag [#allocation5], %s4424_s21 }
 0x186   : > { %1730 = vst [vmem:[%s2299_s24 + $0x80] sm:$0xff] %v1726_v15  ;;  %1731 = vst [vmem:[%s2299_s24 + $0x88] sm:$0xff] %v1727_v0  ;;  %v1729_v2 = vsel %vm1457_vm3, 1.0, %v4423_v59  ;;  %p1944_p2 = scmp.ne.s32.totalorder %s4120_s4, %s1943_s7  ;;  %p4425_p3 = scmp.ne.s32.totalorder %s4242_s28, 0 }
 0x187   : > { %1732 = vst [vmem:[%s2299_s24 + $0x90] sm:$0xff] %v1728_v1  ;;  %1733 = vst [vmem:[%s2299_s24 + $0x98] sm:$0xff] %v1729_v2  ;;  %s2060_s2 = smov [#allocation14]  }
 0x188   : > { %p1945_p5 = pnand %p1944_p2, %p4425_p3  ;;  %s1947_s26 = sshll.u32 %s2060_s2, 4  ;;  %s1948_s26 = int_to_ptr.vmem [resolvable:$false] %s1947_s26 }
 0x189   : > { %s1949_s13 = scalar_lea.vmem %s1948_s26, 5120  ;;  %p1950_p7 = scmp.lt.s32.totalorder %s4120_s4, %s1948_s26 }
 0x18a   : > { %p1946_p6 = pneg %p1945_p5  ;;  %p1951_p0 = scmp.lt.s32.totalorder %s1949_s13, %s1943_s7 }
 0x18c   : > { %p1952_p9 = por %p1951_p0, %p1950_p7 }
 0x18e   : > { %p1953_p12 = pnand %p1952_p9, %p1946_p6 }
 0x190   : > { %1956 = shalt.err (!%p1953_p12)
}
 0x191   : > { %s1957_s24 = scalar_lea.hbm %s4118_s0, 2560  ;;  %s1961_s29 = scalar_lea.hbm %s4180_s5, 5120 }
 0x192   : > { %p1958_p4 = scmp.ne.s32.totalorder %s4118_s0, %s1957_s24  ;;  %p1962_p13 = scmp.lt.u32.totalorder %s4118_s0, %s4180_s5 }
 0x193   : > { %p1963_p1 = scmp.lt.u32.totalorder %s1961_s29, %s1957_s24  ;;  %p1965_p2 = scmp.lt.u32.totalorder %s1957_s24, %s4118_s0 }
 0x194   : > { %p1959_p10 = pnand %p1958_p4, %p4425_p3 }
 0x195   : > { %p1964_p8 = por %p1963_p1, %p1962_p13 }
 0x196   : > { %p1960_p11 = pneg %p1959_p10 }
 0x197   : > { %p1966_p5 = por %p1965_p2, %p1964_p8 }
 0x199   : > { %p1967_p6 = pnand %p1966_p5, %p1960_p11 }
 0x19b   : > { %1970 = shalt.err (!%p1967_p6)
}
 0x19c   : > { %s2061_s16 = smov 128   ;;  %s2062_s15 = smov 8  }
 0x19d   : > { %1759 = dma.vmem_to_hbm [thread:$0]  (%p4425_p3), %s4120_s4, 2560, %s4118_s0, %s4129_s10, %s2061_s16, %s2061_s16, %s2062_s15  }
 0x19e PF: > { %p1791_p7 = scmp.ge.s32.totalorder %s2045_s23, 2  ;;  %s1502_s22 = sand.u32 1, %s2025_s18  }
 0x19f   : > { %p4426_p0 = scmp.ne.s32.totalorder %s4243_s30, 0  ;;  %s1503_s3 = scalar_lea.sflag [#allocation5], %s1502_s22 }
 0x1a1   : > { %p1778_p9 = pnand %p1791_p7, %p4426_p0 }
 0x1a3   : > { %2020 = dma.done.wait (!%p1778_p9), %s1503_s3, 2560  }
 0x1a4   : > { %2022 = vsyncadd (!%p1778_p9), %s1503_s3, 4294964736  ;;  %s23_s23 = sadd.s32 1, %s2045_s23   ;;  %s4427_s25 = sld [smem:[#allocation23_spill]] }
 0x1a5   : > { %p20_p12 = scmp.ge.s32.totalorder %s23_s23, 4   ;;  %s4428_s21 = sld [smem:[#allocation21_spill]] }
 0x1a6   : > { %s4429_s22 = sld [smem:[#allocation22_spill]]  ;;  %s4430_s18 = smov %s2029_s19 }
 0x1a7   : > { %s4431_s19 = smov %s2033_s20  ;;  %22 = sbr.rel (!%p20_p12) target bundleno = 15 (0xf), region = 123 }
 0x1aa   : > { %s4432_s20 = smov %s4427_s25 }
 0x1ae   :  { %1508 = vsyncpa [#allocation4], 1 }
 0x1af   :  { %1510 = vsyncpa [#allocation4 + $0x1], 1 }
 0x1b0   :  { %1511 = vsyncpa [#allocation5], 1 }
 0x1b1   :  { %1513 = vsyncpa [#allocation5 + $0x1], 1 }
 0x1b2   :  { %1514 = vsyncpa [#allocation6], 1 }
 0x1b3   :  { %1516 = vsyncpa [#allocation6 + $0x1], 1 }
 0x1b4   :  { %1517 = vsyncpa [#allocation9], 1 }
 0x1b5   :  { %1518 = vsyncpa [#allocation7], 1 }
 0x1b6   :  { %1520 = vsyncpa [#allocation7 + $0x1], 1 }
 0x1b7   :  { %1521 = vsyncpa [#allocation12], 1 }

</bundles_post_ra>
